<compile_context>
chip_gen: v6e
topology: v6e:2x2x1
jax: 0.10.0
libtpu: 0.0.40
codegen_flags: <defaults>
</compile_context>

<pallas_src>
import jax
import jax.numpy as jnp
from jax.experimental import pallas as pl
from jax.experimental.pallas import tpu as pltpu


NEG_INF = -1e30  # masks padded classifier lanes (exp underflows to 0)


# ------------------------- fused Pallas kernel -------------------------

def make_fused_kernel(T, Vp, E, H, L, Cp):
    """Builds the fused BiLSTM kernel for static (T, Vp, E, H, L, Cp)."""
    H4 = 4 * H

    def kernel(*refs):
        idx = 0
        ids_ref = refs[idx]; idx += 1            # VMEM (T, 1) int32 token ids
        emb_ref = refs[idx]; idx += 1            # VMEM (Vp, E) bf16 embedding
        layer_refs = []
        for _ in range(L):                       # per layer:
            layer_refs.append((refs[idx],        #   wih_cat (D_in, 8H) bf16
                               refs[idx + 1],    #   whh_cat (H, 8H)    bf16
                               refs[idx + 2]))   #   b_cat   (1, 8H)    f32
            idx += 3
        wcls_ref = refs[idx]; idx += 1           # (2H, Cp) bf16
        bcls_ref = refs[idx]; idx += 1           # (1, Cp)  f32
        out_ref = refs[idx]; idx += 1            # (T, Cp) output
        x_scr = refs[idx]; idx += 1              # (T, E)   embedded input
        xg_scr = refs[idx]; idx += 1             # (T, 8H)  batched input proj
        xg2_scr = refs[idx]; idx += 1            # (2T, 4H) interleaved gates
        h_stage = refs[idx]; idx += 1            # (2T, H)  per-step h staging
        act_scrs = refs[idx:idx + L]             # L x (T, 2H) layer outputs

        # ---- 1. embedding gather as ONE one-hot MXU matmul ----------------
        # (OOB-safe: an id >= Vp would simply hit no column -> zero row.)
        ids = ids_ref[...]                                        # (T, 1) i32
        onehot = (jax.lax.broadcasted_iota(jnp.int32, (T, Vp), 1) == ids
                  ).astype(jnp.float32)                           # (T, Vp)
        x_scr[...] = jnp.dot(onehot, emb_ref[...].astype(jnp.float32),
                             preferred_element_type=jnp.float32)
        # emb_dropout: eval-mode identity.

        # row mask used to pick each direction's half of the recurrent proj
        row_is_fwd = jax.lax.broadcasted_iota(jnp.int32, (2, H4), 0) == 0

        # ---- 2. stacked bidirectional LSTM layers --------------------------
        layer_in = x_scr
        for l in range(L):
            wih_ref, whh_ref, b_ref = layer_refs[l]
            act_ref = act_scrs[l]

            # Batched input projection for BOTH directions at once (MXU):
            # columns [0:4H) = fwd gates, [4H:8H) = bwd gates, order i,f,g,o.
            xg_scr[...] = (jnp.dot(layer_in[...],
                                   wih_ref[...].astype(jnp.float32),
                                   preferred_element_type=jnp.float32)
                           + b_ref[...])

            # One static reshuffle per layer (off the critical path):
            # row 2t   = fwd input-gates at time t
            # row 2t+1 = bwd input-gates at time T-1-t
            for t in range(T):
                xg2_scr[pl.ds(2 * t, 1), :] = xg_scr[pl.ds(t, 1), pl.ds(0, H4)]
                xg2_scr[pl.ds(2 * t + 1, 1), :] = (
                    xg_scr[pl.ds(T - 1 - t, 1), pl.ds(H4, H4)])

            whh = whh_ref[...].astype(jnp.float32)   # (H, 8H), loaded once

            def step(t, carry, whh=whh):
                h, c = carry                         # (2, H): row0=fwd, row1=bwd
                row = pl.multiple_of(2 * t, 2)
                # one MXU push covers both directions' recurrent projection
                r = jnp.dot(h, whh, preferred_element_type=jnp.float32)  # (2,8H)
                # pick the matching direction block per row (the two halves
                # are vreg-aligned 128-lane slabs; cross blocks are discarded)
                r_sel = jnp.where(row_is_fwd, r[:, :H4], r[:, H4:])      # (2,4H)
                g = xg2_scr[pl.ds(row, 2), :] + r_sel                    # (2,4H)
                # full-width nonlinearities: 2 EUP pushes for all gates
                sig = jax.nn.sigmoid(g)
                th = jnp.tanh(g)
                c_new = sig[:, H:2 * H] * c + sig[:, 0:H] * th[:, 2 * H:3 * H]
                h_new = sig[:, 3 * H:4 * H] * jnp.tanh(c_new)
                # ONE coalesced store per step, single dynamic address
                h_stage[pl.ds(row, 2), :] = h_new
                return (h_new, c_new)

            init = (jnp.zeros((2, H), jnp.float32),
                    jnp.zeros((2, H), jnp.float32))
            jax.lax.fori_loop(0, T, step, init, unroll=True)

            # Un-interleave into the (T, 2H) layer output in one static pass
            # (fwd at time t = row 2t; bwd at time t = row 2(T-1-t)+1).
            for t in range(T):
                act_ref[pl.ds(t, 1), pl.ds(0, H)] = h_stage[pl.ds(2 * t, 1), :]
                act_ref[pl.ds(t, 1), pl.ds(H, H)] = (
                    h_stage[pl.ds(2 * (T - 1 - t) + 1, 1), :])
            layer_in = act_ref
            # inter-layer LSTM dropout: eval-mode identity.

        # ---- 3. classifier + log_softmax (lane-dense, padded to Cp) --------
        # c_dropout: eval-mode identity.
        logits = (jnp.dot(layer_in[...], wcls_ref[...].astype(jnp.float32),
                          preferred_element_type=jnp.float32)
                  + bcls_ref[...])
        m = jnp.max(logits, axis=-1, keepdims=True)
        z = logits - m
        lse = jnp.log(jnp.sum(jnp.exp(z), axis=-1, keepdims=True))
        out_ref[...] = z - lse

    return kernel


# ------------------------- wrapper -------------------------

def bilstm_forward(token_ids, params):
    T = token_ids.shape[0]
    emb = params["embedding_pad"]
    Vp, E = emb.shape
    L = len(params["lstm"])
    H = params["hidden_dim"]
    C = params["num_classes"]
    Cp = params["cls_b_pad"].shape[1]

    vmem = pl.BlockSpec(memory_space=pltpu.MemorySpace.VMEM)

    flat_w = []
    for layer in params["lstm"]:
        flat_w += [layer["wih_cat"], layer["whh_cat"], layer["b_cat"]]

    ids2d = token_ids.astype(jnp.int32).reshape(T, 1)

    # NOTE: for production vocab sizes the embedding table should live in HBM
    # (memory_space=pl.ANY) with a DMA gather, and a batch grid axis with
    # dimension_semantics=("parallel",) would use the 2nd v7x TensorCore.
    out_pad = pl.pallas_call(
        make_fused_kernel(T, Vp, E, H, L, Cp),
        out_shape=jax.ShapeDtypeStruct((T, Cp), jnp.float32),
        in_specs=[vmem, vmem] + [vmem] * (3 * L) + [vmem, vmem],
        out_specs=vmem,
        scratch_shapes=([pltpu.VMEM((T, E), jnp.float32),
                         pltpu.VMEM((T, 8 * H), jnp.float32),
                         pltpu.VMEM((2 * T, 4 * H), jnp.float32),
                         pltpu.VMEM((2 * T, H), jnp.float32)]
                        + [pltpu.VMEM((T, 2 * H), jnp.float32)] * L),
    )(ids2d, emb, *flat_w, params["cls_w_pad"], params["cls_b_pad"])
    return out_pad[:, :C]


# ------------------------- pure-JAX reference -------------------------

def _lstm_dir_ref(x, wih_t, whh_t, b):
    H = whh_t.shape[0]

    def step(carry, xt):
        h, c = carry
        g = xt @ wih_t + h @ whh_t + b
        i = jax.nn.sigmoid(g[0:H])
        f = jax.nn.sigmoid(g[H:2 * H])
        gg = jnp.tanh(g[2 * H:3 * H])
        o = jax.nn.sigmoid(g[3 * H:4 * H])
        c = f * c + i * gg
        h = o * jnp.tanh(c)
        return (h, c), h

    _, hs = jax.lax.scan(step, (jnp.zeros(H), jnp.zeros(H)), x)
    return hs


def bilstm_reference(token_ids, params):
    H = params["hidden_dim"]
    C = params["num_classes"]
    x = params["embedding_pad"][token_ids].astype(jnp.float32)
    for layer in params["lstm"]:
        wih = layer["wih_cat"].astype(jnp.float32)
        whh = layer["whh_cat"].astype(jnp.float32)
        b = layer["b_cat"][0]
        hf = _lstm_dir_ref(x, wih[:, :4 * H], whh[:, :4 * H], b[:4 * H])
        hb = _lstm_dir_ref(x[::-1], wih[:, 4 * H:], whh[:, 4 * H:], b[4 * H:])[::-1]
        x = jnp.concatenate([hf, hb], axis=-1)
    logits = (x @ params["cls_w_pad"].astype(jnp.float32)[:, :C]
              + params["cls_b_pad"][0, :C])
    return jax.nn.log_softmax(logits, axis=-1)


# ------------------------- deterministic params -------------------------

def init_params(key, vocab, embed_dim, hidden_dim, num_layers, num_classes):
    n_keys = 1 + num_layers * 2 * 4 + 2
    keys = jax.random.split(key, n_keys)
    ki = iter(range(n_keys))

    # Synthetic w2v embedding table (from_pretrained keeps the padding row).
    # Rows padded to a lane/sublane-friendly multiple of 128 for the one-hot
    # gather matmul; extra rows are zero and never selected.
    emb = jax.random.normal(keys[next(ki)], (vocab, embed_dim), jnp.float32) * 0.1
    v_pad = max(128, ((vocab + 127) // 128) * 128)
    emb_pad = (jnp.zeros((v_pad, embed_dim), jnp.float32)
               .at[:vocab].set(emb).astype(jnp.bfloat16))

    k = hidden_dim ** -0.5
    lstm_layers = []
    in_dim = embed_dim
    for _ in range(num_layers):
        parts = {}
        for d in ("fwd", "bwd"):
            wih = jax.random.uniform(keys[next(ki)], (4 * hidden_dim, in_dim),
                                     jnp.float32, -k, k)
            whh = jax.random.uniform(keys[next(ki)], (4 * hidden_dim, hidden_dim),
                                     jnp.float32, -k, k)
            bih = jax.random.uniform(keys[next(ki)], (4 * hidden_dim,),
                                     jnp.float32, -k, k)
            bhh = jax.random.uniform(keys[next(ki)], (4 * hidden_dim,),
                                     jnp.float32, -k, k)
            parts[d] = (wih.T, whh.T, bih + bhh)
        lstm_layers.append(dict(
            wih_cat=jnp.concatenate([parts["fwd"][0], parts["bwd"][0]],
                                    axis=1).astype(jnp.bfloat16),
            whh_cat=jnp.concatenate([parts["fwd"][1], parts["bwd"][1]],
                                    axis=1).astype(jnp.bfloat16),
            b_cat=jnp.concatenate([parts["fwd"][2], parts["bwd"][2]])[None, :],
        ))
        in_dim = 2 * hidden_dim

    kc = (2 * hidden_dim) ** -0.5
    wcls = jax.random.uniform(keys[next(ki)], (num_classes, 2 * hidden_dim),
                              jnp.float32, -kc, kc)
    bcls = jax.random.uniform(keys[next(ki)], (num_classes,),
                              jnp.float32, -kc, kc)

    # Pad classifier to a lane-dense 128-wide output; pad lanes get zero
    # weights and a -1e30 (f32) bias so they contribute nothing to log_softmax.
    c_pad = max(128, ((num_classes + 127) // 128) * 128)
    w_pad = (jnp.zeros((2 * hidden_dim, c_pad), jnp.float32)
             .at[:, :num_classes].set(wcls.T).astype(jnp.bfloat16))
    b_pad = jnp.full((1, c_pad), NEG_INF, jnp.float32).at[0, :num_classes].set(bcls)

    return dict(embedding_pad=emb_pad, lstm=lstm_layers,
                cls_w_pad=w_pad, cls_b_pad=b_pad,
                hidden_dim=hidden_dim, num_classes=num_classes)


# ------------------------- main -------------------------

if __name__ == "__main__":
    T, E, H, L, C, V = 8, 32, 32, 2, 5, 20   # seq, embed, hidden, layers, classes, vocab

    key = jax.random.PRNGKey(0)
    k_tok, k_par = jax.random.split(key)
    token_ids = jax.random.randint(k_tok, (T,), 0, V, dtype=jnp.int32)
    params = init_params(k_par, V, E, H, L, C)

    out = jax.block_until_ready(bilstm_forward(token_ids, params))
    assert out.shape == (T, C)
    assert out.dtype == jnp.float32
    # log_softmax rows must sum to 1 in prob space.
    assert bool(jnp.all(jnp.abs(jnp.sum(jnp.exp(out), axis=1) - 1.0) < 1e-4))
    # match the pure-JAX reference of the PyTorch forward pass.
    ref = bilstm_reference(token_ids, params)
    assert bool(jnp.max(jnp.abs(out - ref)) < 1e-4)
    print("KERNEL_OK")
</pallas_src>

<mosaic_0001>
module attributes {stable_mosaic.version = 11 : i64} {
  func.func @kernel(%arg0: memref<8x1xi32, #tpu.memory_space<vmem>>, %arg1: memref<128x32xbf16, #tpu.memory_space<vmem>>, %arg2: memref<32x256xbf16, #tpu.memory_space<vmem>>, %arg3: memref<32x256xbf16, #tpu.memory_space<vmem>>, %arg4: memref<1x256xf32, #tpu.memory_space<vmem>>, %arg5: memref<64x256xbf16, #tpu.memory_space<vmem>>, %arg6: memref<32x256xbf16, #tpu.memory_space<vmem>>, %arg7: memref<1x256xf32, #tpu.memory_space<vmem>>, %arg8: memref<64x128xbf16, #tpu.memory_space<vmem>>, %arg9: memref<1x128xf32, #tpu.memory_space<vmem>>, %arg10: memref<8x128xf32, #tpu.memory_space<vmem>>, %arg11: memref<8x32xf32, #tpu.memory_space<vmem>>, %arg12: memref<8x256xf32, #tpu.memory_space<vmem>>, %arg13: memref<16x128xf32, #tpu.memory_space<vmem>>, %arg14: memref<16x32xf32, #tpu.memory_space<vmem>>, %arg15: memref<8x64xf32, #tpu.memory_space<vmem>>, %arg16: memref<8x64xf32, #tpu.memory_space<vmem>>) attributes {dimension_semantics = [], scalar_prefetch = 0 : i64, scratch_operands = 6 : i64, tpu.core_type = #tpu.core_type<tc>} {
    %c0 = arith.constant 0 : index
    %c0_0 = arith.constant 0 : index
    %0 = vector.load %arg0[%c0, %c0_0] : memref<8x1xi32, #tpu.memory_space<vmem>>, vector<8x1xi32>
    %1 = tpu.iota {dimensions = array<i32: 1>} : vector<8x128xi32>
    %2 = vector.broadcast %0 : vector<8x1xi32> to vector<8x128xi32>
    %3 = arith.cmpi eq, %1, %2 : vector<8x128xi32>
    %4 = arith.extui %3 : vector<8x128xi1> to vector<8x128xi32>
    %5 = arith.sitofp %4 : vector<8x128xi32> to vector<8x128xf32>
    %c0_1 = arith.constant 0 : index
    %c0_2 = arith.constant 0 : index
    %6 = vector.load %arg1[%c0_1, %c0_2] : memref<128x32xbf16, #tpu.memory_space<vmem>>, vector<128x32xbf16>
    %7 = arith.extf %6 : vector<128x32xbf16> to vector<128x32xf32>
    %cst = arith.constant dense<0.000000e+00> : vector<8x32xf32>
    %8 = tpu.matmul %5, %7, %cst {dimension_numbers = #tpu.dot_dimension_numbers<[1], [0], [0], [1], [0, 0, 1, 1], [], []>} : vector<8x128xf32>, vector<128x32xf32>, vector<8x32xf32> -> vector<8x32xf32>
    %c0_3 = arith.constant 0 : index
    %c0_4 = arith.constant 0 : index
    %9 = vector.load %arg11[%c0_3, %c0_4] : memref<8x32xf32, #tpu.memory_space<vmem>>, vector<8x32xf32>
    tpu.vector_store %arg11[%c0_3, %c0_4], %8 {strides = array<i32>} : memref<8x32xf32, #tpu.memory_space<vmem>>, vector<8x32xf32>,
    %10 = tpu.iota {dimensions = array<i32: 0>} : vector<2x128xi32>
    %c0_i32 = arith.constant 0 : i32
    %11 = vector.broadcast %c0_i32 : i32 to vector<2x128xi32>
    %12 = arith.cmpi eq, %10, %11 : vector<2x128xi32>
    %c0_5 = arith.constant 0 : index
    %c0_6 = arith.constant 0 : index
    %13 = vector.load %arg11[%c0_5, %c0_6] : memref<8x32xf32, #tpu.memory_space<vmem>>, vector<8x32xf32>
    %c0_7 = arith.constant 0 : index
    %c0_8 = arith.constant 0 : index
    %14 = vector.load %arg2[%c0_7, %c0_8] : memref<32x256xbf16, #tpu.memory_space<vmem>>, vector<32x256xbf16>
    %15 = arith.extf %14 : vector<32x256xbf16> to vector<32x256xf32>
    %cst_9 = arith.constant dense<0.000000e+00> : vector<8x256xf32>
    %16 = tpu.matmul %13, %15, %cst_9 {dimension_numbers = #tpu.dot_dimension_numbers<[1], [0], [0], [1], [0, 0, 1, 1], [], []>} : vector<8x32xf32>, vector<32x256xf32>, vector<8x256xf32> -> vector<8x256xf32>
    %c0_10 = arith.constant 0 : index
    %c0_11 = arith.constant 0 : index
    %17 = vector.load %arg4[%c0_10, %c0_11] : memref<1x256xf32, #tpu.memory_space<vmem>>, vector<1x256xf32>
    %18 = vector.broadcast %17 : vector<1x256xf32> to vector<8x256xf32>
    %19 = arith.addf %16, %18 : vector<8x256xf32>
    %c0_12 = arith.constant 0 : index
    %c0_13 = arith.constant 0 : index
    %20 = vector.load %arg12[%c0_12, %c0_13] : memref<8x256xf32, #tpu.memory_space<vmem>>, vector<8x256xf32>
    tpu.vector_store %arg12[%c0_12, %c0_13], %19 {strides = array<i32>} : memref<8x256xf32, #tpu.memory_space<vmem>>, vector<8x256xf32>,
    %c0_14 = arith.constant 0 : index
    %c0_15 = arith.constant 0 : index
    %21 = vector.load %arg12[%c0_14, %c0_15] : memref<8x256xf32, #tpu.memory_space<vmem>>, vector<1x128xf32>
    %c0_16 = arith.constant 0 : index
    %c0_17 = arith.constant 0 : index
    %22 = vector.load %arg13[%c0_16, %c0_17] : memref<16x128xf32, #tpu.memory_space<vmem>>, vector<1x128xf32>
    tpu.vector_store %arg13[%c0_16, %c0_17], %21 {strides = array<i32>} : memref<16x128xf32, #tpu.memory_space<vmem>>, vector<1x128xf32>,
    %c7 = arith.constant 7 : index
    %c128 = arith.constant 128 : index
    %23 = vector.load %arg12[%c7, %c128] : memref<8x256xf32, #tpu.memory_space<vmem>>, vector<1x128xf32>
    %c1 = arith.constant 1 : index
    %c0_18 = arith.constant 0 : index
    %24 = vector.load %arg13[%c1, %c0_18] : memref<16x128xf32, #tpu.memory_space<vmem>>, vector<1x128xf32>
    tpu.vector_store %arg13[%c1, %c0_18], %23 {strides = array<i32>} : memref<16x128xf32, #tpu.memory_space<vmem>>, vector<1x128xf32>,
    %c1_19 = arith.constant 1 : index
    %c0_20 = arith.constant 0 : index
    %25 = vector.load %arg12[%c1_19, %c0_20] : memref<8x256xf32, #tpu.memory_space<vmem>>, vector<1x128xf32>
    %c2 = arith.constant 2 : index
    %c0_21 = arith.constant 0 : index
    %26 = vector.load %arg13[%c2, %c0_21] : memref<16x128xf32, #tpu.memory_space<vmem>>, vector<1x128xf32>
    tpu.vector_store %arg13[%c2, %c0_21], %25 {strides = array<i32>} : memref<16x128xf32, #tpu.memory_space<vmem>>, vector<1x128xf32>,
    %c6 = arith.constant 6 : index
    %c128_22 = arith.constant 128 : index
    %27 = vector.load %arg12[%c6, %c128_22] : memref<8x256xf32, #tpu.memory_space<vmem>>, vector<1x128xf32>
    %c3 = arith.constant 3 : index
    %c0_23 = arith.constant 0 : index
    %28 = vector.load %arg13[%c3, %c0_23] : memref<16x128xf32, #tpu.memory_space<vmem>>, vector<1x128xf32>
    tpu.vector_store %arg13[%c3, %c0_23], %27 {strides = array<i32>} : memref<16x128xf32, #tpu.memory_space<vmem>>, vector<1x128xf32>,
    %c2_24 = arith.constant 2 : index
    %c0_25 = arith.constant 0 : index
    %29 = vector.load %arg12[%c2_24, %c0_25] : memref<8x256xf32, #tpu.memory_space<vmem>>, vector<1x128xf32>
    %c4 = arith.constant 4 : index
    %c0_26 = arith.constant 0 : index
    %30 = vector.load %arg13[%c4, %c0_26] : memref<16x128xf32, #tpu.memory_space<vmem>>, vector<1x128xf32>
    tpu.vector_store %arg13[%c4, %c0_26], %29 {strides = array<i32>} : memref<16x128xf32, #tpu.memory_space<vmem>>, vector<1x128xf32>,
    %c5 = arith.constant 5 : index
    %c128_27 = arith.constant 128 : index
    %31 = vector.load %arg12[%c5, %c128_27] : memref<8x256xf32, #tpu.memory_space<vmem>>, vector<1x128xf32>
    %c5_28 = arith.constant 5 : index
    %c0_29 = arith.constant 0 : index
    %32 = vector.load %arg13[%c5_28, %c0_29] : memref<16x128xf32, #tpu.memory_space<vmem>>, vector<1x128xf32>
    tpu.vector_store %arg13[%c5_28, %c0_29], %31 {strides = array<i32>} : memref<16x128xf32, #tpu.memory_space<vmem>>, vector<1x128xf32>,
    %c3_30 = arith.constant 3 : index
    %c0_31 = arith.constant 0 : index
    %33 = vector.load %arg12[%c3_30, %c0_31] : memref<8x256xf32, #tpu.memory_space<vmem>>, vector<1x128xf32>
    %c6_32 = arith.constant 6 : index
    %c0_33 = arith.constant 0 : index
    %34 = vector.load %arg13[%c6_32, %c0_33] : memref<16x128xf32, #tpu.memory_space<vmem>>, vector<1x128xf32>
    tpu.vector_store %arg13[%c6_32, %c0_33], %33 {strides = array<i32>} : memref<16x128xf32, #tpu.memory_space<vmem>>, vector<1x128xf32>,
    %c4_34 = arith.constant 4 : index
    %c128_35 = arith.constant 128 : index
    %35 = vector.load %arg12[%c4_34, %c128_35] : memref<8x256xf32, #tpu.memory_space<vmem>>, vector<1x128xf32>
    %c7_36 = arith.constant 7 : index
    %c0_37 = arith.constant 0 : index
    %36 = vector.load %arg13[%c7_36, %c0_37] : memref<16x128xf32, #tpu.memory_space<vmem>>, vector<1x128xf32>
    tpu.vector_store %arg13[%c7_36, %c0_37], %35 {strides = array<i32>} : memref<16x128xf32, #tpu.memory_space<vmem>>, vector<1x128xf32>,
    %c4_38 = arith.constant 4 : index
    %c0_39 = arith.constant 0 : index
    %37 = vector.load %arg12[%c4_38, %c0_39] : memref<8x256xf32, #tpu.memory_space<vmem>>, vector<1x128xf32>
    %c8 = arith.constant 8 : index
    %c0_40 = arith.constant 0 : index
    %38 = vector.load %arg13[%c8, %c0_40] : memref<16x128xf32, #tpu.memory_space<vmem>>, vector<1x128xf32>
    tpu.vector_store %arg13[%c8, %c0_40], %37 {strides = array<i32>} : memref<16x128xf32, #tpu.memory_space<vmem>>, vector<1x128xf32>,
    %c3_41 = arith.constant 3 : index
    %c128_42 = arith.constant 128 : index
    %39 = vector.load %arg12[%c3_41, %c128_42] : memref<8x256xf32, #tpu.memory_space<vmem>>, vector<1x128xf32>
    %c9 = arith.constant 9 : index
    %c0_43 = arith.constant 0 : index
    %40 = vector.load %arg13[%c9, %c0_43] : memref<16x128xf32, #tpu.memory_space<vmem>>, vector<1x128xf32>
    tpu.vector_store %arg13[%c9, %c0_43], %39 {strides = array<i32>} : memref<16x128xf32, #tpu.memory_space<vmem>>, vector<1x128xf32>,
    %c5_44 = arith.constant 5 : index
    %c0_45 = arith.constant 0 : index
    %41 = vector.load %arg12[%c5_44, %c0_45] : memref<8x256xf32, #tpu.memory_space<vmem>>, vector<1x128xf32>
    %c10 = arith.constant 10 : index
    %c0_46 = arith.constant 0 : index
    %42 = vector.load %arg13[%c10, %c0_46] : memref<16x128xf32, #tpu.memory_space<vmem>>, vector<1x128xf32>
    tpu.vector_store %arg13[%c10, %c0_46], %41 {strides = array<i32>} : memref<16x128xf32, #tpu.memory_space<vmem>>, vector<1x128xf32>,
    %c2_47 = arith.constant 2 : index
    %c128_48 = arith.constant 128 : index
    %43 = vector.load %arg12[%c2_47, %c128_48] : memref<8x256xf32, #tpu.memory_space<vmem>>, vector<1x128xf32>
    %c11 = arith.constant 11 : index
    %c0_49 = arith.constant 0 : index
    %44 = vector.load %arg13[%c11, %c0_49] : memref<16x128xf32, #tpu.memory_space<vmem>>, vector<1x128xf32>
    tpu.vector_store %arg13[%c11, %c0_49], %43 {strides = array<i32>} : memref<16x128xf32, #tpu.memory_space<vmem>>, vector<1x128xf32>,
    %c6_50 = arith.constant 6 : index
    %c0_51 = arith.constant 0 : index
    %45 = vector.load %arg12[%c6_50, %c0_51] : memref<8x256xf32, #tpu.memory_space<vmem>>, vector<1x128xf32>
    %c12 = arith.constant 12 : index
    %c0_52 = arith.constant 0 : index
    %46 = vector.load %arg13[%c12, %c0_52] : memref<16x128xf32, #tpu.memory_space<vmem>>, vector<1x128xf32>
    tpu.vector_store %arg13[%c12, %c0_52], %45 {strides = array<i32>} : memref<16x128xf32, #tpu.memory_space<vmem>>, vector<1x128xf32>,
    %c1_53 = arith.constant 1 : index
    %c128_54 = arith.constant 128 : index
    %47 = vector.load %arg12[%c1_53, %c128_54] : memref<8x256xf32, #tpu.memory_space<vmem>>, vector<1x128xf32>
    %c13 = arith.constant 13 : index
    %c0_55 = arith.constant 0 : index
    %48 = vector.load %arg13[%c13, %c0_55] : memref<16x128xf32, #tpu.memory_space<vmem>>, vector<1x128xf32>
    tpu.vector_store %arg13[%c13, %c0_55], %47 {strides = array<i32>} : memref<16x128xf32, #tpu.memory_space<vmem>>, vector<1x128xf32>,
    %c7_56 = arith.constant 7 : index
    %c0_57 = arith.constant 0 : index
    %49 = vector.load %arg12[%c7_56, %c0_57] : memref<8x256xf32, #tpu.memory_space<vmem>>, vector<1x128xf32>
    %c14 = arith.constant 14 : index
    %c0_58 = arith.constant 0 : index
    %50 = vector.load %arg13[%c14, %c0_58] : memref<16x128xf32, #tpu.memory_space<vmem>>, vector<1x128xf32>
    tpu.vector_store %arg13[%c14, %c0_58], %49 {strides = array<i32>} : memref<16x128xf32, #tpu.memory_space<vmem>>, vector<1x128xf32>,
    %c0_59 = arith.constant 0 : index
    %c128_60 = arith.constant 128 : index
    %51 = vector.load %arg12[%c0_59, %c128_60] : memref<8x256xf32, #tpu.memory_space<vmem>>, vector<1x128xf32>
    %c15 = arith.constant 15 : index
    %c0_61 = arith.constant 0 : index
    %52 = vector.load %arg13[%c15, %c0_61] : memref<16x128xf32, #tpu.memory_space<vmem>>, vector<1x128xf32>
    tpu.vector_store %arg13[%c15, %c0_61], %51 {strides = array<i32>} : memref<16x128xf32, #tpu.memory_space<vmem>>, vector<1x128xf32>,
    %c0_62 = arith.constant 0 : index
    %c0_63 = arith.constant 0 : index
    %53 = vector.load %arg3[%c0_62, %c0_63] : memref<32x256xbf16, #tpu.memory_space<vmem>>, vector<32x256xbf16>
    %54 = arith.extf %53 : vector<32x256xbf16> to vector<32x256xf32>
    %cst_64 = arith.constant 0.000000e+00 : f32
    %55 = vector.broadcast %cst_64 : f32 to vector<2x32xf32>
    %cst_65 = arith.constant 0.000000e+00 : f32
    %56 = vector.broadcast %cst_65 : f32 to vector<2x32xf32>
    %c0_i32_66 = arith.constant 0 : i32
    %c2_i32 = arith.constant 2 : i32
    %57 = arith.muli %c2_i32, %c0_i32_66 : i32
    %58 = tpu.assume_multiple %57, 2 : i32
    %cst_67 = arith.constant dense<0.000000e+00> : vector<2x256xf32>
    %59 = tpu.matmul %55, %54, %cst_67 {dimension_numbers = #tpu.dot_dimension_numbers<[1], [0], [0], [1], [0, 0, 1, 1], [], []>} : vector<2x32xf32>, vector<32x256xf32>, vector<2x256xf32> -> vector<2x256xf32>
    %60 = vector.extract_strided_slice %59 {offsets = [0, 0], sizes = [2, 128], strides = [1, 1]} : vector<2x256xf32> to vector<2x128xf32>
    %61 = vector.extract_strided_slice %59 {offsets = [0, 128], sizes = [2, 128], strides = [1, 1]} : vector<2x256xf32> to vector<2x128xf32>
    %62 = arith.select %12, %60, %61 : vector<2x128xi1>, vector<2x128xf32>
    %63 = arith.index_cast %58 : i32 to index
    %c0_68 = arith.constant 0 : index
    %64 = vector.load %arg13[%63, %c0_68] : memref<16x128xf32, #tpu.memory_space<vmem>>, vector<2x128xf32>
    %65 = arith.addf %64, %62 : vector<2x128xf32>
    %66 = arith.negf %65 : vector<2x128xf32>
    %67 = math.exp %66 : vector<2x128xf32>
    %cst_69 = arith.constant 1.000000e+00 : f32
    %68 = vector.broadcast %cst_69 : f32 to vector<2x128xf32>
    %69 = arith.addf %68, %67 : vector<2x128xf32>
    %70 = arith.divf %68, %69 : vector<2x128xf32>
    %71 = math.tanh %65 : vector<2x128xf32>
    %72 = vector.extract_strided_slice %70 {offsets = [0, 32], sizes = [2, 32], strides = [1, 1]} : vector<2x128xf32> to vector<2x32xf32>
    %73 = arith.mulf %72, %56 : vector<2x32xf32>
    %74 = vector.extract_strided_slice %70 {offsets = [0, 0], sizes = [2, 32], strides = [1, 1]} : vector<2x128xf32> to vector<2x32xf32>
    %75 = vector.extract_strided_slice %71 {offsets = [0, 64], sizes = [2, 32], strides = [1, 1]} : vector<2x128xf32> to vector<2x32xf32>
    %76 = arith.mulf %74, %75 : vector<2x32xf32>
    %77 = arith.addf %73, %76 : vector<2x32xf32>
    %78 = vector.extract_strided_slice %70 {offsets = [0, 96], sizes = [2, 32], strides = [1, 1]} : vector<2x128xf32> to vector<2x32xf32>
    %79 = math.tanh %77 : vector<2x32xf32>
    %80 = arith.mulf %78, %79 : vector<2x32xf32>
    %81 = arith.index_cast %58 : i32 to index
    %c0_70 = arith.constant 0 : index
    %82 = vector.load %arg14[%81, %c0_70] : memref<16x32xf32, #tpu.memory_space<vmem>>, vector<2x32xf32>
    tpu.vector_store %arg14[%81, %c0_70], %80 {strides = array<i32>} : memref<16x32xf32, #tpu.memory_space<vmem>>, vector<2x32xf32>,
    %c1_i32 = arith.constant 1 : i32
    %c2_i32_71 = arith.constant 2 : i32
    %83 = arith.muli %c2_i32_71, %c1_i32 : i32
    %84 = tpu.assume_multiple %83, 2 : i32
    %cst_72 = arith.constant dense<0.000000e+00> : vector<2x256xf32>
    %85 = tpu.matmul %80, %54, %cst_72 {dimension_numbers = #tpu.dot_dimension_numbers<[1], [0], [0], [1], [0, 0, 1, 1], [], []>} : vector<2x32xf32>, vector<32x256xf32>, vector<2x256xf32> -> vector<2x256xf32>
    %86 = vector.extract_strided_slice %85 {offsets = [0, 0], sizes = [2, 128], strides = [1, 1]} : vector<2x256xf32> to vector<2x128xf32>
    %87 = vector.extract_strided_slice %85 {offsets = [0, 128], sizes = [2, 128], strides = [1, 1]} : vector<2x256xf32> to vector<2x128xf32>
    %88 = arith.select %12, %86, %87 : vector<2x128xi1>, vector<2x128xf32>
    %89 = arith.index_cast %84 : i32 to index
    %c0_73 = arith.constant 0 : index
    %90 = vector.load %arg13[%89, %c0_73] : memref<16x128xf32, #tpu.memory_space<vmem>>, vector<2x128xf32>
    %91 = arith.addf %90, %88 : vector<2x128xf32>
    %92 = arith.negf %91 : vector<2x128xf32>
    %93 = math.exp %92 : vector<2x128xf32>
    %cst_74 = arith.constant 1.000000e+00 : f32
    %94 = vector.broadcast %cst_74 : f32 to vector<2x128xf32>
    %95 = arith.addf %94, %93 : vector<2x128xf32>
    %96 = arith.divf %94, %95 : vector<2x128xf32>
    %97 = math.tanh %91 : vector<2x128xf32>
    %98 = vector.extract_strided_slice %96 {offsets = [0, 32], sizes = [2, 32], strides = [1, 1]} : vector<2x128xf32> to vector<2x32xf32>
    %99 = arith.mulf %98, %77 : vector<2x32xf32>
    %100 = vector.extract_strided_slice %96 {offsets = [0, 0], sizes = [2, 32], strides = [1, 1]} : vector<2x128xf32> to vector<2x32xf32>
    %101 = vector.extract_strided_slice %97 {offsets = [0, 64], sizes = [2, 32], strides = [1, 1]} : vector<2x128xf32> to vector<2x32xf32>
    %102 = arith.mulf %100, %101 : vector<2x32xf32>
    %103 = arith.addf %99, %102 : vector<2x32xf32>
    %104 = vector.extract_strided_slice %96 {offsets = [0, 96], sizes = [2, 32], strides = [1, 1]} : vector<2x128xf32> to vector<2x32xf32>
    %105 = math.tanh %103 : vector<2x32xf32>
    %106 = arith.mulf %104, %105 : vector<2x32xf32>
    %107 = arith.index_cast %84 : i32 to index
    %c0_75 = arith.constant 0 : index
    %108 = vector.load %arg14[%107, %c0_75] : memref<16x32xf32, #tpu.memory_space<vmem>>, vector<2x32xf32>
    tpu.vector_store %arg14[%107, %c0_75], %106 {strides = array<i32>} : memref<16x32xf32, #tpu.memory_space<vmem>>, vector<2x32xf32>,
    %c2_i32_76 = arith.constant 2 : i32
    %c2_i32_77 = arith.constant 2 : i32
    %109 = arith.muli %c2_i32_77, %c2_i32_76 : i32
    %110 = tpu.assume_multiple %109, 2 : i32
    %cst_78 = arith.constant dense<0.000000e+00> : vector<2x256xf32>
    %111 = tpu.matmul %106, %54, %cst_78 {dimension_numbers = #tpu.dot_dimension_numbers<[1], [0], [0], [1], [0, 0, 1, 1], [], []>} : vector<2x32xf32>, vector<32x256xf32>, vector<2x256xf32> -> vector<2x256xf32>
    %112 = vector.extract_strided_slice %111 {offsets = [0, 0], sizes = [2, 128], strides = [1, 1]} : vector<2x256xf32> to vector<2x128xf32>
    %113 = vector.extract_strided_slice %111 {offsets = [0, 128], sizes = [2, 128], strides = [1, 1]} : vector<2x256xf32> to vector<2x128xf32>
    %114 = arith.select %12, %112, %113 : vector<2x128xi1>, vector<2x128xf32>
    %115 = arith.index_cast %110 : i32 to index
    %c0_79 = arith.constant 0 : index
    %116 = vector.load %arg13[%115, %c0_79] : memref<16x128xf32, #tpu.memory_space<vmem>>, vector<2x128xf32>
    %117 = arith.addf %116, %114 : vector<2x128xf32>
    %118 = arith.negf %117 : vector<2x128xf32>
    %119 = math.exp %118 : vector<2x128xf32>
    %cst_80 = arith.constant 1.000000e+00 : f32
    %120 = vector.broadcast %cst_80 : f32 to vector<2x128xf32>
    %121 = arith.addf %120, %119 : vector<2x128xf32>
    %122 = arith.divf %120, %121 : vector<2x128xf32>
    %123 = math.tanh %117 : vector<2x128xf32>
    %124 = vector.extract_strided_slice %122 {offsets = [0, 32], sizes = [2, 32], strides = [1, 1]} : vector<2x128xf32> to vector<2x32xf32>
    %125 = arith.mulf %124, %103 : vector<2x32xf32>
    %126 = vector.extract_strided_slice %122 {offsets = [0, 0], sizes = [2, 32], strides = [1, 1]} : vector<2x128xf32> to vector<2x32xf32>
    %127 = vector.extract_strided_slice %123 {offsets = [0, 64], sizes = [2, 32], strides = [1, 1]} : vector<2x128xf32> to vector<2x32xf32>
    %128 = arith.mulf %126, %127 : vector<2x32xf32>
    %129 = arith.addf %125, %128 : vector<2x32xf32>
    %130 = vector.extract_strided_slice %122 {offsets = [0, 96], sizes = [2, 32], strides = [1, 1]} : vector<2x128xf32> to vector<2x32xf32>
    %131 = math.tanh %129 : vector<2x32xf32>
    %132 = arith.mulf %130, %131 : vector<2x32xf32>
    %133 = arith.index_cast %110 : i32 to index
    %c0_81 = arith.constant 0 : index
    %134 = vector.load %arg14[%133, %c0_81] : memref<16x32xf32, #tpu.memory_space<vmem>>, vector<2x32xf32>
    tpu.vector_store %arg14[%133, %c0_81], %132 {strides = array<i32>} : memref<16x32xf32, #tpu.memory_space<vmem>>, vector<2x32xf32>,
    %c3_i32 = arith.constant 3 : i32
    %c2_i32_82 = arith.constant 2 : i32
    %135 = arith.muli %c2_i32_82, %c3_i32 : i32
    %136 = tpu.assume_multiple %135, 2 : i32
    %cst_83 = arith.constant dense<0.000000e+00> : vector<2x256xf32>
    %137 = tpu.matmul %132, %54, %cst_83 {dimension_numbers = #tpu.dot_dimension_numbers<[1], [0], [0], [1], [0, 0, 1, 1], [], []>} : vector<2x32xf32>, vector<32x256xf32>, vector<2x256xf32> -> vector<2x256xf32>
    %138 = vector.extract_strided_slice %137 {offsets = [0, 0], sizes = [2, 128], strides = [1, 1]} : vector<2x256xf32> to vector<2x128xf32>
    %139 = vector.extract_strided_slice %137 {offsets = [0, 128], sizes = [2, 128], strides = [1, 1]} : vector<2x256xf32> to vector<2x128xf32>
    %140 = arith.select %12, %138, %139 : vector<2x128xi1>, vector<2x128xf32>
    %141 = arith.index_cast %136 : i32 to index
    %c0_84 = arith.constant 0 : index
    %142 = vector.load %arg13[%141, %c0_84] : memref<16x128xf32, #tpu.memory_space<vmem>>, vector<2x128xf32>
    %143 = arith.addf %142, %140 : vector<2x128xf32>
    %144 = arith.negf %143 : vector<2x128xf32>
    %145 = math.exp %144 : vector<2x128xf32>
    %cst_85 = arith.constant 1.000000e+00 : f32
    %146 = vector.broadcast %cst_85 : f32 to vector<2x128xf32>
    %147 = arith.addf %146, %145 : vector<2x128xf32>
    %148 = arith.divf %146, %147 : vector<2x128xf32>
    %149 = math.tanh %143 : vector<2x128xf32>
    %150 = vector.extract_strided_slice %148 {offsets = [0, 32], sizes = [2, 32], strides = [1, 1]} : vector<2x128xf32> to vector<2x32xf32>
    %151 = arith.mulf %150, %129 : vector<2x32xf32>
    %152 = vector.extract_strided_slice %148 {offsets = [0, 0], sizes = [2, 32], strides = [1, 1]} : vector<2x128xf32> to vector<2x32xf32>
    %153 = vector.extract_strided_slice %149 {offsets = [0, 64], sizes = [2, 32], strides = [1, 1]} : vector<2x128xf32> to vector<2x32xf32>
    %154 = arith.mulf %152, %153 : vector<2x32xf32>
    %155 = arith.addf %151, %154 : vector<2x32xf32>
    %156 = vector.extract_strided_slice %148 {offsets = [0, 96], sizes = [2, 32], strides = [1, 1]} : vector<2x128xf32> to vector<2x32xf32>
    %157 = math.tanh %155 : vector<2x32xf32>
    %158 = arith.mulf %156, %157 : vector<2x32xf32>
    %159 = arith.index_cast %136 : i32 to index
    %c0_86 = arith.constant 0 : index
    %160 = vector.load %arg14[%159, %c0_86] : memref<16x32xf32, #tpu.memory_space<vmem>>, vector<2x32xf32>
    tpu.vector_store %arg14[%159, %c0_86], %158 {strides = array<i32>} : memref<16x32xf32, #tpu.memory_space<vmem>>, vector<2x32xf32>,
    %c4_i32 = arith.constant 4 : i32
    %c2_i32_87 = arith.constant 2 : i32
    %161 = arith.muli %c2_i32_87, %c4_i32 : i32
    %162 = tpu.assume_multiple %161, 2 : i32
    %cst_88 = arith.constant dense<0.000000e+00> : vector<2x256xf32>
    %163 = tpu.matmul %158, %54, %cst_88 {dimension_numbers = #tpu.dot_dimension_numbers<[1], [0], [0], [1], [0, 0, 1, 1], [], []>} : vector<2x32xf32>, vector<32x256xf32>, vector<2x256xf32> -> vector<2x256xf32>
    %164 = vector.extract_strided_slice %163 {offsets = [0, 0], sizes = [2, 128], strides = [1, 1]} : vector<2x256xf32> to vector<2x128xf32>
    %165 = vector.extract_strided_slice %163 {offsets = [0, 128], sizes = [2, 128], strides = [1, 1]} : vector<2x256xf32> to vector<2x128xf32>
    %166 = arith.select %12, %164, %165 : vector<2x128xi1>, vector<2x128xf32>
    %167 = arith.index_cast %162 : i32 to index
    %c0_89 = arith.constant 0 : index
    %168 = vector.load %arg13[%167, %c0_89] : memref<16x128xf32, #tpu.memory_space<vmem>>, vector<2x128xf32>
    %169 = arith.addf %168, %166 : vector<2x128xf32>
    %170 = arith.negf %169 : vector<2x128xf32>
    %171 = math.exp %170 : vector<2x128xf32>
    %cst_90 = arith.constant 1.000000e+00 : f32
    %172 = vector.broadcast %cst_90 : f32 to vector<2x128xf32>
    %173 = arith.addf %172, %171 : vector<2x128xf32>
    %174 = arith.divf %172, %173 : vector<2x128xf32>
    %175 = math.tanh %169 : vector<2x128xf32>
    %176 = vector.extract_strided_slice %174 {offsets = [0, 32], sizes = [2, 32], strides = [1, 1]} : vector<2x128xf32> to vector<2x32xf32>
    %177 = arith.mulf %176, %155 : vector<2x32xf32>
    %178 = vector.extract_strided_slice %174 {offsets = [0, 0], sizes = [2, 32], strides = [1, 1]} : vector<2x128xf32> to vector<2x32xf32>
    %179 = vector.extract_strided_slice %175 {offsets = [0, 64], sizes = [2, 32], strides = [1, 1]} : vector<2x128xf32> to vector<2x32xf32>
    %180 = arith.mulf %178, %179 : vector<2x32xf32>
    %181 = arith.addf %177, %180 : vector<2x32xf32>
    %182 = vector.extract_strided_slice %174 {offsets = [0, 96], sizes = [2, 32], strides = [1, 1]} : vector<2x128xf32> to vector<2x32xf32>
    %183 = math.tanh %181 : vector<2x32xf32>
    %184 = arith.mulf %182, %183 : vector<2x32xf32>
    %185 = arith.index_cast %162 : i32 to index
    %c0_91 = arith.constant 0 : index
    %186 = vector.load %arg14[%185, %c0_91] : memref<16x32xf32, #tpu.memory_space<vmem>>, vector<2x32xf32>
    tpu.vector_store %arg14[%185, %c0_91], %184 {strides = array<i32>} : memref<16x32xf32, #tpu.memory_space<vmem>>, vector<2x32xf32>,
    %c5_i32 = arith.constant 5 : i32
    %c2_i32_92 = arith.constant 2 : i32
    %187 = arith.muli %c2_i32_92, %c5_i32 : i32
    %188 = tpu.assume_multiple %187, 2 : i32
    %cst_93 = arith.constant dense<0.000000e+00> : vector<2x256xf32>
    %189 = tpu.matmul %184, %54, %cst_93 {dimension_numbers = #tpu.dot_dimension_numbers<[1], [0], [0], [1], [0, 0, 1, 1], [], []>} : vector<2x32xf32>, vector<32x256xf32>, vector<2x256xf32> -> vector<2x256xf32>
    %190 = vector.extract_strided_slice %189 {offsets = [0, 0], sizes = [2, 128], strides = [1, 1]} : vector<2x256xf32> to vector<2x128xf32>
    %191 = vector.extract_strided_slice %189 {offsets = [0, 128], sizes = [2, 128], strides = [1, 1]} : vector<2x256xf32> to vector<2x128xf32>
    %192 = arith.select %12, %190, %191 : vector<2x128xi1>, vector<2x128xf32>
    %193 = arith.index_cast %188 : i32 to index
    %c0_94 = arith.constant 0 : index
    %194 = vector.load %arg13[%193, %c0_94] : memref<16x128xf32, #tpu.memory_space<vmem>>, vector<2x128xf32>
    %195 = arith.addf %194, %192 : vector<2x128xf32>
    %196 = arith.negf %195 : vector<2x128xf32>
    %197 = math.exp %196 : vector<2x128xf32>
    %cst_95 = arith.constant 1.000000e+00 : f32
    %198 = vector.broadcast %cst_95 : f32 to vector<2x128xf32>
    %199 = arith.addf %198, %197 : vector<2x128xf32>
    %200 = arith.divf %198, %199 : vector<2x128xf32>
    %201 = math.tanh %195 : vector<2x128xf32>
    %202 = vector.extract_strided_slice %200 {offsets = [0, 32], sizes = [2, 32], strides = [1, 1]} : vector<2x128xf32> to vector<2x32xf32>
    %203 = arith.mulf %202, %181 : vector<2x32xf32>
    %204 = vector.extract_strided_slice %200 {offsets = [0, 0], sizes = [2, 32], strides = [1, 1]} : vector<2x128xf32> to vector<2x32xf32>
    %205 = vector.extract_strided_slice %201 {offsets = [0, 64], sizes = [2, 32], strides = [1, 1]} : vector<2x128xf32> to vector<2x32xf32>
    %206 = arith.mulf %204, %205 : vector<2x32xf32>
    %207 = arith.addf %203, %206 : vector<2x32xf32>
    %208 = vector.extract_strided_slice %200 {offsets = [0, 96], sizes = [2, 32], strides = [1, 1]} : vector<2x128xf32> to vector<2x32xf32>
    %209 = math.tanh %207 : vector<2x32xf32>
    %210 = arith.mulf %208, %209 : vector<2x32xf32>
    %211 = arith.index_cast %188 : i32 to index
    %c0_96 = arith.constant 0 : index
    %212 = vector.load %arg14[%211, %c0_96] : memref<16x32xf32, #tpu.memory_space<vmem>>, vector<2x32xf32>
    tpu.vector_store %arg14[%211, %c0_96], %210 {strides = array<i32>} : memref<16x32xf32, #tpu.memory_space<vmem>>, vector<2x32xf32>,
    %c6_i32 = arith.constant 6 : i32
    %c2_i32_97 = arith.constant 2 : i32
    %213 = arith.muli %c2_i32_97, %c6_i32 : i32
    %214 = tpu.assume_multiple %213, 2 : i32
    %cst_98 = arith.constant dense<0.000000e+00> : vector<2x256xf32>
    %215 = tpu.matmul %210, %54, %cst_98 {dimension_numbers = #tpu.dot_dimension_numbers<[1], [0], [0], [1], [0, 0, 1, 1], [], []>} : vector<2x32xf32>, vector<32x256xf32>, vector<2x256xf32> -> vector<2x256xf32>
    %216 = vector.extract_strided_slice %215 {offsets = [0, 0], sizes = [2, 128], strides = [1, 1]} : vector<2x256xf32> to vector<2x128xf32>
    %217 = vector.extract_strided_slice %215 {offsets = [0, 128], sizes = [2, 128], strides = [1, 1]} : vector<2x256xf32> to vector<2x128xf32>
    %218 = arith.select %12, %216, %217 : vector<2x128xi1>, vector<2x128xf32>
    %219 = arith.index_cast %214 : i32 to index
    %c0_99 = arith.constant 0 : index
    %220 = vector.load %arg13[%219, %c0_99] : memref<16x128xf32, #tpu.memory_space<vmem>>, vector<2x128xf32>
    %221 = arith.addf %220, %218 : vector<2x128xf32>
    %222 = arith.negf %221 : vector<2x128xf32>
    %223 = math.exp %222 : vector<2x128xf32>
    %cst_100 = arith.constant 1.000000e+00 : f32
    %224 = vector.broadcast %cst_100 : f32 to vector<2x128xf32>
    %225 = arith.addf %224, %223 : vector<2x128xf32>
    %226 = arith.divf %224, %225 : vector<2x128xf32>
    %227 = math.tanh %221 : vector<2x128xf32>
    %228 = vector.extract_strided_slice %226 {offsets = [0, 32], sizes = [2, 32], strides = [1, 1]} : vector<2x128xf32> to vector<2x32xf32>
    %229 = arith.mulf %228, %207 : vector<2x32xf32>
    %230 = vector.extract_strided_slice %226 {offsets = [0, 0], sizes = [2, 32], strides = [1, 1]} : vector<2x128xf32> to vector<2x32xf32>
    %231 = vector.extract_strided_slice %227 {offsets = [0, 64], sizes = [2, 32], strides = [1, 1]} : vector<2x128xf32> to vector<2x32xf32>
    %232 = arith.mulf %230, %231 : vector<2x32xf32>
    %233 = arith.addf %229, %232 : vector<2x32xf32>
    %234 = vector.extract_strided_slice %226 {offsets = [0, 96], sizes = [2, 32], strides = [1, 1]} : vector<2x128xf32> to vector<2x32xf32>
    %235 = math.tanh %233 : vector<2x32xf32>
    %236 = arith.mulf %234, %235 : vector<2x32xf32>
    %237 = arith.index_cast %214 : i32 to index
    %c0_101 = arith.constant 0 : index
    %238 = vector.load %arg14[%237, %c0_101] : memref<16x32xf32, #tpu.memory_space<vmem>>, vector<2x32xf32>
    tpu.vector_store %arg14[%237, %c0_101], %236 {strides = array<i32>} : memref<16x32xf32, #tpu.memory_space<vmem>>, vector<2x32xf32>,
    %c7_i32 = arith.constant 7 : i32
    %c2_i32_102 = arith.constant 2 : i32
    %239 = arith.muli %c2_i32_102, %c7_i32 : i32
    %240 = tpu.assume_multiple %239, 2 : i32
    %cst_103 = arith.constant dense<0.000000e+00> : vector<2x256xf32>
    %241 = tpu.matmul %236, %54, %cst_103 {dimension_numbers = #tpu.dot_dimension_numbers<[1], [0], [0], [1], [0, 0, 1, 1], [], []>} : vector<2x32xf32>, vector<32x256xf32>, vector<2x256xf32> -> vector<2x256xf32>
    %242 = vector.extract_strided_slice %241 {offsets = [0, 0], sizes = [2, 128], strides = [1, 1]} : vector<2x256xf32> to vector<2x128xf32>
    %243 = vector.extract_strided_slice %241 {offsets = [0, 128], sizes = [2, 128], strides = [1, 1]} : vector<2x256xf32> to vector<2x128xf32>
    %244 = arith.select %12, %242, %243 : vector<2x128xi1>, vector<2x128xf32>
    %245 = arith.index_cast %240 : i32 to index
    %c0_104 = arith.constant 0 : index
    %246 = vector.load %arg13[%245, %c0_104] : memref<16x128xf32, #tpu.memory_space<vmem>>, vector<2x128xf32>
    %247 = arith.addf %246, %244 : vector<2x128xf32>
    %248 = arith.negf %247 : vector<2x128xf32>
    %249 = math.exp %248 : vector<2x128xf32>
    %cst_105 = arith.constant 1.000000e+00 : f32
    %250 = vector.broadcast %cst_105 : f32 to vector<2x128xf32>
    %251 = arith.addf %250, %249 : vector<2x128xf32>
    %252 = arith.divf %250, %251 : vector<2x128xf32>
    %253 = math.tanh %247 : vector<2x128xf32>
    %254 = vector.extract_strided_slice %252 {offsets = [0, 32], sizes = [2, 32], strides = [1, 1]} : vector<2x128xf32> to vector<2x32xf32>
    %255 = arith.mulf %254, %233 : vector<2x32xf32>
    %256 = vector.extract_strided_slice %252 {offsets = [0, 0], sizes = [2, 32], strides = [1, 1]} : vector<2x128xf32> to vector<2x32xf32>
    %257 = vector.extract_strided_slice %253 {offsets = [0, 64], sizes = [2, 32], strides = [1, 1]} : vector<2x128xf32> to vector<2x32xf32>
    %258 = arith.mulf %256, %257 : vector<2x32xf32>
    %259 = arith.addf %255, %258 : vector<2x32xf32>
    %260 = vector.extract_strided_slice %252 {offsets = [0, 96], sizes = [2, 32], strides = [1, 1]} : vector<2x128xf32> to vector<2x32xf32>
    %261 = math.tanh %259 : vector<2x32xf32>
    %262 = arith.mulf %260, %261 : vector<2x32xf32>
    %263 = arith.index_cast %240 : i32 to index
    %c0_106 = arith.constant 0 : index
    %264 = vector.load %arg14[%263, %c0_106] : memref<16x32xf32, #tpu.memory_space<vmem>>, vector<2x32xf32>
    tpu.vector_store %arg14[%263, %c0_106], %262 {strides = array<i32>} : memref<16x32xf32, #tpu.memory_space<vmem>>, vector<2x32xf32>,
    %c8_i32 = arith.constant 8 : i32
    %c0_107 = arith.constant 0 : index
    %c0_108 = arith.constant 0 : index
    %265 = vector.load %arg14[%c0_107, %c0_108] : memref<16x32xf32, #tpu.memory_space<vmem>>, vector<1x32xf32>
    %c0_109 = arith.constant 0 : index
    %c0_110 = arith.constant 0 : index
    %266 = vector.load %arg15[%c0_109, %c0_110] : memref<8x64xf32, #tpu.memory_space<vmem>>, vector<1x32xf32>
    tpu.vector_store %arg15[%c0_109, %c0_110], %265 {strides = array<i32>} : memref<8x64xf32, #tpu.memory_space<vmem>>, vector<1x32xf32>,
    %c15_111 = arith.constant 15 : index
    %c0_112 = arith.constant 0 : index
    %267 = vector.load %arg14[%c15_111, %c0_112] : memref<16x32xf32, #tpu.memory_space<vmem>>, vector<1x32xf32>
    %c0_113 = arith.constant 0 : index
    %c32 = arith.constant 32 : index
    %268 = vector.load %arg15[%c0_113, %c32] : memref<8x64xf32, #tpu.memory_space<vmem>>, vector<1x32xf32>
    tpu.vector_store %arg15[%c0_113, %c32], %267 {strides = array<i32>} : memref<8x64xf32, #tpu.memory_space<vmem>>, vector<1x32xf32>,
    %c2_114 = arith.constant 2 : index
    %c0_115 = arith.constant 0 : index
    %269 = vector.load %arg14[%c2_114, %c0_115] : memref<16x32xf32, #tpu.memory_space<vmem>>, vector<1x32xf32>
    %c1_116 = arith.constant 1 : index
    %c0_117 = arith.constant 0 : index
    %270 = vector.load %arg15[%c1_116, %c0_117] : memref<8x64xf32, #tpu.memory_space<vmem>>, vector<1x32xf32>
    tpu.vector_store %arg15[%c1_116, %c0_117], %269 {strides = array<i32>} : memref<8x64xf32, #tpu.memory_space<vmem>>, vector<1x32xf32>,
    %c13_118 = arith.constant 13 : index
    %c0_119 = arith.constant 0 : index
    %271 = vector.load %arg14[%c13_118, %c0_119] : memref<16x32xf32, #tpu.memory_space<vmem>>, vector<1x32xf32>
    %c1_120 = arith.constant 1 : index
    %c32_121 = arith.constant 32 : index
    %272 = vector.load %arg15[%c1_120, %c32_121] : memref<8x64xf32, #tpu.memory_space<vmem>>, vector<1x32xf32>
    tpu.vector_store %arg15[%c1_120, %c32_121], %271 {strides = array<i32>} : memref<8x64xf32, #tpu.memory_space<vmem>>, vector<1x32xf32>,
    %c4_122 = arith.constant 4 : index
    %c0_123 = arith.constant 0 : index
    %273 = vector.load %arg14[%c4_122, %c0_123] : memref<16x32xf32, #tpu.memory_space<vmem>>, vector<1x32xf32>
    %c2_124 = arith.constant 2 : index
    %c0_125 = arith.constant 0 : index
    %274 = vector.load %arg15[%c2_124, %c0_125] : memref<8x64xf32, #tpu.memory_space<vmem>>, vector<1x32xf32>
    tpu.vector_store %arg15[%c2_124, %c0_125], %273 {strides = array<i32>} : memref<8x64xf32, #tpu.memory_space<vmem>>, vector<1x32xf32>,
    %c11_126 = arith.constant 11 : index
    %c0_127 = arith.constant 0 : index
    %275 = vector.load %arg14[%c11_126, %c0_127] : memref<16x32xf32, #tpu.memory_space<vmem>>, vector<1x32xf32>
    %c2_128 = arith.constant 2 : index
    %c32_129 = arith.constant 32 : index
    %276 = vector.load %arg15[%c2_128, %c32_129] : memref<8x64xf32, #tpu.memory_space<vmem>>, vector<1x32xf32>
    tpu.vector_store %arg15[%c2_128, %c32_129], %275 {strides = array<i32>} : memref<8x64xf32, #tpu.memory_space<vmem>>, vector<1x32xf32>,
    %c6_130 = arith.constant 6 : index
    %c0_131 = arith.constant 0 : index
    %277 = vector.load %arg14[%c6_130, %c0_131] : memref<16x32xf32, #tpu.memory_space<vmem>>, vector<1x32xf32>
    %c3_132 = arith.constant 3 : index
    %c0_133 = arith.constant 0 : index
    %278 = vector.load %arg15[%c3_132, %c0_133] : memref<8x64xf32, #tpu.memory_space<vmem>>, vector<1x32xf32>
    tpu.vector_store %arg15[%c3_132, %c0_133], %277 {strides = array<i32>} : memref<8x64xf32, #tpu.memory_space<vmem>>, vector<1x32xf32>,
    %c9_134 = arith.constant 9 : index
    %c0_135 = arith.constant 0 : index
    %279 = vector.load %arg14[%c9_134, %c0_135] : memref<16x32xf32, #tpu.memory_space<vmem>>, vector<1x32xf32>
    %c3_136 = arith.constant 3 : index
    %c32_137 = arith.constant 32 : index
    %280 = vector.load %arg15[%c3_136, %c32_137] : memref<8x64xf32, #tpu.memory_space<vmem>>, vector<1x32xf32>
    tpu.vector_store %arg15[%c3_136, %c32_137], %279 {strides = array<i32>} : memref<8x64xf32, #tpu.memory_space<vmem>>, vector<1x32xf32>,
    %c8_138 = arith.constant 8 : index
    %c0_139 = arith.constant 0 : index
    %281 = vector.load %arg14[%c8_138, %c0_139] : memref<16x32xf32, #tpu.memory_space<vmem>>, vector<1x32xf32>
    %c4_140 = arith.constant 4 : index
    %c0_141 = arith.constant 0 : index
    %282 = vector.load %arg15[%c4_140, %c0_141] : memref<8x64xf32, #tpu.memory_space<vmem>>, vector<1x32xf32>
    tpu.vector_store %arg15[%c4_140, %c0_141], %281 {strides = array<i32>} : memref<8x64xf32, #tpu.memory_space<vmem>>, vector<1x32xf32>,
    %c7_142 = arith.constant 7 : index
    %c0_143 = arith.constant 0 : index
    %283 = vector.load %arg14[%c7_142, %c0_143] : memref<16x32xf32, #tpu.memory_space<vmem>>, vector<1x32xf32>
    %c4_144 = arith.constant 4 : index
    %c32_145 = arith.constant 32 : index
    %284 = vector.load %arg15[%c4_144, %c32_145] : memref<8x64xf32, #tpu.memory_space<vmem>>, vector<1x32xf32>
    tpu.vector_store %arg15[%c4_144, %c32_145], %283 {strides = array<i32>} : memref<8x64xf32, #tpu.memory_space<vmem>>, vector<1x32xf32>,
    %c10_146 = arith.constant 10 : index
    %c0_147 = arith.constant 0 : index
    %285 = vector.load %arg14[%c10_146, %c0_147] : memref<16x32xf32, #tpu.memory_space<vmem>>, vector<1x32xf32>
    %c5_148 = arith.constant 5 : index
    %c0_149 = arith.constant 0 : index
    %286 = vector.load %arg15[%c5_148, %c0_149] : memref<8x64xf32, #tpu.memory_space<vmem>>, vector<1x32xf32>
    tpu.vector_store %arg15[%c5_148, %c0_149], %285 {strides = array<i32>} : memref<8x64xf32, #tpu.memory_space<vmem>>, vector<1x32xf32>,
    %c5_150 = arith.constant 5 : index
    %c0_151 = arith.constant 0 : index
    %287 = vector.load %arg14[%c5_150, %c0_151] : memref<16x32xf32, #tpu.memory_space<vmem>>, vector<1x32xf32>
    %c5_152 = arith.constant 5 : index
    %c32_153 = arith.constant 32 : index
    %288 = vector.load %arg15[%c5_152, %c32_153] : memref<8x64xf32, #tpu.memory_space<vmem>>, vector<1x32xf32>
    tpu.vector_store %arg15[%c5_152, %c32_153], %287 {strides = array<i32>} : memref<8x64xf32, #tpu.memory_space<vmem>>, vector<1x32xf32>,
    %c12_154 = arith.constant 12 : index
    %c0_155 = arith.constant 0 : index
    %289 = vector.load %arg14[%c12_154, %c0_155] : memref<16x32xf32, #tpu.memory_space<vmem>>, vector<1x32xf32>
    %c6_156 = arith.constant 6 : index
    %c0_157 = arith.constant 0 : index
    %290 = vector.load %arg15[%c6_156, %c0_157] : memref<8x64xf32, #tpu.memory_space<vmem>>, vector<1x32xf32>
    tpu.vector_store %arg15[%c6_156, %c0_157], %289 {strides = array<i32>} : memref<8x64xf32, #tpu.memory_space<vmem>>, vector<1x32xf32>,
    %c3_158 = arith.constant 3 : index
    %c0_159 = arith.constant 0 : index
    %291 = vector.load %arg14[%c3_158, %c0_159] : memref<16x32xf32, #tpu.memory_space<vmem>>, vector<1x32xf32>
    %c6_160 = arith.constant 6 : index
    %c32_161 = arith.constant 32 : index
    %292 = vector.load %arg15[%c6_160, %c32_161] : memref<8x64xf32, #tpu.memory_space<vmem>>, vector<1x32xf32>
    tpu.vector_store %arg15[%c6_160, %c32_161], %291 {strides = array<i32>} : memref<8x64xf32, #tpu.memory_space<vmem>>, vector<1x32xf32>,
    %c14_162 = arith.constant 14 : index
    %c0_163 = arith.constant 0 : index
    %293 = vector.load %arg14[%c14_162, %c0_163] : memref<16x32xf32, #tpu.memory_space<vmem>>, vector<1x32xf32>
    %c7_164 = arith.constant 7 : index
    %c0_165 = arith.constant 0 : index
    %294 = vector.load %arg15[%c7_164, %c0_165] : memref<8x64xf32, #tpu.memory_space<vmem>>, vector<1x32xf32>
    tpu.vector_store %arg15[%c7_164, %c0_165], %293 {strides = array<i32>} : memref<8x64xf32, #tpu.memory_space<vmem>>, vector<1x32xf32>,
    %c1_166 = arith.constant 1 : index
    %c0_167 = arith.constant 0 : index
    %295 = vector.load %arg14[%c1_166, %c0_167] : memref<16x32xf32, #tpu.memory_space<vmem>>, vector<1x32xf32>
    %c7_168 = arith.constant 7 : index
    %c32_169 = arith.constant 32 : index
    %296 = vector.load %arg15[%c7_168, %c32_169] : memref<8x64xf32, #tpu.memory_space<vmem>>, vector<1x32xf32>
    tpu.vector_store %arg15[%c7_168, %c32_169], %295 {strides = array<i32>} : memref<8x64xf32, #tpu.memory_space<vmem>>, vector<1x32xf32>,
    %c0_170 = arith.constant 0 : index
    %c0_171 = arith.constant 0 : index
    %297 = vector.load %arg15[%c0_170, %c0_171] : memref<8x64xf32, #tpu.memory_space<vmem>>, vector<8x64xf32>
    %c0_172 = arith.constant 0 : index
    %c0_173 = arith.constant 0 : index
    %298 = vector.load %arg5[%c0_172, %c0_173] : memref<64x256xbf16, #tpu.memory_space<vmem>>, vector<64x256xbf16>
    %299 = arith.extf %298 : vector<64x256xbf16> to vector<64x256xf32>
    %cst_174 = arith.constant dense<0.000000e+00> : vector<8x256xf32>
    %300 = tpu.matmul %297, %299, %cst_174 {dimension_numbers = #tpu.dot_dimension_numbers<[1], [0], [0], [1], [0, 0, 1, 1], [], []>} : vector<8x64xf32>, vector<64x256xf32>, vector<8x256xf32> -> vector<8x256xf32>
    %c0_175 = arith.constant 0 : index
    %c0_176 = arith.constant 0 : index
    %301 = vector.load %arg7[%c0_175, %c0_176] : memref<1x256xf32, #tpu.memory_space<vmem>>, vector<1x256xf32>
    %302 = vector.broadcast %301 : vector<1x256xf32> to vector<8x256xf32>
    %303 = arith.addf %300, %302 : vector<8x256xf32>
    %c0_177 = arith.constant 0 : index
    %c0_178 = arith.constant 0 : index
    %304 = vector.load %arg12[%c0_177, %c0_178] : memref<8x256xf32, #tpu.memory_space<vmem>>, vector<8x256xf32>
    tpu.vector_store %arg12[%c0_177, %c0_178], %303 {strides = array<i32>} : memref<8x256xf32, #tpu.memory_space<vmem>>, vector<8x256xf32>,
    %c0_179 = arith.constant 0 : index
    %c0_180 = arith.constant 0 : index
    %305 = vector.load %arg12[%c0_179, %c0_180] : memref<8x256xf32, #tpu.memory_space<vmem>>, vector<1x128xf32>
    %c0_181 = arith.constant 0 : index
    %c0_182 = arith.constant 0 : index
    %306 = vector.load %arg13[%c0_181, %c0_182] : memref<16x128xf32, #tpu.memory_space<vmem>>, vector<1x128xf32>
    tpu.vector_store %arg13[%c0_181, %c0_182], %305 {strides = array<i32>} : memref<16x128xf32, #tpu.memory_space<vmem>>, vector<1x128xf32>,
    %c7_183 = arith.constant 7 : index
    %c128_184 = arith.constant 128 : index
    %307 = vector.load %arg12[%c7_183, %c128_184] : memref<8x256xf32, #tpu.memory_space<vmem>>, vector<1x128xf32>
    %c1_185 = arith.constant 1 : index
    %c0_186 = arith.constant 0 : index
    %308 = vector.load %arg13[%c1_185, %c0_186] : memref<16x128xf32, #tpu.memory_space<vmem>>, vector<1x128xf32>
    tpu.vector_store %arg13[%c1_185, %c0_186], %307 {strides = array<i32>} : memref<16x128xf32, #tpu.memory_space<vmem>>, vector<1x128xf32>,
    %c1_187 = arith.constant 1 : index
    %c0_188 = arith.constant 0 : index
    %309 = vector.load %arg12[%c1_187, %c0_188] : memref<8x256xf32, #tpu.memory_space<vmem>>, vector<1x128xf32>
    %c2_189 = arith.constant 2 : index
    %c0_190 = arith.constant 0 : index
    %310 = vector.load %arg13[%c2_189, %c0_190] : memref<16x128xf32, #tpu.memory_space<vmem>>, vector<1x128xf32>
    tpu.vector_store %arg13[%c2_189, %c0_190], %309 {strides = array<i32>} : memref<16x128xf32, #tpu.memory_space<vmem>>, vector<1x128xf32>,
    %c6_191 = arith.constant 6 : index
    %c128_192 = arith.constant 128 : index
    %311 = vector.load %arg12[%c6_191, %c128_192] : memref<8x256xf32, #tpu.memory_space<vmem>>, vector<1x128xf32>
    %c3_193 = arith.constant 3 : index
    %c0_194 = arith.constant 0 : index
    %312 = vector.load %arg13[%c3_193, %c0_194] : memref<16x128xf32, #tpu.memory_space<vmem>>, vector<1x128xf32>
    tpu.vector_store %arg13[%c3_193, %c0_194], %311 {strides = array<i32>} : memref<16x128xf32, #tpu.memory_space<vmem>>, vector<1x128xf32>,
    %c2_195 = arith.constant 2 : index
    %c0_196 = arith.constant 0 : index
    %313 = vector.load %arg12[%c2_195, %c0_196] : memref<8x256xf32, #tpu.memory_space<vmem>>, vector<1x128xf32>
    %c4_197 = arith.constant 4 : index
    %c0_198 = arith.constant 0 : index
    %314 = vector.load %arg13[%c4_197, %c0_198] : memref<16x128xf32, #tpu.memory_space<vmem>>, vector<1x128xf32>
    tpu.vector_store %arg13[%c4_197, %c0_198], %313 {strides = array<i32>} : memref<16x128xf32, #tpu.memory_space<vmem>>, vector<1x128xf32>,
    %c5_199 = arith.constant 5 : index
    %c128_200 = arith.constant 128 : index
    %315 = vector.load %arg12[%c5_199, %c128_200] : memref<8x256xf32, #tpu.memory_space<vmem>>, vector<1x128xf32>
    %c5_201 = arith.constant 5 : index
    %c0_202 = arith.constant 0 : index
    %316 = vector.load %arg13[%c5_201, %c0_202] : memref<16x128xf32, #tpu.memory_space<vmem>>, vector<1x128xf32>
    tpu.vector_store %arg13[%c5_201, %c0_202], %315 {strides = array<i32>} : memref<16x128xf32, #tpu.memory_space<vmem>>, vector<1x128xf32>,
    %c3_203 = arith.constant 3 : index
    %c0_204 = arith.constant 0 : index
    %317 = vector.load %arg12[%c3_203, %c0_204] : memref<8x256xf32, #tpu.memory_space<vmem>>, vector<1x128xf32>
    %c6_205 = arith.constant 6 : index
    %c0_206 = arith.constant 0 : index
    %318 = vector.load %arg13[%c6_205, %c0_206] : memref<16x128xf32, #tpu.memory_space<vmem>>, vector<1x128xf32>
    tpu.vector_store %arg13[%c6_205, %c0_206], %317 {strides = array<i32>} : memref<16x128xf32, #tpu.memory_space<vmem>>, vector<1x128xf32>,
    %c4_207 = arith.constant 4 : index
    %c128_208 = arith.constant 128 : index
    %319 = vector.load %arg12[%c4_207, %c128_208] : memref<8x256xf32, #tpu.memory_space<vmem>>, vector<1x128xf32>
    %c7_209 = arith.constant 7 : index
    %c0_210 = arith.constant 0 : index
    %320 = vector.load %arg13[%c7_209, %c0_210] : memref<16x128xf32, #tpu.memory_space<vmem>>, vector<1x128xf32>
    tpu.vector_store %arg13[%c7_209, %c0_210], %319 {strides = array<i32>} : memref<16x128xf32, #tpu.memory_space<vmem>>, vector<1x128xf32>,
    %c4_211 = arith.constant 4 : index
    %c0_212 = arith.constant 0 : index
    %321 = vector.load %arg12[%c4_211, %c0_212] : memref<8x256xf32, #tpu.memory_space<vmem>>, vector<1x128xf32>
    %c8_213 = arith.constant 8 : index
    %c0_214 = arith.constant 0 : index
    %322 = vector.load %arg13[%c8_213, %c0_214] : memref<16x128xf32, #tpu.memory_space<vmem>>, vector<1x128xf32>
    tpu.vector_store %arg13[%c8_213, %c0_214], %321 {strides = array<i32>} : memref<16x128xf32, #tpu.memory_space<vmem>>, vector<1x128xf32>,
    %c3_215 = arith.constant 3 : index
    %c128_216 = arith.constant 128 : index
    %323 = vector.load %arg12[%c3_215, %c128_216] : memref<8x256xf32, #tpu.memory_space<vmem>>, vector<1x128xf32>
    %c9_217 = arith.constant 9 : index
    %c0_218 = arith.constant 0 : index
    %324 = vector.load %arg13[%c9_217, %c0_218] : memref<16x128xf32, #tpu.memory_space<vmem>>, vector<1x128xf32>
    tpu.vector_store %arg13[%c9_217, %c0_218], %323 {strides = array<i32>} : memref<16x128xf32, #tpu.memory_space<vmem>>, vector<1x128xf32>,
    %c5_219 = arith.constant 5 : index
    %c0_220 = arith.constant 0 : index
    %325 = vector.load %arg12[%c5_219, %c0_220] : memref<8x256xf32, #tpu.memory_space<vmem>>, vector<1x128xf32>
    %c10_221 = arith.constant 10 : index
    %c0_222 = arith.constant 0 : index
    %326 = vector.load %arg13[%c10_221, %c0_222] : memref<16x128xf32, #tpu.memory_space<vmem>>, vector<1x128xf32>
    tpu.vector_store %arg13[%c10_221, %c0_222], %325 {strides = array<i32>} : memref<16x128xf32, #tpu.memory_space<vmem>>, vector<1x128xf32>,
    %c2_223 = arith.constant 2 : index
    %c128_224 = arith.constant 128 : index
    %327 = vector.load %arg12[%c2_223, %c128_224] : memref<8x256xf32, #tpu.memory_space<vmem>>, vector<1x128xf32>
    %c11_225 = arith.constant 11 : index
    %c0_226 = arith.constant 0 : index
    %328 = vector.load %arg13[%c11_225, %c0_226] : memref<16x128xf32, #tpu.memory_space<vmem>>, vector<1x128xf32>
    tpu.vector_store %arg13[%c11_225, %c0_226], %327 {strides = array<i32>} : memref<16x128xf32, #tpu.memory_space<vmem>>, vector<1x128xf32>,
    %c6_227 = arith.constant 6 : index
    %c0_228 = arith.constant 0 : index
    %329 = vector.load %arg12[%c6_227, %c0_228] : memref<8x256xf32, #tpu.memory_space<vmem>>, vector<1x128xf32>
    %c12_229 = arith.constant 12 : index
    %c0_230 = arith.constant 0 : index
    %330 = vector.load %arg13[%c12_229, %c0_230] : memref<16x128xf32, #tpu.memory_space<vmem>>, vector<1x128xf32>
    tpu.vector_store %arg13[%c12_229, %c0_230], %329 {strides = array<i32>} : memref<16x128xf32, #tpu.memory_space<vmem>>, vector<1x128xf32>,
    %c1_231 = arith.constant 1 : index
    %c128_232 = arith.constant 128 : index
    %331 = vector.load %arg12[%c1_231, %c128_232] : memref<8x256xf32, #tpu.memory_space<vmem>>, vector<1x128xf32>
    %c13_233 = arith.constant 13 : index
    %c0_234 = arith.constant 0 : index
    %332 = vector.load %arg13[%c13_233, %c0_234] : memref<16x128xf32, #tpu.memory_space<vmem>>, vector<1x128xf32>
    tpu.vector_store %arg13[%c13_233, %c0_234], %331 {strides = array<i32>} : memref<16x128xf32, #tpu.memory_space<vmem>>, vector<1x128xf32>,
    %c7_235 = arith.constant 7 : index
    %c0_236 = arith.constant 0 : index
    %333 = vector.load %arg12[%c7_235, %c0_236] : memref<8x256xf32, #tpu.memory_space<vmem>>, vector<1x128xf32>
    %c14_237 = arith.constant 14 : index
    %c0_238 = arith.constant 0 : index
    %334 = vector.load %arg13[%c14_237, %c0_238] : memref<16x128xf32, #tpu.memory_space<vmem>>, vector<1x128xf32>
    tpu.vector_store %arg13[%c14_237, %c0_238], %333 {strides = array<i32>} : memref<16x128xf32, #tpu.memory_space<vmem>>, vector<1x128xf32>,
    %c0_239 = arith.constant 0 : index
    %c128_240 = arith.constant 128 : index
    %335 = vector.load %arg12[%c0_239, %c128_240] : memref<8x256xf32, #tpu.memory_space<vmem>>, vector<1x128xf32>
    %c15_241 = arith.constant 15 : index
    %c0_242 = arith.constant 0 : index
    %336 = vector.load %arg13[%c15_241, %c0_242] : memref<16x128xf32, #tpu.memory_space<vmem>>, vector<1x128xf32>
    tpu.vector_store %arg13[%c15_241, %c0_242], %335 {strides = array<i32>} : memref<16x128xf32, #tpu.memory_space<vmem>>, vector<1x128xf32>,
    %c0_243 = arith.constant 0 : index
    %c0_244 = arith.constant 0 : index
    %337 = vector.load %arg6[%c0_243, %c0_244] : memref<32x256xbf16, #tpu.memory_space<vmem>>, vector<32x256xbf16>
    %338 = arith.extf %337 : vector<32x256xbf16> to vector<32x256xf32>
    %cst_245 = arith.constant 0.000000e+00 : f32
    %339 = vector.broadcast %cst_245 : f32 to vector<2x32xf32>
    %cst_246 = arith.constant 0.000000e+00 : f32
    %340 = vector.broadcast %cst_246 : f32 to vector<2x32xf32>
    %c0_i32_247 = arith.constant 0 : i32
    %c2_i32_248 = arith.constant 2 : i32
    %341 = arith.muli %c2_i32_248, %c0_i32_247 : i32
    %342 = tpu.assume_multiple %341, 2 : i32
    %cst_249 = arith.constant dense<0.000000e+00> : vector<2x256xf32>
    %343 = tpu.matmul %339, %338, %cst_249 {dimension_numbers = #tpu.dot_dimension_numbers<[1], [0], [0], [1], [0, 0, 1, 1], [], []>} : vector<2x32xf32>, vector<32x256xf32>, vector<2x256xf32> -> vector<2x256xf32>
    %344 = vector.extract_strided_slice %343 {offsets = [0, 0], sizes = [2, 128], strides = [1, 1]} : vector<2x256xf32> to vector<2x128xf32>
    %345 = vector.extract_strided_slice %343 {offsets = [0, 128], sizes = [2, 128], strides = [1, 1]} : vector<2x256xf32> to vector<2x128xf32>
    %346 = arith.select %12, %344, %345 : vector<2x128xi1>, vector<2x128xf32>
    %347 = arith.index_cast %342 : i32 to index
    %c0_250 = arith.constant 0 : index
    %348 = vector.load %arg13[%347, %c0_250] : memref<16x128xf32, #tpu.memory_space<vmem>>, vector<2x128xf32>
    %349 = arith.addf %348, %346 : vector<2x128xf32>
    %350 = arith.negf %349 : vector<2x128xf32>
    %351 = math.exp %350 : vector<2x128xf32>
    %cst_251 = arith.constant 1.000000e+00 : f32
    %352 = vector.broadcast %cst_251 : f32 to vector<2x128xf32>
    %353 = arith.addf %352, %351 : vector<2x128xf32>
    %354 = arith.divf %352, %353 : vector<2x128xf32>
    %355 = math.tanh %349 : vector<2x128xf32>
    %356 = vector.extract_strided_slice %354 {offsets = [0, 32], sizes = [2, 32], strides = [1, 1]} : vector<2x128xf32> to vector<2x32xf32>
    %357 = arith.mulf %356, %340 : vector<2x32xf32>
    %358 = vector.extract_strided_slice %354 {offsets = [0, 0], sizes = [2, 32], strides = [1, 1]} : vector<2x128xf32> to vector<2x32xf32>
    %359 = vector.extract_strided_slice %355 {offsets = [0, 64], sizes = [2, 32], strides = [1, 1]} : vector<2x128xf32> to vector<2x32xf32>
    %360 = arith.mulf %358, %359 : vector<2x32xf32>
    %361 = arith.addf %357, %360 : vector<2x32xf32>
    %362 = vector.extract_strided_slice %354 {offsets = [0, 96], sizes = [2, 32], strides = [1, 1]} : vector<2x128xf32> to vector<2x32xf32>
    %363 = math.tanh %361 : vector<2x32xf32>
    %364 = arith.mulf %362, %363 : vector<2x32xf32>
    %365 = arith.index_cast %342 : i32 to index
    %c0_252 = arith.constant 0 : index
    %366 = vector.load %arg14[%365, %c0_252] : memref<16x32xf32, #tpu.memory_space<vmem>>, vector<2x32xf32>
    tpu.vector_store %arg14[%365, %c0_252], %364 {strides = array<i32>} : memref<16x32xf32, #tpu.memory_space<vmem>>, vector<2x32xf32>,
    %c1_i32_253 = arith.constant 1 : i32
    %c2_i32_254 = arith.constant 2 : i32
    %367 = arith.muli %c2_i32_254, %c1_i32_253 : i32
    %368 = tpu.assume_multiple %367, 2 : i32
    %cst_255 = arith.constant dense<0.000000e+00> : vector<2x256xf32>
    %369 = tpu.matmul %364, %338, %cst_255 {dimension_numbers = #tpu.dot_dimension_numbers<[1], [0], [0], [1], [0, 0, 1, 1], [], []>} : vector<2x32xf32>, vector<32x256xf32>, vector<2x256xf32> -> vector<2x256xf32>
    %370 = vector.extract_strided_slice %369 {offsets = [0, 0], sizes = [2, 128], strides = [1, 1]} : vector<2x256xf32> to vector<2x128xf32>
    %371 = vector.extract_strided_slice %369 {offsets = [0, 128], sizes = [2, 128], strides = [1, 1]} : vector<2x256xf32> to vector<2x128xf32>
    %372 = arith.select %12, %370, %371 : vector<2x128xi1>, vector<2x128xf32>
    %373 = arith.index_cast %368 : i32 to index
    %c0_256 = arith.constant 0 : index
    %374 = vector.load %arg13[%373, %c0_256] : memref<16x128xf32, #tpu.memory_space<vmem>>, vector<2x128xf32>
    %375 = arith.addf %374, %372 : vector<2x128xf32>
    %376 = arith.negf %375 : vector<2x128xf32>
    %377 = math.exp %376 : vector<2x128xf32>
    %cst_257 = arith.constant 1.000000e+00 : f32
    %378 = vector.broadcast %cst_257 : f32 to vector<2x128xf32>
    %379 = arith.addf %378, %377 : vector<2x128xf32>
    %380 = arith.divf %378, %379 : vector<2x128xf32>
    %381 = math.tanh %375 : vector<2x128xf32>
    %382 = vector.extract_strided_slice %380 {offsets = [0, 32], sizes = [2, 32], strides = [1, 1]} : vector<2x128xf32> to vector<2x32xf32>
    %383 = arith.mulf %382, %361 : vector<2x32xf32>
    %384 = vector.extract_strided_slice %380 {offsets = [0, 0], sizes = [2, 32], strides = [1, 1]} : vector<2x128xf32> to vector<2x32xf32>
    %385 = vector.extract_strided_slice %381 {offsets = [0, 64], sizes = [2, 32], strides = [1, 1]} : vector<2x128xf32> to vector<2x32xf32>
    %386 = arith.mulf %384, %385 : vector<2x32xf32>
    %387 = arith.addf %383, %386 : vector<2x32xf32>
    %388 = vector.extract_strided_slice %380 {offsets = [0, 96], sizes = [2, 32], strides = [1, 1]} : vector<2x128xf32> to vector<2x32xf32>
    %389 = math.tanh %387 : vector<2x32xf32>
    %390 = arith.mulf %388, %389 : vector<2x32xf32>
    %391 = arith.index_cast %368 : i32 to index
    %c0_258 = arith.constant 0 : index
    %392 = vector.load %arg14[%391, %c0_258] : memref<16x32xf32, #tpu.memory_space<vmem>>, vector<2x32xf32>
    tpu.vector_store %arg14[%391, %c0_258], %390 {strides = array<i32>} : memref<16x32xf32, #tpu.memory_space<vmem>>, vector<2x32xf32>,
    %c2_i32_259 = arith.constant 2 : i32
    %c2_i32_260 = arith.constant 2 : i32
    %393 = arith.muli %c2_i32_260, %c2_i32_259 : i32
    %394 = tpu.assume_multiple %393, 2 : i32
    %cst_261 = arith.constant dense<0.000000e+00> : vector<2x256xf32>
    %395 = tpu.matmul %390, %338, %cst_261 {dimension_numbers = #tpu.dot_dimension_numbers<[1], [0], [0], [1], [0, 0, 1, 1], [], []>} : vector<2x32xf32>, vector<32x256xf32>, vector<2x256xf32> -> vector<2x256xf32>
    %396 = vector.extract_strided_slice %395 {offsets = [0, 0], sizes = [2, 128], strides = [1, 1]} : vector<2x256xf32> to vector<2x128xf32>
    %397 = vector.extract_strided_slice %395 {offsets = [0, 128], sizes = [2, 128], strides = [1, 1]} : vector<2x256xf32> to vector<2x128xf32>
    %398 = arith.select %12, %396, %397 : vector<2x128xi1>, vector<2x128xf32>
    %399 = arith.index_cast %394 : i32 to index
    %c0_262 = arith.constant 0 : index
    %400 = vector.load %arg13[%399, %c0_262] : memref<16x128xf32, #tpu.memory_space<vmem>>, vector<2x128xf32>
    %401 = arith.addf %400, %398 : vector<2x128xf32>
    %402 = arith.negf %401 : vector<2x128xf32>
    %403 = math.exp %402 : vector<2x128xf32>
    %cst_263 = arith.constant 1.000000e+00 : f32
    %404 = vector.broadcast %cst_263 : f32 to vector<2x128xf32>
    %405 = arith.addf %404, %403 : vector<2x128xf32>
    %406 = arith.divf %404, %405 : vector<2x128xf32>
    %407 = math.tanh %401 : vector<2x128xf32>
    %408 = vector.extract_strided_slice %406 {offsets = [0, 32], sizes = [2, 32], strides = [1, 1]} : vector<2x128xf32> to vector<2x32xf32>
    %409 = arith.mulf %408, %387 : vector<2x32xf32>
    %410 = vector.extract_strided_slice %406 {offsets = [0, 0], sizes = [2, 32], strides = [1, 1]} : vector<2x128xf32> to vector<2x32xf32>
    %411 = vector.extract_strided_slice %407 {offsets = [0, 64], sizes = [2, 32], strides = [1, 1]} : vector<2x128xf32> to vector<2x32xf32>
    %412 = arith.mulf %410, %411 : vector<2x32xf32>
    %413 = arith.addf %409, %412 : vector<2x32xf32>
    %414 = vector.extract_strided_slice %406 {offsets = [0, 96], sizes = [2, 32], strides = [1, 1]} : vector<2x128xf32> to vector<2x32xf32>
    %415 = math.tanh %413 : vector<2x32xf32>
    %416 = arith.mulf %414, %415 : vector<2x32xf32>
    %417 = arith.index_cast %394 : i32 to index
    %c0_264 = arith.constant 0 : index
    %418 = vector.load %arg14[%417, %c0_264] : memref<16x32xf32, #tpu.memory_space<vmem>>, vector<2x32xf32>
    tpu.vector_store %arg14[%417, %c0_264], %416 {strides = array<i32>} : memref<16x32xf32, #tpu.memory_space<vmem>>, vector<2x32xf32>,
    %c3_i32_265 = arith.constant 3 : i32
    %c2_i32_266 = arith.constant 2 : i32
    %419 = arith.muli %c2_i32_266, %c3_i32_265 : i32
    %420 = tpu.assume_multiple %419, 2 : i32
    %cst_267 = arith.constant dense<0.000000e+00> : vector<2x256xf32>
    %421 = tpu.matmul %416, %338, %cst_267 {dimension_numbers = #tpu.dot_dimension_numbers<[1], [0], [0], [1], [0, 0, 1, 1], [], []>} : vector<2x32xf32>, vector<32x256xf32>, vector<2x256xf32> -> vector<2x256xf32>
    %422 = vector.extract_strided_slice %421 {offsets = [0, 0], sizes = [2, 128], strides = [1, 1]} : vector<2x256xf32> to vector<2x128xf32>
    %423 = vector.extract_strided_slice %421 {offsets = [0, 128], sizes = [2, 128], strides = [1, 1]} : vector<2x256xf32> to vector<2x128xf32>
    %424 = arith.select %12, %422, %423 : vector<2x128xi1>, vector<2x128xf32>
    %425 = arith.index_cast %420 : i32 to index
    %c0_268 = arith.constant 0 : index
    %426 = vector.load %arg13[%425, %c0_268] : memref<16x128xf32, #tpu.memory_space<vmem>>, vector<2x128xf32>
    %427 = arith.addf %426, %424 : vector<2x128xf32>
    %428 = arith.negf %427 : vector<2x128xf32>
    %429 = math.exp %428 : vector<2x128xf32>
    %cst_269 = arith.constant 1.000000e+00 : f32
    %430 = vector.broadcast %cst_269 : f32 to vector<2x128xf32>
    %431 = arith.addf %430, %429 : vector<2x128xf32>
    %432 = arith.divf %430, %431 : vector<2x128xf32>
    %433 = math.tanh %427 : vector<2x128xf32>
    %434 = vector.extract_strided_slice %432 {offsets = [0, 32], sizes = [2, 32], strides = [1, 1]} : vector<2x128xf32> to vector<2x32xf32>
    %435 = arith.mulf %434, %413 : vector<2x32xf32>
    %436 = vector.extract_strided_slice %432 {offsets = [0, 0], sizes = [2, 32], strides = [1, 1]} : vector<2x128xf32> to vector<2x32xf32>
    %437 = vector.extract_strided_slice %433 {offsets = [0, 64], sizes = [2, 32], strides = [1, 1]} : vector<2x128xf32> to vector<2x32xf32>
    %438 = arith.mulf %436, %437 : vector<2x32xf32>
    %439 = arith.addf %435, %438 : vector<2x32xf32>
    %440 = vector.extract_strided_slice %432 {offsets = [0, 96], sizes = [2, 32], strides = [1, 1]} : vector<2x128xf32> to vector<2x32xf32>
    %441 = math.tanh %439 : vector<2x32xf32>
    %442 = arith.mulf %440, %441 : vector<2x32xf32>
    %443 = arith.index_cast %420 : i32 to index
    %c0_270 = arith.constant 0 : index
    %444 = vector.load %arg14[%443, %c0_270] : memref<16x32xf32, #tpu.memory_space<vmem>>, vector<2x32xf32>
    tpu.vector_store %arg14[%443, %c0_270], %442 {strides = array<i32>} : memref<16x32xf32, #tpu.memory_space<vmem>>, vector<2x32xf32>,
    %c4_i32_271 = arith.constant 4 : i32
    %c2_i32_272 = arith.constant 2 : i32
    %445 = arith.muli %c2_i32_272, %c4_i32_271 : i32
    %446 = tpu.assume_multiple %445, 2 : i32
    %cst_273 = arith.constant dense<0.000000e+00> : vector<2x256xf32>
    %447 = tpu.matmul %442, %338, %cst_273 {dimension_numbers = #tpu.dot_dimension_numbers<[1], [0], [0], [1], [0, 0, 1, 1], [], []>} : vector<2x32xf32>, vector<32x256xf32>, vector<2x256xf32> -> vector<2x256xf32>
    %448 = vector.extract_strided_slice %447 {offsets = [0, 0], sizes = [2, 128], strides = [1, 1]} : vector<2x256xf32> to vector<2x128xf32>
    %449 = vector.extract_strided_slice %447 {offsets = [0, 128], sizes = [2, 128], strides = [1, 1]} : vector<2x256xf32> to vector<2x128xf32>
    %450 = arith.select %12, %448, %449 : vector<2x128xi1>, vector<2x128xf32>
    %451 = arith.index_cast %446 : i32 to index
    %c0_274 = arith.constant 0 : index
    %452 = vector.load %arg13[%451, %c0_274] : memref<16x128xf32, #tpu.memory_space<vmem>>, vector<2x128xf32>
    %453 = arith.addf %452, %450 : vector<2x128xf32>
    %454 = arith.negf %453 : vector<2x128xf32>
    %455 = math.exp %454 : vector<2x128xf32>
    %cst_275 = arith.constant 1.000000e+00 : f32
    %456 = vector.broadcast %cst_275 : f32 to vector<2x128xf32>
    %457 = arith.addf %456, %455 : vector<2x128xf32>
    %458 = arith.divf %456, %457 : vector<2x128xf32>
    %459 = math.tanh %453 : vector<2x128xf32>
    %460 = vector.extract_strided_slice %458 {offsets = [0, 32], sizes = [2, 32], strides = [1, 1]} : vector<2x128xf32> to vector<2x32xf32>
    %461 = arith.mulf %460, %439 : vector<2x32xf32>
    %462 = vector.extract_strided_slice %458 {offsets = [0, 0], sizes = [2, 32], strides = [1, 1]} : vector<2x128xf32> to vector<2x32xf32>
    %463 = vector.extract_strided_slice %459 {offsets = [0, 64], sizes = [2, 32], strides = [1, 1]} : vector<2x128xf32> to vector<2x32xf32>
    %464 = arith.mulf %462, %463 : vector<2x32xf32>
    %465 = arith.addf %461, %464 : vector<2x32xf32>
    %466 = vector.extract_strided_slice %458 {offsets = [0, 96], sizes = [2, 32], strides = [1, 1]} : vector<2x128xf32> to vector<2x32xf32>
    %467 = math.tanh %465 : vector<2x32xf32>
    %468 = arith.mulf %466, %467 : vector<2x32xf32>
    %469 = arith.index_cast %446 : i32 to index
    %c0_276 = arith.constant 0 : index
    %470 = vector.load %arg14[%469, %c0_276] : memref<16x32xf32, #tpu.memory_space<vmem>>, vector<2x32xf32>
    tpu.vector_store %arg14[%469, %c0_276], %468 {strides = array<i32>} : memref<16x32xf32, #tpu.memory_space<vmem>>, vector<2x32xf32>,
    %c5_i32_277 = arith.constant 5 : i32
    %c2_i32_278 = arith.constant 2 : i32
    %471 = arith.muli %c2_i32_278, %c5_i32_277 : i32
    %472 = tpu.assume_multiple %471, 2 : i32
    %cst_279 = arith.constant dense<0.000000e+00> : vector<2x256xf32>
    %473 = tpu.matmul %468, %338, %cst_279 {dimension_numbers = #tpu.dot_dimension_numbers<[1], [0], [0], [1], [0, 0, 1, 1], [], []>} : vector<2x32xf32>, vector<32x256xf32>, vector<2x256xf32> -> vector<2x256xf32>
    %474 = vector.extract_strided_slice %473 {offsets = [0, 0], sizes = [2, 128], strides = [1, 1]} : vector<2x256xf32> to vector<2x128xf32>
    %475 = vector.extract_strided_slice %473 {offsets = [0, 128], sizes = [2, 128], strides = [1, 1]} : vector<2x256xf32> to vector<2x128xf32>
    %476 = arith.select %12, %474, %475 : vector<2x128xi1>, vector<2x128xf32>
    %477 = arith.index_cast %472 : i32 to index
    %c0_280 = arith.constant 0 : index
    %478 = vector.load %arg13[%477, %c0_280] : memref<16x128xf32, #tpu.memory_space<vmem>>, vector<2x128xf32>
    %479 = arith.addf %478, %476 : vector<2x128xf32>
    %480 = arith.negf %479 : vector<2x128xf32>
    %481 = math.exp %480 : vector<2x128xf32>
    %cst_281 = arith.constant 1.000000e+00 : f32
    %482 = vector.broadcast %cst_281 : f32 to vector<2x128xf32>
    %483 = arith.addf %482, %481 : vector<2x128xf32>
    %484 = arith.divf %482, %483 : vector<2x128xf32>
    %485 = math.tanh %479 : vector<2x128xf32>
    %486 = vector.extract_strided_slice %484 {offsets = [0, 32], sizes = [2, 32], strides = [1, 1]} : vector<2x128xf32> to vector<2x32xf32>
    %487 = arith.mulf %486, %465 : vector<2x32xf32>
    %488 = vector.extract_strided_slice %484 {offsets = [0, 0], sizes = [2, 32], strides = [1, 1]} : vector<2x128xf32> to vector<2x32xf32>
    %489 = vector.extract_strided_slice %485 {offsets = [0, 64], sizes = [2, 32], strides = [1, 1]} : vector<2x128xf32> to vector<2x32xf32>
    %490 = arith.mulf %488, %489 : vector<2x32xf32>
    %491 = arith.addf %487, %490 : vector<2x32xf32>
    %492 = vector.extract_strided_slice %484 {offsets = [0, 96], sizes = [2, 32], strides = [1, 1]} : vector<2x128xf32> to vector<2x32xf32>
    %493 = math.tanh %491 : vector<2x32xf32>
    %494 = arith.mulf %492, %493 : vector<2x32xf32>
    %495 = arith.index_cast %472 : i32 to index
    %c0_282 = arith.constant 0 : index
    %496 = vector.load %arg14[%495, %c0_282] : memref<16x32xf32, #tpu.memory_space<vmem>>, vector<2x32xf32>
    tpu.vector_store %arg14[%495, %c0_282], %494 {strides = array<i32>} : memref<16x32xf32, #tpu.memory_space<vmem>>, vector<2x32xf32>,
    %c6_i32_283 = arith.constant 6 : i32
    %c2_i32_284 = arith.constant 2 : i32
    %497 = arith.muli %c2_i32_284, %c6_i32_283 : i32
    %498 = tpu.assume_multiple %497, 2 : i32
    %cst_285 = arith.constant dense<0.000000e+00> : vector<2x256xf32>
    %499 = tpu.matmul %494, %338, %cst_285 {dimension_numbers = #tpu.dot_dimension_numbers<[1], [0], [0], [1], [0, 0, 1, 1], [], []>} : vector<2x32xf32>, vector<32x256xf32>, vector<2x256xf32> -> vector<2x256xf32>
    %500 = vector.extract_strided_slice %499 {offsets = [0, 0], sizes = [2, 128], strides = [1, 1]} : vector<2x256xf32> to vector<2x128xf32>
    %501 = vector.extract_strided_slice %499 {offsets = [0, 128], sizes = [2, 128], strides = [1, 1]} : vector<2x256xf32> to vector<2x128xf32>
    %502 = arith.select %12, %500, %501 : vector<2x128xi1>, vector<2x128xf32>
    %503 = arith.index_cast %498 : i32 to index
    %c0_286 = arith.constant 0 : index
    %504 = vector.load %arg13[%503, %c0_286] : memref<16x128xf32, #tpu.memory_space<vmem>>, vector<2x128xf32>
    %505 = arith.addf %504, %502 : vector<2x128xf32>
    %506 = arith.negf %505 : vector<2x128xf32>
    %507 = math.exp %506 : vector<2x128xf32>
    %cst_287 = arith.constant 1.000000e+00 : f32
    %508 = vector.broadcast %cst_287 : f32 to vector<2x128xf32>
    %509 = arith.addf %508, %507 : vector<2x128xf32>
    %510 = arith.divf %508, %509 : vector<2x128xf32>
    %511 = math.tanh %505 : vector<2x128xf32>
    %512 = vector.extract_strided_slice %510 {offsets = [0, 32], sizes = [2, 32], strides = [1, 1]} : vector<2x128xf32> to vector<2x32xf32>
    %513 = arith.mulf %512, %491 : vector<2x32xf32>
    %514 = vector.extract_strided_slice %510 {offsets = [0, 0], sizes = [2, 32], strides = [1, 1]} : vector<2x128xf32> to vector<2x32xf32>
    %515 = vector.extract_strided_slice %511 {offsets = [0, 64], sizes = [2, 32], strides = [1, 1]} : vector<2x128xf32> to vector<2x32xf32>
    %516 = arith.mulf %514, %515 : vector<2x32xf32>
    %517 = arith.addf %513, %516 : vector<2x32xf32>
    %518 = vector.extract_strided_slice %510 {offsets = [0, 96], sizes = [2, 32], strides = [1, 1]} : vector<2x128xf32> to vector<2x32xf32>
    %519 = math.tanh %517 : vector<2x32xf32>
    %520 = arith.mulf %518, %519 : vector<2x32xf32>
    %521 = arith.index_cast %498 : i32 to index
    %c0_288 = arith.constant 0 : index
    %522 = vector.load %arg14[%521, %c0_288] : memref<16x32xf32, #tpu.memory_space<vmem>>, vector<2x32xf32>
    tpu.vector_store %arg14[%521, %c0_288], %520 {strides = array<i32>} : memref<16x32xf32, #tpu.memory_space<vmem>>, vector<2x32xf32>,
    %c7_i32_289 = arith.constant 7 : i32
    %c2_i32_290 = arith.constant 2 : i32
    %523 = arith.muli %c2_i32_290, %c7_i32_289 : i32
    %524 = tpu.assume_multiple %523, 2 : i32
    %cst_291 = arith.constant dense<0.000000e+00> : vector<2x256xf32>
    %525 = tpu.matmul %520, %338, %cst_291 {dimension_numbers = #tpu.dot_dimension_numbers<[1], [0], [0], [1], [0, 0, 1, 1], [], []>} : vector<2x32xf32>, vector<32x256xf32>, vector<2x256xf32> -> vector<2x256xf32>
    %526 = vector.extract_strided_slice %525 {offsets = [0, 0], sizes = [2, 128], strides = [1, 1]} : vector<2x256xf32> to vector<2x128xf32>
    %527 = vector.extract_strided_slice %525 {offsets = [0, 128], sizes = [2, 128], strides = [1, 1]} : vector<2x256xf32> to vector<2x128xf32>
    %528 = arith.select %12, %526, %527 : vector<2x128xi1>, vector<2x128xf32>
    %529 = arith.index_cast %524 : i32 to index
    %c0_292 = arith.constant 0 : index
    %530 = vector.load %arg13[%529, %c0_292] : memref<16x128xf32, #tpu.memory_space<vmem>>, vector<2x128xf32>
    %531 = arith.addf %530, %528 : vector<2x128xf32>
    %532 = arith.negf %531 : vector<2x128xf32>
    %533 = math.exp %532 : vector<2x128xf32>
    %cst_293 = arith.constant 1.000000e+00 : f32
    %534 = vector.broadcast %cst_293 : f32 to vector<2x128xf32>
    %535 = arith.addf %534, %533 : vector<2x128xf32>
    %536 = arith.divf %534, %535 : vector<2x128xf32>
    %537 = math.tanh %531 : vector<2x128xf32>
    %538 = vector.extract_strided_slice %536 {offsets = [0, 32], sizes = [2, 32], strides = [1, 1]} : vector<2x128xf32> to vector<2x32xf32>
    %539 = arith.mulf %538, %517 : vector<2x32xf32>
    %540 = vector.extract_strided_slice %536 {offsets = [0, 0], sizes = [2, 32], strides = [1, 1]} : vector<2x128xf32> to vector<2x32xf32>
    %541 = vector.extract_strided_slice %537 {offsets = [0, 64], sizes = [2, 32], strides = [1, 1]} : vector<2x128xf32> to vector<2x32xf32>
    %542 = arith.mulf %540, %541 : vector<2x32xf32>
    %543 = arith.addf %539, %542 : vector<2x32xf32>
    %544 = vector.extract_strided_slice %536 {offsets = [0, 96], sizes = [2, 32], strides = [1, 1]} : vector<2x128xf32> to vector<2x32xf32>
    %545 = math.tanh %543 : vector<2x32xf32>
    %546 = arith.mulf %544, %545 : vector<2x32xf32>
    %547 = arith.index_cast %524 : i32 to index
    %c0_294 = arith.constant 0 : index
    %548 = vector.load %arg14[%547, %c0_294] : memref<16x32xf32, #tpu.memory_space<vmem>>, vector<2x32xf32>
    tpu.vector_store %arg14[%547, %c0_294], %546 {strides = array<i32>} : memref<16x32xf32, #tpu.memory_space<vmem>>, vector<2x32xf32>,
    %c8_i32_295 = arith.constant 8 : i32
    %c0_296 = arith.constant 0 : index
    %c0_297 = arith.constant 0 : index
    %549 = vector.load %arg14[%c0_296, %c0_297] : memref<16x32xf32, #tpu.memory_space<vmem>>, vector<1x32xf32>
    %c0_298 = arith.constant 0 : index
    %c0_299 = arith.constant 0 : index
    %550 = vector.load %arg16[%c0_298, %c0_299] : memref<8x64xf32, #tpu.memory_space<vmem>>, vector<1x32xf32>
    tpu.vector_store %arg16[%c0_298, %c0_299], %549 {strides = array<i32>} : memref<8x64xf32, #tpu.memory_space<vmem>>, vector<1x32xf32>,
    %c15_300 = arith.constant 15 : index
    %c0_301 = arith.constant 0 : index
    %551 = vector.load %arg14[%c15_300, %c0_301] : memref<16x32xf32, #tpu.memory_space<vmem>>, vector<1x32xf32>
    %c0_302 = arith.constant 0 : index
    %c32_303 = arith.constant 32 : index
    %552 = vector.load %arg16[%c0_302, %c32_303] : memref<8x64xf32, #tpu.memory_space<vmem>>, vector<1x32xf32>
    tpu.vector_store %arg16[%c0_302, %c32_303], %551 {strides = array<i32>} : memref<8x64xf32, #tpu.memory_space<vmem>>, vector<1x32xf32>,
    %c2_304 = arith.constant 2 : index
    %c0_305 = arith.constant 0 : index
    %553 = vector.load %arg14[%c2_304, %c0_305] : memref<16x32xf32, #tpu.memory_space<vmem>>, vector<1x32xf32>
    %c1_306 = arith.constant 1 : index
    %c0_307 = arith.constant 0 : index
    %554 = vector.load %arg16[%c1_306, %c0_307] : memref<8x64xf32, #tpu.memory_space<vmem>>, vector<1x32xf32>
    tpu.vector_store %arg16[%c1_306, %c0_307], %553 {strides = array<i32>} : memref<8x64xf32, #tpu.memory_space<vmem>>, vector<1x32xf32>,
    %c13_308 = arith.constant 13 : index
    %c0_309 = arith.constant 0 : index
    %555 = vector.load %arg14[%c13_308, %c0_309] : memref<16x32xf32, #tpu.memory_space<vmem>>, vector<1x32xf32>
    %c1_310 = arith.constant 1 : index
    %c32_311 = arith.constant 32 : index
    %556 = vector.load %arg16[%c1_310, %c32_311] : memref<8x64xf32, #tpu.memory_space<vmem>>, vector<1x32xf32>
    tpu.vector_store %arg16[%c1_310, %c32_311], %555 {strides = array<i32>} : memref<8x64xf32, #tpu.memory_space<vmem>>, vector<1x32xf32>,
    %c4_312 = arith.constant 4 : index
    %c0_313 = arith.constant 0 : index
    %557 = vector.load %arg14[%c4_312, %c0_313] : memref<16x32xf32, #tpu.memory_space<vmem>>, vector<1x32xf32>
    %c2_314 = arith.constant 2 : index
    %c0_315 = arith.constant 0 : index
    %558 = vector.load %arg16[%c2_314, %c0_315] : memref<8x64xf32, #tpu.memory_space<vmem>>, vector<1x32xf32>
    tpu.vector_store %arg16[%c2_314, %c0_315], %557 {strides = array<i32>} : memref<8x64xf32, #tpu.memory_space<vmem>>, vector<1x32xf32>,
    %c11_316 = arith.constant 11 : index
    %c0_317 = arith.constant 0 : index
    %559 = vector.load %arg14[%c11_316, %c0_317] : memref<16x32xf32, #tpu.memory_space<vmem>>, vector<1x32xf32>
    %c2_318 = arith.constant 2 : index
    %c32_319 = arith.constant 32 : index
    %560 = vector.load %arg16[%c2_318, %c32_319] : memref<8x64xf32, #tpu.memory_space<vmem>>, vector<1x32xf32>
    tpu.vector_store %arg16[%c2_318, %c32_319], %559 {strides = array<i32>} : memref<8x64xf32, #tpu.memory_space<vmem>>, vector<1x32xf32>,
    %c6_320 = arith.constant 6 : index
    %c0_321 = arith.constant 0 : index
    %561 = vector.load %arg14[%c6_320, %c0_321] : memref<16x32xf32, #tpu.memory_space<vmem>>, vector<1x32xf32>
    %c3_322 = arith.constant 3 : index
    %c0_323 = arith.constant 0 : index
    %562 = vector.load %arg16[%c3_322, %c0_323] : memref<8x64xf32, #tpu.memory_space<vmem>>, vector<1x32xf32>
    tpu.vector_store %arg16[%c3_322, %c0_323], %561 {strides = array<i32>} : memref<8x64xf32, #tpu.memory_space<vmem>>, vector<1x32xf32>,
    %c9_324 = arith.constant 9 : index
    %c0_325 = arith.constant 0 : index
    %563 = vector.load %arg14[%c9_324, %c0_325] : memref<16x32xf32, #tpu.memory_space<vmem>>, vector<1x32xf32>
    %c3_326 = arith.constant 3 : index
    %c32_327 = arith.constant 32 : index
    %564 = vector.load %arg16[%c3_326, %c32_327] : memref<8x64xf32, #tpu.memory_space<vmem>>, vector<1x32xf32>
    tpu.vector_store %arg16[%c3_326, %c32_327], %563 {strides = array<i32>} : memref<8x64xf32, #tpu.memory_space<vmem>>, vector<1x32xf32>,
    %c8_328 = arith.constant 8 : index
    %c0_329 = arith.constant 0 : index
    %565 = vector.load %arg14[%c8_328, %c0_329] : memref<16x32xf32, #tpu.memory_space<vmem>>, vector<1x32xf32>
    %c4_330 = arith.constant 4 : index
    %c0_331 = arith.constant 0 : index
    %566 = vector.load %arg16[%c4_330, %c0_331] : memref<8x64xf32, #tpu.memory_space<vmem>>, vector<1x32xf32>
    tpu.vector_store %arg16[%c4_330, %c0_331], %565 {strides = array<i32>} : memref<8x64xf32, #tpu.memory_space<vmem>>, vector<1x32xf32>,
    %c7_332 = arith.constant 7 : index
    %c0_333 = arith.constant 0 : index
    %567 = vector.load %arg14[%c7_332, %c0_333] : memref<16x32xf32, #tpu.memory_space<vmem>>, vector<1x32xf32>
    %c4_334 = arith.constant 4 : index
    %c32_335 = arith.constant 32 : index
    %568 = vector.load %arg16[%c4_334, %c32_335] : memref<8x64xf32, #tpu.memory_space<vmem>>, vector<1x32xf32>
    tpu.vector_store %arg16[%c4_334, %c32_335], %567 {strides = array<i32>} : memref<8x64xf32, #tpu.memory_space<vmem>>, vector<1x32xf32>,
    %c10_336 = arith.constant 10 : index
    %c0_337 = arith.constant 0 : index
    %569 = vector.load %arg14[%c10_336, %c0_337] : memref<16x32xf32, #tpu.memory_space<vmem>>, vector<1x32xf32>
    %c5_338 = arith.constant 5 : index
    %c0_339 = arith.constant 0 : index
    %570 = vector.load %arg16[%c5_338, %c0_339] : memref<8x64xf32, #tpu.memory_space<vmem>>, vector<1x32xf32>
    tpu.vector_store %arg16[%c5_338, %c0_339], %569 {strides = array<i32>} : memref<8x64xf32, #tpu.memory_space<vmem>>, vector<1x32xf32>,
    %c5_340 = arith.constant 5 : index
    %c0_341 = arith.constant 0 : index
    %571 = vector.load %arg14[%c5_340, %c0_341] : memref<16x32xf32, #tpu.memory_space<vmem>>, vector<1x32xf32>
    %c5_342 = arith.constant 5 : index
    %c32_343 = arith.constant 32 : index
    %572 = vector.load %arg16[%c5_342, %c32_343] : memref<8x64xf32, #tpu.memory_space<vmem>>, vector<1x32xf32>
    tpu.vector_store %arg16[%c5_342, %c32_343], %571 {strides = array<i32>} : memref<8x64xf32, #tpu.memory_space<vmem>>, vector<1x32xf32>,
    %c12_344 = arith.constant 12 : index
    %c0_345 = arith.constant 0 : index
    %573 = vector.load %arg14[%c12_344, %c0_345] : memref<16x32xf32, #tpu.memory_space<vmem>>, vector<1x32xf32>
    %c6_346 = arith.constant 6 : index
    %c0_347 = arith.constant 0 : index
    %574 = vector.load %arg16[%c6_346, %c0_347] : memref<8x64xf32, #tpu.memory_space<vmem>>, vector<1x32xf32>
    tpu.vector_store %arg16[%c6_346, %c0_347], %573 {strides = array<i32>} : memref<8x64xf32, #tpu.memory_space<vmem>>, vector<1x32xf32>,
    %c3_348 = arith.constant 3 : index
    %c0_349 = arith.constant 0 : index
    %575 = vector.load %arg14[%c3_348, %c0_349] : memref<16x32xf32, #tpu.memory_space<vmem>>, vector<1x32xf32>
    %c6_350 = arith.constant 6 : index
    %c32_351 = arith.constant 32 : index
    %576 = vector.load %arg16[%c6_350, %c32_351] : memref<8x64xf32, #tpu.memory_space<vmem>>, vector<1x32xf32>
    tpu.vector_store %arg16[%c6_350, %c32_351], %575 {strides = array<i32>} : memref<8x64xf32, #tpu.memory_space<vmem>>, vector<1x32xf32>,
    %c14_352 = arith.constant 14 : index
    %c0_353 = arith.constant 0 : index
    %577 = vector.load %arg14[%c14_352, %c0_353] : memref<16x32xf32, #tpu.memory_space<vmem>>, vector<1x32xf32>
    %c7_354 = arith.constant 7 : index
    %c0_355 = arith.constant 0 : index
    %578 = vector.load %arg16[%c7_354, %c0_355] : memref<8x64xf32, #tpu.memory_space<vmem>>, vector<1x32xf32>
    tpu.vector_store %arg16[%c7_354, %c0_355], %577 {strides = array<i32>} : memref<8x64xf32, #tpu.memory_space<vmem>>, vector<1x32xf32>,
    %c1_356 = arith.constant 1 : index
    %c0_357 = arith.constant 0 : index
    %579 = vector.load %arg14[%c1_356, %c0_357] : memref<16x32xf32, #tpu.memory_space<vmem>>, vector<1x32xf32>
    %c7_358 = arith.constant 7 : index
    %c32_359 = arith.constant 32 : index
    %580 = vector.load %arg16[%c7_358, %c32_359] : memref<8x64xf32, #tpu.memory_space<vmem>>, vector<1x32xf32>
    tpu.vector_store %arg16[%c7_358, %c32_359], %579 {strides = array<i32>} : memref<8x64xf32, #tpu.memory_space<vmem>>, vector<1x32xf32>,
    %c0_360 = arith.constant 0 : index
    %c0_361 = arith.constant 0 : index
    %581 = vector.load %arg16[%c0_360, %c0_361] : memref<8x64xf32, #tpu.memory_space<vmem>>, vector<8x64xf32>
    %c0_362 = arith.constant 0 : index
    %c0_363 = arith.constant 0 : index
    %582 = vector.load %arg8[%c0_362, %c0_363] : memref<64x128xbf16, #tpu.memory_space<vmem>>, vector<64x128xbf16>
    %583 = arith.extf %582 : vector<64x128xbf16> to vector<64x128xf32>
    %cst_364 = arith.constant dense<0.000000e+00> : vector<8x128xf32>
    %584 = tpu.matmul %581, %583, %cst_364 {dimension_numbers = #tpu.dot_dimension_numbers<[1], [0], [0], [1], [0, 0, 1, 1], [], []>} : vector<8x64xf32>, vector<64x128xf32>, vector<8x128xf32> -> vector<8x128xf32>
    %c0_365 = arith.constant 0 : index
    %c0_366 = arith.constant 0 : index
    %585 = vector.load %arg9[%c0_365, %c0_366] : memref<1x128xf32, #tpu.memory_space<vmem>>, vector<1x128xf32>
    %586 = vector.broadcast %585 : vector<1x128xf32> to vector<8x128xf32>
    %587 = arith.addf %584, %586 : vector<8x128xf32>
    %cst_367 = arith.constant dense<0xFF800000> : vector<8xf32>
    %588 = vector.multi_reduction <maximumf>, %587, %cst_367 [1] : vector<8x128xf32> to vector<8xf32>
    %589 = vector.shape_cast %588 : vector<8xf32> to vector<8x1xf32>
    %590 = vector.broadcast %589 : vector<8x1xf32> to vector<8x128xf32>
    %591 = arith.subf %587, %590 : vector<8x128xf32>
    %592 = math.exp %591 : vector<8x128xf32>
    %cst_368 = arith.constant dense<0.000000e+00> : vector<8xf32>
    %593 = vector.multi_reduction <add>, %592, %cst_368 [1] : vector<8x128xf32> to vector<8xf32>
    %594 = vector.shape_cast %593 : vector<8xf32> to vector<8x1xf32>
    %595 = math.log %594 : vector<8x1xf32>
    %596 = vector.broadcast %595 : vector<8x1xf32> to vector<8x128xf32>
    %597 = arith.subf %591, %596 : vector<8x128xf32>
    %c0_369 = arith.constant 0 : index
    %c0_370 = arith.constant 0 : index
    %598 = vector.load %arg10[%c0_369, %c0_370] : memref<8x128xf32, #tpu.memory_space<vmem>>, vector<8x128xf32>
    tpu.vector_store %arg10[%c0_369, %c0_370], %597 {strides = array<i32>} : memref<8x128xf32, #tpu.memory_space<vmem>>, vector<8x128xf32>,
    return
  }
}

</mosaic_0001>

<bundles_post_ra>
// kernel: tpu_custom_call.1
= control target key start
LH: loop header
LB: loop body
LE: loop exit
PB: predicated region body
PF: predicated region fallthrough
CT: control target
= control target key end

     0   :  { %15 = vsyncpa [#allocation9], 0  ;;  %s3405_s0 = inlined_call_operand.vmem [shape: s32[8,1], index: 0, kind: input, shape index: {}]   ;;  %s3406_s1 = inlined_call_operand.vmem [shape: bf16[128,32], index: 1, kind: input, shape index: {}]   ;;  %s3407_s2 = inlined_call_operand.vmem [shape: bf16[32,256], index: 2, kind: input, shape index: {}]   ;;  %s3408_s3 = inlined_call_operand.hbm [shape: bf16[32,256], index: 3, kind: input, shape index: {}]   ;;  %s3409_s4 = inlined_call_operand.vmem [shape: f32[1,256], index: 4, kind: input, shape index: {}]   ;;  %s3410_s5 = inlined_call_operand.vmem [shape: bf16[64,256], index: 5, kind: input, shape index: {}]   ;;  %s3411_s6 = inlined_call_operand.hbm [shape: bf16[32,256], index: 6, kind: input, shape index: {}]   ;;  %s3412_s7 = inlined_call_operand.vmem [shape: f32[1,256], index: 7, kind: input, shape index: {}]   ;;  %s3413_s8 = inlined_call_operand.hbm [shape: bf16[64,128], index: 8, kind: input, shape index: {}]   ;;  %s3414_s9 = inlined_call_operand.vmem [shape: f32[1,128], index: 9, kind: input, shape index: {}]   ;;  %s3415_s10 = inlined_call_operand.hbm [shape: f32[8,128], index: 10, kind: output, shape index: {}]  }
   0x1   :  { %16 = vsyncpa [#allocation12], 0 }
   0x2   :  { %17 = vsyncpa [#allocation10], 0  ;;  %s2850_s13 = smov [#allocation11]   ;;  %s2851_s15 = smov [#allocation8]  }
   0x3   :  { %s45_s14 = sshll.u32 %s2850_s13, 4  ;;  %s29_s16 = sshll.u32 %s2851_s15, 4  ;;  %s46_s14 = int_to_ptr.vmem [resolvable:$true] %s45_s14  ;;  %s30_s16 = int_to_ptr.vmem [resolvable:$true] %s29_s16 }
   0x4   :  { %s2772_s17 = scalar_lea.vmem %s46_s14, 512  ;;  %p2777_p1 = scmp.lt.s32.totalorder %s46_s14, %s46_s14 }
   0x5   :  { %p2773_p0 = scmp.ne.s32.totalorder %s46_s14, %s2772_s17  ;;  %p2778_p2 = scmp.lt.s32.totalorder %s2772_s17, %s2772_s17 }
   0x7   :  { %p2779_p3 = por %p2778_p2, %p2777_p1 }
   0x9   :  { %p2780_p4 = pnand %p2779_p3, %p2773_p0 }
   0xb   :  { %2783 = shalt.err (!%p2780_p4)
}
   0xc   :  { %s2852_s18 = smov 128   ;;  %s2853_s19 = smov 8  }
   0xd   :  { %51 = dma.hbm_to_vmem [thread:$0]  %s3411_s6, 512, %s46_s14, [#allocation12], %s2852_s18, %s2852_s18, %s2853_s19  }
   0xe   :  { %s2792_s22 = scalar_lea.vmem %s30_s16, 512  ;;  %p2797_p6 = scmp.lt.s32.totalorder %s30_s16, %s30_s16 }
   0xf   :  { %p2793_p5 = scmp.ne.s32.totalorder %s30_s16, %s2792_s22  ;;  %p2798_p7 = scmp.lt.s32.totalorder %s2792_s22, %s2792_s22 }
  0x11   :  { %p2799_p8 = por %p2798_p7, %p2797_p6 }
  0x13   :  { %p2800_p9 = pnand %p2799_p8, %p2793_p5 }
  0x15   :  { %2803 = shalt.err (!%p2800_p9)
}
  0x16   :  { %35 = dma.hbm_to_vmem [thread:$0]  %s3408_s3, 512, %s30_s16, [#allocation9], %s2852_s18, %s2852_s18, %s2853_s19  }
  0x17   :  { %s2854_s25 = smov [#allocation13]  }
  0x18   :  { %s59_s26 = sshll.u32 %s2854_s25, 4  ;;  %s60_s26 = int_to_ptr.vmem [resolvable:$true] %s59_s26 }
  0x19   :  { %s2812_s27 = scalar_lea.vmem %s60_s26, 512  ;;  %p2817_p11 = scmp.lt.s32.totalorder %s60_s26, %s60_s26 }
  0x1a   :  { %p2813_p10 = scmp.ne.s32.totalorder %s60_s26, %s2812_s27  ;;  %p2818_p12 = scmp.lt.s32.totalorder %s2812_s27, %s2812_s27 }
  0x1c   :  { %p2819_p13 = por %p2818_p12, %p2817_p11 }
  0x1e   :  { %p2820_p0 = pnand %p2819_p13, %p2813_p10 }
  0x20   :  { %2823 = shalt.err (!%p2820_p0)
}
  0x21   :  { %s2855_s6 = smov 64   ;;  %s2856_s28 = smov 4  }
  0x22   :  { %65 = dma.hbm_to_vmem [thread:$0]  %s3413_s8, 512, %s60_s26, [#allocation12], %s2855_s6, %s2855_s6, %s2856_s28  }
  0x23   :  { %2844 = dma.done.wait [#allocation9], 512  }
  0x24   :  { %2845 = vsyncadd [#allocation9], 4294966784 }
  0x25   :  { %2846 = dma.done.wait [#allocation12], 1024  }
  0x26   :  { %2847 = vsyncadd [#allocation12], 4294966272  ;;  %v2857_v0 = vmov 0   ;;  %v2858_v1 = vmov 0.0   ;;  %vm2859_vm0 = vmmov 0   ;;  %v77_v2 = vld [vmem:[%s3405_s0] sm:$0xff]  ;;  %v78_v27 = vlaneseq }
  0x27   :  { %2631 = vset.pattern.permute.xlu0 %v2857_v0  ;;  %2564 = vmatprep.subr.mxu0 %v2858_v1  ;;  %v2534_v3 = vld [vmem:[%s3406_s1 + $0x38] sm:$0xff]   ;;  %v2533_v4 = vld [vmem:[%s3406_s1 + $0x30] sm:$0xff]   ;;  %v2532_v8 = vld [vmem:[%s3406_s1 + $0x28] sm:$0xff]   ;;  %v2860_v30 = vmov 1.0   ;;  %vm188_vm2 = vcmask 261120   ;;  %vm443_vm4 = vcmask 254976  }
  0x28   :  { %285 = vmatprep.mubr.f32.mxu1 %v2858_v1  ;;  %2596 = vmatprep.mubr.msk.f32.mxu0 %vm2859_vm0, %v2858_v1  ;;  %v2510_v5 = vunpack.c.l.bf16 %v2534_v3  ;;  %v2511_v6 = vunpack.c.h.bf16 %v2534_v3  ;;  %v2507_v7 = vunpack.c.h.bf16 %v2533_v4  ;;  %v2506_v9 = vunpack.c.l.bf16 %v2533_v4  ;;  %v2531_v11 = vld [vmem:[%s3406_s1 + $0x20] sm:$0xff]   ;;  %v2530_v14 = vld [vmem:[%s3406_s1 + $0x18] sm:$0xff]   ;;  %v2529_v17 = vld [vmem:[%s3406_s1 + $0x10] sm:$0xff]   ;;  %s2862_s27 = smov [#allocation14]  }
  0x29   :  { %81 = vperm.xlu0 %2631, %v77_v2   ;;  %v2503_v10 = vunpack.c.h.bf16 %v2532_v8  ;;  %v2502_v12 = vunpack.c.l.bf16 %v2532_v8  ;;  %v2499_v13 = vunpack.c.h.bf16 %v2531_v11  ;;  %v2498_v15 = vunpack.c.l.bf16 %v2531_v11  ;;  %v2528_v20 = vld [vmem:[%s3406_s1 + $0x8] sm:$0xff]   ;;  %v2481_v23 = vld [vmem:[%s3406_s1] sm:$0xff]   ;;  %v197_v31 = vld [vmem:[%s3407_s2 + $0x18] sm:$0xff]  ;;  %s2434_s28 = sshll.u32 %s2862_s27, 4  ;;  %s2435_s28 = int_to_ptr.vmem [resolvable:$true] %s2434_s28 }
  0x2a   :  { %2565 = vmatpush3.msra.mxu0 %v2511_v6  ;;  %v2495_v16 = vunpack.c.h.bf16 %v2530_v14  ;;  %v2494_v18 = vunpack.c.l.bf16 %v2530_v14  ;;  %v2491_v19 = vunpack.c.h.bf16 %v2529_v17  ;;  %v2490_v21 = vunpack.c.l.bf16 %v2529_v17  ;;  %v196_v34 = vld [vmem:[%s3407_s2 + $0x10] sm:$0xff]  ;;  %v195_v37 = vld [vmem:[%s3407_s2 + $0x8] sm:$0xff]  ;;  %v194_v38 = vld [vmem:[%s3407_s2] sm:$0xff]  ;;  %p2829_p2 = scmp.lt.s32.totalorder %s2435_s28, %s2435_s28 }
  0x2b   :  { %2566 = vmatprep.subr.mxu0 %v2858_v1  ;;  %v2487_v22 = vunpack.c.h.bf16 %v2528_v20  ;;  %v2486_v24 = vunpack.c.l.bf16 %v2528_v20  ;;  %v2483_v25 = vunpack.c.h.bf16 %v2481_v23  ;;  %v2482_v26 = vunpack.c.l.bf16 %v2481_v23  ;;  %v329_v43 = vld [vmem:[#allocation8 + $0x18] sm:$0xff]  ;;  %v328_v45 = vld [vmem:[#allocation8 + $0x10] sm:$0xff]  ;;  %v327_v48 = vld [vmem:[#allocation8 + $0x8] sm:$0xff] }
  0x2c   :  { %2567 = vmatpush3.msra.mxu0 %v2510_v5  ;;  %v79_v28 = vand.u32 127, %v78_v27  ;;  %v205_v32 = vunpack.c.h.bf16 %v197_v31  ;;  %v204_v33 = vunpack.c.l.bf16 %v197_v31  ;;  %v203_v35 = vunpack.c.h.bf16 %v196_v34  ;;  %v326_v51 = vld [vmem:[#allocation8] sm:$0xff]  ;;  %v206_v60 = vld [vmem:[%s3409_s4] sm:$0x3]  ;;  %s2861_s4 = smov 32  }
  0x2d   :  { %2568 = vmatprep.subr.mxu0 %v2858_v1  ;;  %v202_v36 = vunpack.c.l.bf16 %v196_v34  ;;  %v201_v39 = vunpack.c.h.bf16 %v195_v37  ;;  %v200_v40 = vunpack.c.l.bf16 %v195_v37  ;;  %v199_v41 = vunpack.c.h.bf16 %v194_v38 }
  0x2e   :  { %2569 = vmatpush3.msra.mxu0 %v2507_v7  ;;  %245 = vmatprep.subr.mxu1 %v205_v32  ;;  %v198_v42 = vunpack.c.l.bf16 %v194_v38  ;;  %v2989_v44 = vunpack.c.h.bf16 %v329_v43  ;;  %v2991_v46 = vunpack.c.l.bf16 %v329_v43  ;;  %v2994_v47 = vunpack.c.h.bf16 %v328_v45 }
  0x2f   :  { %2570 = vmatprep.subr.mxu0 %v2858_v1  ;;  %246 = vmatpush1.msra.mxu1 %v204_v33  ;;  %v2997_v49 = vunpack.c.l.bf16 %v328_v45  ;;  %v3000_v50 = vunpack.c.h.bf16 %v327_v48  ;;  %v3003_v52 = vunpack.c.l.bf16 %v327_v48  ;;  %v3006_v53 = vunpack.c.h.bf16 %v326_v51 }
  0x30   :  { %2571 = vmatpush3.msra.mxu0 %v2506_v9  ;;  %247 = vmatprep.subr.mxu1 %v203_v35  ;;  %v3009_v54 = vunpack.c.l.bf16 %v326_v51  ;;  %v3037_v58 = vshrl.u32 %v78_v27, 7  ;;  %vm1195_vm5 = vcmask 253952   ;;  %vm1202_vm6 = vcmask 516352  }
  0x31   :  { %2572 = vmatprep.subr.mxu0 %v2858_v1  ;;  %248 = vmatpush1.msra.mxu1 %v202_v36  ;;  %vm1297_vm7 = vcmask 523264  }
  0x32   :  { %2573 = vmatpush3.msra.mxu0 %v2503_v10  ;;  %249 = vmatprep.subr.mxu1 %v201_v39  ;;  %v210_v59 = vsub.s32 0, %v3037_v58  ;;  %v214_v61 = vsub.s32 1, %v3037_v58  ;;  %vm192_vm3 = vcmp.eq.s32.totalorder %v3037_v58, 0 }
  0x33   :  { %2574 = vmatprep.subr.mxu0 %v2858_v1  ;;  %250 = vmatpush1.msra.mxu1 %v200_v40 }
  0x34   :  { %2575 = vmatpush3.msra.mxu0 %v2502_v12  ;;  %251 = vmatprep.subr.mxu1 %v199_v41  ;;  %v211_v62 = vrot.slane %v206_v60, %v210_v59  ;;  %v215_v63 = vrot.slane %v206_v60, %v214_v61 }
  0x35   :  { %2576 = vmatprep.subr.mxu0 %v2858_v1  ;;  %252 = vmatpush1.msra.mxu1 %v198_v42 }
  0x36   :  { %2577 = vmatpush3.msra.mxu0 %v2499_v13  ;;  %365 = vmatprep.subr.mxu1 %v2989_v44 }
  0x37   :  { %2578 = vmatprep.subr.mxu0 %v2858_v1 }
  0x38   :  { %2579 = vmatpush3.msra.mxu0 %v2498_v15 }
  0x39   :  { %2580 = vmatprep.subr.mxu0 %v2858_v1 }
  0x3a   :  { %2581 = vmatpush3.msra.mxu0 %v2495_v16 }
  0x3b   :  { %2582 = vmatprep.subr.mxu0 %v2858_v1 }
  0x3c   :  { %2583 = vmatpush3.msra.mxu0 %v2494_v18 }
  0x3d   :  { %2584 = vmatprep.subr.mxu0 %v2858_v1 }
  0x3e   :  { %2585 = vmatpush3.msra.mxu0 %v2491_v19 }
  0x3f   :  { %2586 = vmatprep.subr.mxu0 %v2858_v1 }
  0x40   :  { %2587 = vmatpush3.msra.mxu0 %v2490_v21 }
  0x41   :  { %2588 = vmatprep.subr.mxu0 %v2858_v1 }
  0x42   :  { %2589 = vmatpush3.msra.mxu0 %v2487_v22 }
  0x43   :  { %2590 = vmatprep.subr.mxu0 %v2858_v1 }
  0x44   :  { %2591 = vmatpush3.msra.mxu0 %v2486_v24 }
  0x45   :  { %2592 = vmatprep.subr.mxu0 %v2858_v1 }
  0x46   :  { %2593 = vmatpush3.msra.mxu0 %v2483_v25 }
  0x47   :  { %2594 = vmatprep.subr.mxu0 %v2858_v1 }
  0x48   :  { %2595 = vmatpush3.msra.mxu0 %v2482_v26 }
  0x49   :  { %685 = vmatprep.subr.mxu0 %v2989_v44 }
  0xa4   :  { %v82_v29 = vpop.permute.xlu0 %81 }
  0xa5   :  { %vm83_vm1 = vcmp.eq.s32.totalorder %v79_v28, %v82_v29 }
  0xa6   :  { %2597 = vmatmul.mubr.msk.f32.vlgmr.msra.gmra.mxu0 %vm83_vm1, %v2860_v30 }
  0xa7   :  { %725 = vmatprep.mubr.f32.mxu0 %v2858_v1  ;;  %686 = vmatpush1.msra.mxu0 %v2991_v46 }
  0xa8   :  { %687 = vmatprep.subr.mxu0 %v2994_v47 }
  0xa9   :  { %688 = vmatpush1.msra.mxu0 %v2997_v49 }
  0xaa   :  { %689 = vmatprep.subr.mxu0 %v3000_v50 }
  0xab   :  { %690 = vmatpush1.msra.mxu0 %v3003_v52 }
  0xac   :  { %691 = vmatprep.subr.mxu0 %v3006_v53 }
  0xad   :  { %692 = vmatpush1.msra.mxu0 %v3009_v54 }
  0xae   :  { %899 = vmatprep.subr.mxu0 %v2989_v44 }
 0x166   :  { %v184_v55 = vpop.f32.mrf.mxu0 }
 0x167   :  { %189 = vst.msk [vmem:[#allocation2] sm:$0xff] %vm188_vm2, %v184_v55 }
 0x168   :  { %v2598_v56 = vpop.f32.mrf.mxu0 }
 0x16e   :  { %v193_v57 = vld [vmem:[#allocation2] sm:$0xff] }
 0x16f   :  { %2446 = vmatmul.mubr.msk.f32.vlgmr.msra.gmra.mxu1 %vm188_vm2, %v193_v57 }
 0x170   :  { %366 = vmatpush1.msra.mxu1 %v2991_v46  ;;  %405 = vmatprep.mubr.f32.mxu1 %v2858_v1 }
 0x171   :  { %367 = vmatprep.subr.mxu1 %v2994_v47 }
 0x172   :  { %368 = vmatpush1.msra.mxu1 %v2997_v49 }
 0x173   :  { %369 = vmatprep.subr.mxu1 %v3000_v50 }
 0x174   :  { %370 = vmatpush1.msra.mxu1 %v3003_v52 }
 0x175   :  { %371 = vmatprep.subr.mxu1 %v3006_v53 }
 0x176   :  { %372 = vmatpush1.msra.mxu1 %v3009_v54 }
 0x177   :  { %406 = vmatmul.mubr.f32.vlgmr.msra.gmra.mxu1 %v2858_v1  ;;  %471 = vmatprep.subr.mxu1 %v2989_v44 }
 0x178   :  { %472 = vmatpush1.msra.mxu1 %v2991_v46  ;;  %511 = vmatprep.mubr.f32.mxu1 %v2858_v1 }
 0x179   :  { %473 = vmatprep.subr.mxu1 %v2994_v47 }
 0x17a   :  { %474 = vmatpush1.msra.mxu1 %v2997_v49 }
 0x17b   :  { %475 = vmatprep.subr.mxu1 %v3000_v50 }
 0x17c   :  { %476 = vmatpush1.msra.mxu1 %v3003_v52 }
 0x17d   :  { %477 = vmatprep.subr.mxu1 %v3006_v53 }
 0x17e   :  { %478 = vmatpush1.msra.mxu1 %v3009_v54 }
 0x17f   :  { %578 = vmatprep.subr.mxu1 %v2989_v44 }
 0x22f   :  { %v287_v0 = vpop.f32.mrf.mxu1 }
 0x230   :  { %v288_v2 = vadd.f32 %v287_v0, %v211_v62 }
 0x231   :  { %v289_v3 = vpop.f32.mrf.mxu1 }
 0x232   :  { %292 = vst [vmem:[#allocation3] sm:$0xff] %v288_v2  ;;  %v290_v4 = vadd.f32 %v289_v3, %v215_v63 }
 0x234   :  { %293 = vst [vmem:[#allocation3 + $0x8] sm:$0xff] %v290_v4 }
 0x237   :  { %v407_v17 = vpop.f32.mrf.mxu1 }
 0x239   :  { %v294_v5 = vld [vmem:[#allocation3] ss:$0 sm:$0xff]  ;;  %v298_v6 = vld [vmem:[#allocation3 + $0x1] ss:$0 sm:$0xff]  ;;  %v302_v7 = vld [vmem:[#allocation3 + $0x2] ss:$0 sm:$0xff]  ;;  %v409_v22 = vpop.f32.mrf.mxu1 }
 0x23a   :  { %295 = vst [vmem:[#allocation4] sm:$0x1] %v294_v5  ;;  %299 = vst [vmem:[#allocation4 + $0x2] sm:$0x1] %v298_v6  ;;  %v306_v8 = vld [vmem:[#allocation3 + $0x3] ss:$0 sm:$0xff]  ;;  %v412_v23 = vsel %vm192_vm3, %v407_v17, %v409_v22 }
 0x23b   :  { %303 = vst [vmem:[#allocation4 + $0x4] sm:$0x1] %v302_v7  ;;  %v310_v9 = vld [vmem:[#allocation3 + $0x4] ss:$0 sm:$0xff]  ;;  %v314_v10 = vld [vmem:[#allocation3 + $0x5] ss:$0 sm:$0xff] }
 0x23c   :  { %307 = vst [vmem:[#allocation4 + $0x6] sm:$0x1] %v306_v8  ;;  %311 = vst [vmem:[#allocation4 + $0x8] sm:$0x1] %v310_v9  ;;  %v318_v11 = vld [vmem:[#allocation3 + $0x6] ss:$0 sm:$0xff] }
 0x23d   :  { %315 = vst [vmem:[#allocation4 + $0xa] sm:$0x1] %v314_v10  ;;  %v322_v12 = vld [vmem:[#allocation3 + $0x7] ss:$0 sm:$0xff]  ;;  %v296_v13 = vld [vmem:[#allocation3 + $0xf] ss:$0 sm:$0xff] }
 0x23e   :  { %319 = vst [vmem:[#allocation4 + $0xc] sm:$0x1] %v318_v11  ;;  %323 = vst [vmem:[#allocation4 + $0xe] sm:$0x1] %v322_v12  ;;  %v300_v14 = vld [vmem:[#allocation3 + $0xe] ss:$0 sm:$0xff] }
 0x23f   :  { %297 = vst [vmem:[#allocation4 + $0x1] sm:$0x1] %v296_v13  ;;  %v304_v15 = vld [vmem:[#allocation3 + $0xd] ss:$0 sm:$0xff]  ;;  %v308_v16 = vld [vmem:[#allocation3 + $0xc] ss:$0 sm:$0xff] }
 0x240   :  { %301 = vst [vmem:[#allocation4 + $0x3] sm:$0x1] %v300_v14  ;;  %305 = vst [vmem:[#allocation4 + $0x5] sm:$0x1] %v304_v15  ;;  %v312_v18 = vld [vmem:[#allocation3 + $0xb] ss:$0 sm:$0xff] }
 0x241   :  { %309 = vst [vmem:[#allocation4 + $0x7] sm:$0x1] %v308_v16  ;;  %v316_v19 = vld [vmem:[#allocation3 + $0xa] ss:$0 sm:$0xff]  ;;  %v320_v20 = vld [vmem:[#allocation3 + $0x9] ss:$0 sm:$0xff] }
 0x242   :  { %313 = vst [vmem:[#allocation4 + $0x9] sm:$0x1] %v312_v18  ;;  %317 = vst [vmem:[#allocation4 + $0xb] sm:$0x1] %v316_v19  ;;  %v324_v21 = vld [vmem:[#allocation3 + $0x8] ss:$0 sm:$0xff] }
 0x243   :  { %321 = vst [vmem:[#allocation4 + $0xd] sm:$0x1] %v320_v20  ;;  %325 = vst [vmem:[#allocation4 + $0xf] sm:$0x1] %v324_v21 }
 0x246   :  { %v413_v24 = vld [vmem:[#allocation4] sm:$0x3] }
 0x247   :  { %v414_v25 = vadd.f32 %v413_v24, %v412_v23  ;;  %v520_v45 = vld [vmem:[#allocation4 + $0x2] sm:$0x3]  ;;  %v627_v12 = vld [vmem:[#allocation4 + $0x4] sm:$0x3] }
 0x249   :  { %2632 = vtanh.f32 %v414_v25  ;;  %v2447_v27 = vmul.f32 -1.442695, %v414_v25 }
 0x24b   :  { %2634 = vpow2.f32 %v2447_v27 }
 0x256   :  { %v2633_v26 = vpop.eup %2632 }
 0x257   :  { %424 = vrot.lane.b32.xlu0 %v2633_v26, %s2855_s6 }
 0x258   :  { %v2635_v28 = vpop.eup %2634 }
 0x259   :  { %v418_v29 = vadd.f32 1.0, %v2635_v28 }
 0x25b   :  { %2636 = vrcp.f32 %v418_v29 }
 0x268   :  { %v2637_v30 = vpop.eup %2636 }
 0x269   :  { %v422_v33 = vmul.f32 0.0, %v2637_v30 }
 0x2c9   :  { %v425_v31 = vpop.permute.xlu0 %424 }
 0x2ca   :  { %v427_v32 = vmul.f32 %v2637_v30, %v425_v31 }
 0x2cc   :  { %429 = vrot.lane.b32.xlu1 %v427_v32, %s2861_s4  ;;  %v734_v32 = vld [vmem:[#allocation4 + $0x6] sm:$0x3] }
 0x33e   :  { %v430_v34 = vpop.permute.xlu1 %429 }
 0x33f   :  { %v432_v35 = vadd.f32 %v430_v34, %v422_v33 }
 0x341   :  { %2638 = vtanh.f32 %v432_v35 }
 0x34e   :  { %v2639_v36 = vpop.eup %2638 }
 0x34f   :  { %435 = vrot.lane.b32.xlu1 %v2639_v36, %s2855_s6 }
 0x3c1   :  { %v436_v37 = vpop.permute.xlu1 %435 }
 0x3c2   :  { %v438_v38 = vmul.f32 %v2637_v30, %v436_v37 }
 0x3c4   :  { %440 = vrot.lane.b32.xlu0 %v438_v38, %s2861_s4 }
 0x436   :  { %v441_v39 = vpop.permute.xlu0 %440 }
 0x437   :  { %444 = vst.msk [vmem:[#allocation5] sm:$0x3] %vm443_vm4, %v441_v39  ;;  %2448 = vmatmul.mubr.msk.f32.vlgmr.msra.gmra.mxu1 %vm188_vm2, %v441_v39 }
 0x438   :  { %579 = vmatpush1.msra.mxu1 %v2991_v46  ;;  %618 = vmatprep.mubr.f32.mxu1 %v2858_v1 }
 0x439   :  { %580 = vmatprep.subr.mxu1 %v2994_v47 }
 0x43a   :  { %581 = vmatpush1.msra.mxu1 %v2997_v49 }
 0x43b   :  { %582 = vmatprep.subr.mxu1 %v3000_v50 }
 0x43c   :  { %583 = vmatpush1.msra.mxu1 %v3003_v52 }
 0x43d   :  { %584 = vmatprep.subr.mxu1 %v3006_v53 }
 0x43e   :  { %585 = vmatpush1.msra.mxu1 %v3009_v54  ;;  %v1194_v40 = vld [vmem:[#allocation5] sm:$0x1] }
 0x43f   :  { %792 = vmatprep.subr.mxu1 %v2989_v44  ;;  %1196 = vst.msk [vmem:[#allocation6] sm:$0x1] %vm1195_vm5, %v1194_v40 }
 0x4f7   :  { %v513_v41 = vpop.f32.mrf.mxu1 }
 0x4f9   :  { %v515_v42 = vpop.f32.mrf.mxu1 }
 0x4fa   :  { %v518_v43 = vsel %vm192_vm3, %v513_v41, %v515_v42 }
 0x4fb   :  { %v521_v48 = vadd.f32 %v520_v45, %v518_v43 }
 0x4fd   :  { %2640 = vtanh.f32 %v521_v48  ;;  %v2449_v55 = vmul.f32 -1.442695, %v521_v48 }
 0x4ff   :  { %2642 = vpow2.f32 %v2449_v55 }
 0x50a   :  { %v2641_v51 = vpop.eup %2640 }
 0x50b   :  { %531 = vrot.lane.b32.xlu1 %v2641_v51, %s2855_s6 }
 0x50c   :  { %v2643_v56 = vpop.eup %2642 }
 0x50d   :  { %v525_v57 = vadd.f32 1.0, %v2643_v56 }
 0x50f   :  { %2644 = vrcp.f32 %v525_v57 }
 0x51c   :  { %v2645_v60 = vpop.eup %2644 }
 0x51d   :  { %v529_v0 = vmul.f32 %v2645_v60, %v432_v35 }
 0x57d   :  { %v532_v62 = vpop.permute.xlu1 %531 }
 0x57e   :  { %v534_v63 = vmul.f32 %v2645_v60, %v532_v62  ;;  %v841_v62 = vld [vmem:[#allocation4 + $0x8] sm:$0x3] }
 0x580   :  { %536 = vrot.lane.b32.xlu0 %v534_v63, %s2861_s4 }
 0x5f2   :  { %v537_v2 = vpop.permute.xlu0 %536 }
 0x5f3   :  { %v539_v3 = vadd.f32 %v537_v2, %v529_v0 }
 0x5f5   :  { %2646 = vtanh.f32 %v539_v3 }
 0x602   :  { %v2647_v4 = vpop.eup %2646 }
 0x603   :  { %542 = vrot.lane.b32.xlu1 %v2647_v4, %s2855_s6 }
 0x675   :  { %v543_v5 = vpop.permute.xlu1 %542 }
 0x676   :  { %v545_v6 = vmul.f32 %v2645_v60, %v543_v5 }
 0x678   :  { %547 = vrot.lane.b32.xlu0 %v545_v6, %s2861_s4 }
 0x6ea   :  { %v548_v7 = vpop.permute.xlu0 %547 }
 0x6eb   :  { %551 = vst.msk [vmem:[#allocation5 + $0x2] sm:$0x3] %vm443_vm4, %v548_v7  ;;  %2450 = vmatmul.mubr.msk.f32.vlgmr.msra.gmra.mxu1 %vm188_vm2, %v548_v7 }
 0x6ec   :  { %793 = vmatpush1.msra.mxu1 %v2991_v46  ;;  %832 = vmatprep.mubr.f32.mxu1 %v2858_v1 }
 0x6ed   :  { %794 = vmatprep.subr.mxu1 %v2994_v47 }
 0x6ee   :  { %795 = vmatpush1.msra.mxu1 %v2997_v49 }
 0x6ef   :  { %796 = vmatprep.subr.mxu1 %v3000_v50 }
 0x6f0   :  { %797 = vmatpush1.msra.mxu1 %v3003_v52 }
 0x6f1   :  { %798 = vmatprep.subr.mxu1 %v3006_v53 }
 0x6f2   :  { %799 = vmatpush1.msra.mxu1 %v3009_v54  ;;  %v1204_v8 = vld [vmem:[#allocation5 + $0x2] sm:$0x1] }
 0x6f3   :  { %1006 = vmatprep.subr.mxu1 %v2989_v44  ;;  %1205 = vst.msk [vmem:[#allocation6 + $0x1] sm:$0x1] %vm1195_vm5, %v1204_v8 }
 0x7ab   :  { %v620_v9 = vpop.f32.mrf.mxu1 }
 0x7ad   :  { %v622_v10 = vpop.f32.mrf.mxu1 }
 0x7ae   :  { %v625_v11 = vsel %vm192_vm3, %v620_v9, %v622_v10 }
 0x7af   :  { %v628_v13 = vadd.f32 %v627_v12, %v625_v11 }
 0x7b1   :  { %2648 = vtanh.f32 %v628_v13  ;;  %v2451_v15 = vmul.f32 -1.442695, %v628_v13 }
 0x7b3   :  { %2650 = vpow2.f32 %v2451_v15 }
 0x7be   :  { %v2649_v14 = vpop.eup %2648 }
 0x7bf   :  { %638 = vrot.lane.b32.xlu1 %v2649_v14, %s2855_s6 }
 0x7c0   :  { %v2651_v16 = vpop.eup %2650 }
 0x7c1   :  { %v632_v17 = vadd.f32 1.0, %v2651_v16 }
 0x7c3   :  { %2652 = vrcp.f32 %v632_v17 }
 0x7d0   :  { %v2653_v18 = vpop.eup %2652 }
 0x7d1   :  { %v636_v21 = vmul.f32 %v2653_v18, %v539_v3 }
 0x831   :  { %v639_v19 = vpop.permute.xlu1 %638 }
 0x832   :  { %v641_v20 = vmul.f32 %v2653_v18, %v639_v19 }
 0x834   :  { %643 = vrot.lane.b32.xlu0 %v641_v20, %s2861_s4 }
 0x8a6   :  { %v644_v22 = vpop.permute.xlu0 %643 }
 0x8a7   :  { %v646_v23 = vadd.f32 %v644_v22, %v636_v21 }
 0x8a9   :  { %2654 = vtanh.f32 %v646_v23 }
 0x8b6   :  { %v2655_v24 = vpop.eup %2654 }
 0x8b7   :  { %649 = vrot.lane.b32.xlu1 %v2655_v24, %s2855_s6 }
 0x929   :  { %v650_v25 = vpop.permute.xlu1 %649 }
 0x92a   :  { %v652_v26 = vmul.f32 %v2653_v18, %v650_v25  ;;  %v948_v18 = vld [vmem:[#allocation4 + $0xa] sm:$0x3] }
 0x92c   :  { %654 = vrot.lane.b32.xlu0 %v652_v26, %s2861_s4 }
 0x99e   :  { %v655_v27 = vpop.permute.xlu0 %654 }
 0x99f   :  { %658 = vst.msk [vmem:[#allocation5 + $0x4] sm:$0x3] %vm443_vm4, %v655_v27  ;;  %2452 = vmatmul.mubr.msk.f32.vlgmr.msra.gmra.mxu0 %vm188_vm2, %v655_v27 }
 0x9a0   :  { %900 = vmatpush1.msra.mxu0 %v2991_v46  ;;  %939 = vmatprep.mubr.f32.mxu0 %v2858_v1 }
 0x9a1   :  { %901 = vmatprep.subr.mxu0 %v2994_v47 }
 0x9a2   :  { %902 = vmatpush1.msra.mxu0 %v2997_v49 }
 0x9a3   :  { %903 = vmatprep.subr.mxu0 %v3000_v50 }
 0x9a4   :  { %904 = vmatpush1.msra.mxu0 %v3003_v52 }
 0x9a5   :  { %905 = vmatprep.subr.mxu0 %v3006_v53 }
 0x9a6   :  { %906 = vmatpush1.msra.mxu0 %v3009_v54  ;;  %v1212_v28 = vld [vmem:[#allocation5 + $0x4] sm:$0x1] }
 0x9a7   :  { %1113 = vmatprep.subr.mxu0 %v2989_v44  ;;  %1213 = vst.msk [vmem:[#allocation6 + $0x2] sm:$0x1] %vm1195_vm5, %v1212_v28 }
 0xa5f   :  { %v727_v29 = vpop.f32.mrf.mxu0 }
 0xa61   :  { %v729_v30 = vpop.f32.mrf.mxu0 }
 0xa62   :  { %v732_v31 = vsel %vm192_vm3, %v727_v29, %v729_v30 }
 0xa63   :  { %v735_v33 = vadd.f32 %v734_v32, %v732_v31  ;;  %v1055_v32 = vld [vmem:[#allocation4 + $0xc] sm:$0x3] }
 0xa65   :  { %2656 = vtanh.f32 %v735_v33  ;;  %v2453_v35 = vmul.f32 -1.442695, %v735_v33 }
 0xa67   :  { %2658 = vpow2.f32 %v2453_v35 }
 0xa72   :  { %v2657_v34 = vpop.eup %2656 }
 0xa73   :  { %745 = vrot.lane.b32.xlu1 %v2657_v34, %s2855_s6 }
 0xa74   :  { %v2659_v36 = vpop.eup %2658 }
 0xa75   :  { %v739_v37 = vadd.f32 1.0, %v2659_v36 }
 0xa77   :  { %2660 = vrcp.f32 %v739_v37 }
 0xa84   :  { %v2661_v38 = vpop.eup %2660 }
 0xa85   :  { %v743_v40 = vmul.f32 %v2661_v38, %v646_v23 }
 0xae5   :  { %v746_v44 = vpop.permute.xlu1 %745 }
 0xae6   :  { %v748_v39 = vmul.f32 %v2661_v38, %v746_v44 }
 0xae8   :  { %750 = vrot.lane.b32.xlu0 %v748_v39, %s2861_s4 }
 0xb5a   :  { %v751_v41 = vpop.permute.xlu0 %750 }
 0xb5b   :  { %v753_v42 = vadd.f32 %v751_v41, %v743_v40 }
 0xb5d   :  { %2662 = vtanh.f32 %v753_v42 }
 0xb6a   :  { %v2663_v43 = vpop.eup %2662 }
 0xb6b   :  { %756 = vrot.lane.b32.xlu1 %v2663_v43, %s2855_s6 }
 0xbdd   :  { %v757_v45 = vpop.permute.xlu1 %756 }
 0xbde   :  { %v759_v48 = vmul.f32 %v2661_v38, %v757_v45 }
 0xbe0   :  { %761 = vrot.lane.b32.xlu0 %v759_v48, %s2861_s4 }
 0xc52   :  { %v762_v51 = vpop.permute.xlu0 %761 }
 0xc53   :  { %765 = vst.msk [vmem:[#allocation5 + $0x6] sm:$0x3] %vm443_vm4, %v762_v51  ;;  %2454 = vmatmul.mubr.msk.f32.vlgmr.msra.gmra.mxu1 %vm188_vm2, %v762_v51 }
 0xc54   :  { %1007 = vmatpush1.msra.mxu1 %v2991_v46  ;;  %1046 = vmatprep.mubr.f32.mxu1 %v2858_v1 }
 0xc55   :  { %1008 = vmatprep.subr.mxu1 %v2994_v47 }
 0xc56   :  { %1009 = vmatpush1.msra.mxu1 %v2997_v49 }
 0xc57   :  { %1010 = vmatprep.subr.mxu1 %v3000_v50 }
 0xc58   :  { %1011 = vmatpush1.msra.mxu1 %v3003_v52 }
 0xc59   :  { %1012 = vmatprep.subr.mxu1 %v3006_v53 }
 0xc5a   :  { %1013 = vmatpush1.msra.mxu1 %v3009_v54  ;;  %v1220_v55 = vld [vmem:[#allocation5 + $0x6] sm:$0x1] }
 0xc5b   :  { %1221 = vst.msk [vmem:[#allocation6 + $0x3] sm:$0x1] %vm1195_vm5, %v1220_v55 }
 0xd13   :  { %v834_v56 = vpop.f32.mrf.mxu1 }
 0xd15   :  { %v836_v57 = vpop.f32.mrf.mxu1 }
 0xd16   :  { %v839_v60 = vsel %vm192_vm3, %v834_v56, %v836_v57 }
 0xd17   :  { %v842_v63 = vadd.f32 %v841_v62, %v839_v60  ;;  %v1162_v62 = vld [vmem:[#allocation4 + $0xe] sm:$0x3] }
 0xd19   :  { %2664 = vtanh.f32 %v842_v63  ;;  %v2455_v2 = vmul.f32 -1.442695, %v842_v63 }
 0xd1b   :  { %2666 = vpow2.f32 %v2455_v2 }
 0xd26   :  { %v2665_v0 = vpop.eup %2664 }
 0xd27   :  { %852 = vrot.lane.b32.xlu1 %v2665_v0, %s2855_s6 }
 0xd28   :  { %v2667_v3 = vpop.eup %2666 }
 0xd29   :  { %v846_v4 = vadd.f32 1.0, %v2667_v3 }
 0xd2b   :  { %2668 = vrcp.f32 %v846_v4 }
 0xd38   :  { %v2669_v5 = vpop.eup %2668 }
 0xd39   :  { %v850_v8 = vmul.f32 %v2669_v5, %v753_v42 }
 0xd99   :  { %v853_v6 = vpop.permute.xlu1 %852 }
 0xd9a   :  { %v855_v7 = vmul.f32 %v2669_v5, %v853_v6 }
 0xd9c   :  { %857 = vrot.lane.b32.xlu0 %v855_v7, %s2861_s4 }
 0xe0e   :  { %v858_v9 = vpop.permute.xlu0 %857 }
 0xe0f   :  { %v860_v10 = vadd.f32 %v858_v9, %v850_v8 }
 0xe11   :  { %2670 = vtanh.f32 %v860_v10 }
 0xe1e   :  { %v2671_v11 = vpop.eup %2670 }
 0xe1f   :  { %863 = vrot.lane.b32.xlu1 %v2671_v11, %s2855_s6 }
 0xe91   :  { %v864_v12 = vpop.permute.xlu1 %863 }
 0xe92   :  { %v866_v13 = vmul.f32 %v2669_v5, %v864_v12 }
 0xe94   :  { %868 = vrot.lane.b32.xlu0 %v866_v13, %s2861_s4  ;;  %v1230_v13 = vld [vmem:[#allocation5 + $0x7] sm:$0x1] }
 0xf06   :  { %v869_v14 = vpop.permute.xlu0 %868 }
 0xf07   :  { %872 = vst.msk [vmem:[#allocation5 + $0x8] sm:$0x3] %vm443_vm4, %v869_v14  ;;  %2456 = vmatmul.mubr.msk.f32.vlgmr.msra.gmra.mxu0 %vm188_vm2, %v869_v14 }
 0xf08   :  { %1114 = vmatpush1.msra.mxu0 %v2991_v46  ;;  %1153 = vmatprep.mubr.f32.mxu0 %v2858_v1 }
 0xf09   :  { %1115 = vmatprep.subr.mxu0 %v2994_v47 }
 0xf0a   :  { %1116 = vmatpush1.msra.mxu0 %v2997_v49 }
 0xf0b   :  { %1117 = vmatprep.subr.mxu0 %v3000_v50 }
 0xf0c   :  { %1118 = vmatpush1.msra.mxu0 %v3003_v52 }
 0xf0d   :  { %1119 = vmatprep.subr.mxu0 %v3006_v53 }
 0xf0e   :  { %1120 = vmatpush1.msra.mxu0 %v3009_v54  ;;  %v1228_v15 = vld [vmem:[#allocation5 + $0x8] sm:$0x1] }
 0xf0f   :  { %1229 = vst.msk [vmem:[#allocation6 + $0x4] sm:$0x1] %vm1195_vm5, %v1228_v15 }
 0xfc7   :  { %v941_v16 = vpop.f32.mrf.mxu0 }
 0xfc9   :  { %v943_v17 = vpop.f32.mrf.mxu0 }
 0xfca   :  { %v946_v46 = vsel %vm192_vm3, %v941_v16, %v943_v17 }
 0xfcb   :  { %v949_v47 = vadd.f32 %v948_v18, %v946_v46  ;;  %v1268_v46 = vld [vmem:[%s3410_s5 + $0x38] sm:$0xff]  ;;  %v1267_v18 = vld [vmem:[%s3410_s5 + $0x30] sm:$0xff] }
 0xfcd   :  { %2672 = vtanh.f32 %v949_v47  ;;  %v2457_v50 = vmul.f32 -1.442695, %v949_v47  ;;  %v1283_v47 = vunpack.c.l.bf16 %v1268_v46 }
 0xfcf   :  { %2674 = vpow2.f32 %v2457_v50  ;;  %v1282_v50 = vunpack.c.h.bf16 %v1267_v18 }
 0xfda   :  { %v2673_v49 = vpop.eup %2672 }
 0xfdb   :  { %959 = vrot.lane.b32.xlu1 %v2673_v49, %s2855_s6  ;;  %v1284_v49 = vunpack.c.h.bf16 %v1268_v46 }
 0xfdc   :  { %v2675_v52 = vpop.eup %2674 }
 0xfdd   :  { %v953_v53 = vadd.f32 1.0, %v2675_v52  ;;  %1317 = vmatprep.subr.mxu1 %v1284_v49 }
 0xfdf   :  { %2676 = vrcp.f32 %v953_v53  ;;  %v1281_v53 = vunpack.c.l.bf16 %v1267_v18 }
 0xfec   :  { %v2677_v54 = vpop.eup %2676 }
 0xfed   :  { %v957_v21 = vmul.f32 %v2677_v54, %v860_v10 }
0x104d   :  { %v960_v19 = vpop.permute.xlu1 %959 }
0x104e   :  { %v962_v20 = vmul.f32 %v2677_v54, %v960_v19  ;;  %v1238_v19 = vld [vmem:[#allocation5 + $0x5] sm:$0x1] }
0x1050   :  { %964 = vrot.lane.b32.xlu0 %v962_v20, %s2861_s4  ;;  %v1254_v20 = vld [vmem:[#allocation5 + $0x1] sm:$0x1] }
0x10c2   :  { %v965_v22 = vpop.permute.xlu0 %964 }
0x10c3   :  { %v967_v23 = vadd.f32 %v965_v22, %v957_v21  ;;  %v1266_v21 = vld [vmem:[%s3410_s5 + $0x28] sm:$0xff]  ;;  %v1265_v22 = vld [vmem:[%s3410_s5 + $0x20] sm:$0xff] }
0x10c5   :  { %2678 = vtanh.f32 %v967_v23 }
0x10d2   :  { %v2679_v24 = vpop.eup %2678 }
0x10d3   :  { %970 = vrot.lane.b32.xlu1 %v2679_v24, %s2855_s6  ;;  %v1280_v24 = vunpack.c.h.bf16 %v1266_v21 }
0x1145   :  { %v971_v25 = vpop.permute.xlu1 %970 }
0x1146   :  { %v973_v26 = vmul.f32 %v2677_v54, %v971_v25  ;;  %v1222_v54 = vld [vmem:[#allocation5 + $0x9] sm:$0x1]  ;;  %v1278_v25 = vunpack.c.h.bf16 %v1265_v22 }
0x1148   :  { %975 = vrot.lane.b32.xlu0 %v973_v26, %s2861_s4  ;;  %v1277_v26 = vunpack.c.l.bf16 %v1265_v22 }
0x11ba   :  { %v976_v27 = vpop.permute.xlu0 %975 }
0x11bb   :  { %979 = vst.msk [vmem:[#allocation5 + $0xa] sm:$0x3] %vm443_vm4, %v976_v27  ;;  %2458 = vmatmul.mubr.msk.f32.vlgmr.msra.gmra.mxu1 %vm188_vm2, %v976_v27 }
0x11bc   :  { %1365 = vmatprep.mubr.f32.mxu1 %v2858_v1  ;;  %1318 = vmatpush1.msra.mxu1 %v1283_v47 }
0x11bd   :  { %1319 = vmatprep.subr.mxu1 %v1282_v50 }
0x11be   :  { %1320 = vmatpush1.msra.mxu1 %v1281_v53 }
0x11bf   :  { %1321 = vmatprep.subr.mxu1 %v1280_v24 }
0x11c2   :  { %v1236_v28 = vld [vmem:[#allocation5 + $0xa] sm:$0x1]  ;;  %v1214_v12 = vld [vmem:[#allocation5 + $0xb] sm:$0x1] }
0x11c3   :  { %1237 = vst.msk [vmem:[#allocation6 + $0x5] sm:$0x1] %vm1195_vm5, %v1236_v28  ;;  %v1264_v28 = vld [vmem:[%s3410_s5 + $0x18] sm:$0xff] }
0x127b   :  { %v1048_v29 = vpop.f32.mrf.mxu1 }
0x127d   :  { %v1050_v30 = vpop.f32.mrf.mxu1 }
0x127e   :  { %v1053_v31 = vsel %vm192_vm3, %v1048_v29, %v1050_v30  ;;  %v1263_v29 = vld [vmem:[%s3410_s5 + $0x10] sm:$0xff]  ;;  %v1262_v30 = vld [vmem:[%s3410_s5 + $0x8] sm:$0xff] }
0x127f   :  { %v1056_v33 = vadd.f32 %v1055_v32, %v1053_v31  ;;  %v1275_v31 = vunpack.c.l.bf16 %v1264_v28  ;;  %v1276_v32 = vunpack.c.h.bf16 %v1264_v28 }
0x1281   :  { %2680 = vtanh.f32 %v1056_v33  ;;  %v2459_v35 = vmul.f32 -1.442695, %v1056_v33  ;;  %v1274_v33 = vunpack.c.h.bf16 %v1263_v29 }
0x1283   :  { %2682 = vpow2.f32 %v2459_v35  ;;  %v1261_v35 = vld [vmem:[%s3410_s5] sm:$0xff] }
0x128e   :  { %v2681_v34 = vpop.eup %2680 }
0x128f   :  { %1066 = vrot.lane.b32.xlu1 %v2681_v34, %s2855_s6  ;;  %v1273_v34 = vunpack.c.l.bf16 %v1263_v29 }
0x1290   :  { %v2683_v36 = vpop.eup %2682 }
0x1291   :  { %v1060_v37 = vadd.f32 1.0, %v2683_v36  ;;  %v1272_v36 = vunpack.c.h.bf16 %v1262_v30 }
0x1293   :  { %2684 = vrcp.f32 %v1060_v37 }
0x12a0   :  { %v2685_v38 = vpop.eup %2684 }
0x12a1   :  { %v1064_v40 = vmul.f32 %v2685_v38, %v967_v23  ;;  %v1279_v23 = vunpack.c.l.bf16 %v1266_v21 }
0x12a3   :  { %1322 = vmatpush1.msra.mxu1 %v1279_v23 }
0x12a4   :  { %1323 = vmatprep.subr.mxu1 %v1278_v25 }
0x12a5   :  { %1324 = vmatpush1.msra.mxu1 %v1277_v26 }
0x12a6   :  { %1325 = vmatprep.subr.mxu1 %v1276_v32 }
0x12a7   :  { %1326 = vmatpush1.msra.mxu1 %v1275_v31 }
0x12a8   :  { %1327 = vmatprep.subr.mxu1 %v1274_v33 }
0x12a9   :  { %1328 = vmatpush1.msra.mxu1 %v1273_v34 }
0x12aa   :  { %1329 = vmatprep.subr.mxu1 %v1272_v36 }
0x1301   :  { %v1067_v44 = vpop.permute.xlu1 %1066 }
0x1302   :  { %v1069_v39 = vmul.f32 %v2685_v38, %v1067_v44  ;;  %v1270_v44 = vunpack.c.h.bf16 %v1261_v35 }
0x1304   :  { %1071 = vrot.lane.b32.xlu0 %v1069_v39, %s2861_s4  ;;  %v1269_v39 = vunpack.c.l.bf16 %v1261_v35 }
0x1376   :  { %v1072_v41 = vpop.permute.xlu0 %1071 }
0x1377   :  { %v1074_v42 = vadd.f32 %v1072_v41, %v1064_v40 }
0x1379   :  { %2686 = vtanh.f32 %v1074_v42 }
0x1386   :  { %v2687_v43 = vpop.eup %2686 }
0x1387   :  { %1077 = vrot.lane.b32.xlu1 %v2687_v43, %s2855_s6  ;;  %v1409_v43 = vld [vmem:[#allocation11 + $0x18] sm:$0xff] }
0x13f9   :  { %v1078_v45 = vpop.permute.xlu1 %1077 }
0x13fa   :  { %v1080_v48 = vmul.f32 %v2685_v38, %v1078_v45  ;;  %v1271_v38 = vunpack.c.l.bf16 %v1262_v30  ;;  %v3200_v45 = vunpack.c.h.bf16 %v1409_v43 }
0x13fc   :  { %1082 = vrot.lane.b32.xlu0 %v1080_v48, %s2861_s4  ;;  %1330 = vmatpush1.msra.mxu1 %v1271_v38  ;;  %v3202_v48 = vunpack.c.l.bf16 %v1409_v43 }
0x13fd   :  { %1331 = vmatprep.subr.mxu1 %v1270_v44  ;;  %1442 = vmatprep.subr.mxu0 %v3200_v45 }
0x13fe   :  { %1332 = vmatpush1.msra.mxu1 %v1269_v39 }
0x13ff   :  { %1652 = vmatprep.subr.mxu1 %v3200_v45 }
0x146e   :  { %v1083_v51 = vpop.permute.xlu0 %1082 }
0x146f   :  { %1086 = vst.msk [vmem:[#allocation5 + $0xc] sm:$0x3] %vm443_vm4, %v1083_v51  ;;  %2460 = vmatmul.mubr.msk.f32.vlgmr.msra.gmra.mxu0 %vm188_vm2, %v1083_v51  ;;  %v1408_v51 = vld [vmem:[#allocation11 + $0x10] sm:$0xff] }
0x1470   :  { %1482 = vmatprep.mubr.f32.mxu0 %v2858_v1  ;;  %1443 = vmatpush1.msra.mxu0 %v3202_v48 }
0x1476   :  { %v1244_v55 = vld [vmem:[#allocation5 + $0xc] sm:$0x1]  ;;  %v1206_v17 = vld [vmem:[#allocation5 + $0xd] sm:$0x1] }
0x1477   :  { %1245 = vst.msk [vmem:[#allocation6 + $0x6] sm:$0x1] %vm1195_vm5, %v1244_v55  ;;  %v1407_v55 = vld [vmem:[#allocation11 + $0x8] sm:$0xff] }
0x152f   :  { %v1155_v56 = vpop.f32.mrf.mxu0 }
0x1531   :  { %v1157_v57 = vpop.f32.mrf.mxu0 }
0x1532   :  { %v1160_v60 = vsel %vm192_vm3, %v1155_v56, %v1157_v57  ;;  %v3204_v56 = vunpack.c.h.bf16 %v1408_v51  ;;  %v3206_v57 = vunpack.c.l.bf16 %v1408_v51 }
0x1533   :  { %v1163_v63 = vadd.f32 %v1162_v62, %v1160_v60  ;;  %v1406_v60 = vld [vmem:[#allocation11] sm:$0xff]  ;;  %v3209_v62 = vunpack.c.h.bf16 %v1407_v55 }
0x1534   :  { %1444 = vmatprep.subr.mxu0 %v3204_v56 }
0x1535   :  { %2688 = vtanh.f32 %v1163_v63  ;;  %v2461_v2 = vmul.f32 -1.442695, %v1163_v63  ;;  %1445 = vmatpush1.msra.mxu0 %v3206_v57 }
0x1536   :  { %1446 = vmatprep.subr.mxu0 %v3209_v62 }
0x1537   :  { %2690 = vpow2.f32 %v2461_v2  ;;  %v3213_v2 = vunpack.c.l.bf16 %v1407_v55 }
0x1539   :  { %1447 = vmatpush1.msra.mxu0 %v3213_v2 }
0x1542   :  { %v2689_v0 = vpop.eup %2688 }
0x1543   :  { %1173 = vrot.lane.b32.xlu1 %v2689_v0, %s2855_s6  ;;  %v1246_v0 = vld [vmem:[#allocation5 + $0x3] sm:$0x1] }
0x1544   :  { %v2691_v3 = vpop.eup %2690 }
0x1545   :  { %v1167_v4 = vadd.f32 1.0, %v2691_v3  ;;  %v3218_v3 = vunpack.c.h.bf16 %v1406_v60 }
0x1547   :  { %2692 = vrcp.f32 %v1167_v4  ;;  %v3221_v4 = vunpack.c.l.bf16 %v1406_v60  ;;  %1448 = vmatprep.subr.mxu0 %v3218_v3 }
0x1549   :  { %1449 = vmatpush1.msra.mxu0 %v3221_v4 }
0x154a   :  { %1483 = vmatmul.mubr.f32.vlgmr.msra.gmra.mxu0 %v2858_v1  ;;  %1547 = vmatprep.subr.mxu0 %v3200_v45 }
0x154b   :  { %1548 = vmatpush1.msra.mxu0 %v3202_v48  ;;  %1587 = vmatprep.mubr.f32.mxu0 %v2858_v1 }
0x154c   :  { %1549 = vmatprep.subr.mxu0 %v3204_v56 }
0x154d   :  { %1550 = vmatpush1.msra.mxu0 %v3206_v57 }
0x154e   :  { %1551 = vmatprep.subr.mxu0 %v3209_v62 }
0x154f   :  { %1552 = vmatpush1.msra.mxu0 %v3213_v2 }
0x1550   :  { %1553 = vmatprep.subr.mxu0 %v3218_v3 }
0x1551   :  { %1554 = vmatpush1.msra.mxu0 %v3221_v4 }
0x1552   :  { %1757 = vmatprep.subr.mxu0 %v3200_v45 }
0x1554   :  { %v2693_v5 = vpop.eup %2692 }
0x1555   :  { %v1171_v8 = vmul.f32 %v2693_v5, %v1074_v42 }
0x15b5   :  { %v1174_v6 = vpop.permute.xlu1 %1173 }
0x15b6   :  { %v1176_v7 = vmul.f32 %v2693_v5, %v1174_v6 }
0x15b8   :  { %1178 = vrot.lane.b32.xlu0 %v1176_v7, %s2861_s4 }
0x162a   :  { %v1179_v9 = vpop.permute.xlu0 %1178 }
0x162b   :  { %v1181_v10 = vadd.f32 %v1179_v9, %v1171_v8  ;;  %v1285_v9 = vld [vmem:[%s3412_s7] sm:$0x3] }
0x162d   :  { %2694 = vtanh.f32 %v1181_v10  ;;  %v1290_v10 = vrot.slane %v1285_v9, %v210_v59 }
0x163a   :  { %v2695_v11 = vpop.eup %2694 }
0x163b   :  { %1184 = vrot.lane.b32.xlu1 %v2695_v11, %s2855_s6  ;;  %v1294_v11 = vrot.slane %v1285_v9, %v214_v61  ;;  %v1484_v61 = vpop.f32.mrf.mxu0 }
0x163d   :  { %v1486_v24 = vpop.f32.mrf.mxu0 }
0x163e   :  { %v1489_v25 = vsel %vm192_vm3, %v1484_v61, %v1486_v24 }
0x163f   :  { %1216 = vrot.lane.b32.xlu1 %v1214_v12, %s2861_s4 }
0x1643   :  { %1232 = vrot.lane.b32.xlu1 %v1230_v13, %s2861_s4 }
0x16ad   :  { %v1185_v14 = vpop.permute.xlu1 %1184 }
0x16ae   :  { %v1187_v15 = vmul.f32 %v2693_v5, %v1185_v14 }
0x16b0   :  { %1189 = vrot.lane.b32.xlu0 %v1187_v15, %s2861_s4 }
0x16b1   :  { %v1217_v16 = vpop.permute.xlu1 %1216 }
0x16b2   :  { %1219 = vst.msk [vmem:[#allocation6 + $0x2] sm:$0x1] %vm1202_vm6, %v1217_v16 }
0x16b4   :  { %1208 = vrot.lane.b32.xlu0 %v1206_v17, %s2861_s4 }
0x16b5   :  { %v1233_v52 = vpop.permute.xlu1 %1232 }
0x16b6   :  { %1235 = vst.msk [vmem:[#allocation6 + $0x4] sm:$0x1] %vm1202_vm6, %v1233_v52 }
0x16b8   :  { %1224 = vrot.lane.b32.xlu0 %v1222_v54, %s2861_s4 }
0x16bc   :  { %1240 = vrot.lane.b32.xlu0 %v1238_v19, %s2861_s4 }
0x16c0   :  { %1256 = vrot.lane.b32.xlu0 %v1254_v20, %s2861_s4 }
0x1722   :  { %v1190_v27 = vpop.permute.xlu0 %1189 }
0x1723   :  { %1193 = vst.msk [vmem:[#allocation5 + $0xe] sm:$0x3] %vm443_vm4, %v1190_v27 }
0x1726   :  { %v1209_v37 = vpop.permute.xlu0 %1208 }
0x1727   :  { %1211 = vst.msk [vmem:[#allocation6 + $0x1] sm:$0x1] %vm1202_vm6, %v1209_v37 }
0x172a   :  { %v1225_v40 = vpop.permute.xlu0 %1224  ;;  %v1197_v41 = vld [vmem:[#allocation5 + $0xf] sm:$0x1]  ;;  %v1252_v42 = vld [vmem:[#allocation5 + $0xe] sm:$0x1] }
0x172b   :  { %1227 = vst.msk [vmem:[#allocation6 + $0x3] sm:$0x1] %vm1202_vm6, %v1225_v40  ;;  %1199 = vrot.lane.b32.xlu1 %v1197_v41, %s2861_s4 }
0x172c   :  { %1253 = vst.msk [vmem:[#allocation6 + $0x7] sm:$0x1] %vm1195_vm5, %v1252_v42 }
0x172e   :  { %v1241_v63 = vpop.permute.xlu0 %1240 }
0x172f   :  { %1243 = vst.msk [vmem:[#allocation6 + $0x5] sm:$0x1] %vm1202_vm6, %v1241_v63  ;;  %1248 = vrot.lane.b32.xlu1 %v1246_v0, %s2861_s4 }
0x1732   :  { %v1257_v5 = vpop.permute.xlu0 %1256 }
0x1733   :  { %1259 = vst.msk [vmem:[#allocation6 + $0x7] sm:$0x1] %vm1202_vm6, %v1257_v5 }
0x179d   :  { %v1200_v6 = vpop.permute.xlu1 %1199 }
0x179e   :  { %1203 = vst.msk [vmem:[#allocation6] sm:$0x1] %vm1202_vm6, %v1200_v6 }
0x17a1   :  { %v1249_v7 = vpop.permute.xlu1 %1248 }
0x17a2   :  { %1251 = vst.msk [vmem:[#allocation6 + $0x6] sm:$0x1] %vm1202_vm6, %v1249_v7 }
0x17a9   :  { %v1260_v8 = vld [vmem:[#allocation6] sm:$0xff] }
0x17aa   :  { %2462 = vmatmul.mubr.msk.f32.vlgmr.msra.gmra.mxu1 %vm1297_vm7, %v1260_v8 }
0x17ab   :  { %1653 = vmatpush1.msra.mxu1 %v3202_v48  ;;  %1692 = vmatprep.mubr.f32.mxu1 %v2858_v1 }
0x17ac   :  { %1654 = vmatprep.subr.mxu1 %v3204_v56 }
0x17ad   :  { %1655 = vmatpush1.msra.mxu1 %v3206_v57 }
0x17ae   :  { %1656 = vmatprep.subr.mxu1 %v3209_v62 }
0x17af   :  { %1657 = vmatpush1.msra.mxu1 %v3213_v2 }
0x17b0   :  { %1658 = vmatprep.subr.mxu1 %v3218_v3 }
0x17b1   :  { %1659 = vmatpush1.msra.mxu1 %v3221_v4 }
0x17b2   :  { %1862 = vmatprep.subr.mxu1 %v3200_v45 }
0x186a   :  { %v1367_v12 = vpop.f32.mrf.mxu1 }
0x186b   :  { %v1368_v13 = vadd.f32 %v1367_v12, %v1290_v10 }
0x186c   :  { %v1369_v14 = vpop.f32.mrf.mxu1 }
0x186d   :  { %1372 = vst [vmem:[#allocation3] sm:$0xff] %v1368_v13  ;;  %v1370_v15 = vadd.f32 %v1369_v14, %v1294_v11 }
0x186f   :  { %1373 = vst [vmem:[#allocation3 + $0x8] sm:$0xff] %v1370_v15 }
0x1874   :  { %v1374_v16 = vld [vmem:[#allocation3] ss:$0 sm:$0xff]  ;;  %v1378_v17 = vld [vmem:[#allocation3 + $0x1] ss:$0 sm:$0xff]  ;;  %v1382_v46 = vld [vmem:[#allocation3 + $0x2] ss:$0 sm:$0xff] }
0x1875   :  { %1375 = vst [vmem:[#allocation4] sm:$0x1] %v1374_v16  ;;  %1379 = vst [vmem:[#allocation4 + $0x2] sm:$0x1] %v1378_v17  ;;  %v1386_v18 = vld [vmem:[#allocation3 + $0x3] ss:$0 sm:$0xff] }
0x1876   :  { %1383 = vst [vmem:[#allocation4 + $0x4] sm:$0x1] %v1382_v46  ;;  %v1390_v47 = vld [vmem:[#allocation3 + $0x4] ss:$0 sm:$0xff]  ;;  %v1394_v49 = vld [vmem:[#allocation3 + $0x5] ss:$0 sm:$0xff] }
0x1877   :  { %v1376_v50 = vld [vmem:[#allocation3 + $0xf] ss:$0 sm:$0xff]  ;;  %v1380_v59 = vld [vmem:[#allocation3 + $0xe] ss:$0 sm:$0xff]  ;;  %v1384_v52 = vld [vmem:[#allocation3 + $0xd] ss:$0 sm:$0xff] }
0x1878   :  { %1387 = vst [vmem:[#allocation4 + $0x6] sm:$0x1] %v1386_v18  ;;  %1391 = vst [vmem:[#allocation4 + $0x8] sm:$0x1] %v1390_v47  ;;  %v1388_v53 = vld [vmem:[#allocation3 + $0xc] ss:$0 sm:$0xff] }
0x1879   :  { %1395 = vst [vmem:[#allocation4 + $0xa] sm:$0x1] %v1394_v49  ;;  %1377 = vst [vmem:[#allocation4 + $0x1] sm:$0x1] %v1376_v50  ;;  %v1392_v54 = vld [vmem:[#allocation3 + $0xb] ss:$0 sm:$0xff] }
0x187a   :  { %1381 = vst [vmem:[#allocation4 + $0x3] sm:$0x1] %v1380_v59  ;;  %1385 = vst [vmem:[#allocation4 + $0x5] sm:$0x1] %v1384_v52  ;;  %v1396_v19 = vld [vmem:[#allocation3 + $0xa] ss:$0 sm:$0xff] }
0x187b   :  { %1389 = vst [vmem:[#allocation4 + $0x7] sm:$0x1] %v1388_v53  ;;  %1393 = vst [vmem:[#allocation4 + $0x9] sm:$0x1] %v1392_v54  ;;  %v1398_v20 = vld [vmem:[#allocation3 + $0x6] ss:$0 sm:$0xff] }
0x187c   :  { %1397 = vst [vmem:[#allocation4 + $0xb] sm:$0x1] %v1396_v19  ;;  %v1400_v21 = vld [vmem:[#allocation3 + $0x9] ss:$0 sm:$0xff]  ;;  %v1402_v22 = vld [vmem:[#allocation3 + $0x7] ss:$0 sm:$0xff] }
0x187d   :  { %1399 = vst [vmem:[#allocation4 + $0xc] sm:$0x1] %v1398_v20  ;;  %1401 = vst [vmem:[#allocation4 + $0xd] sm:$0x1] %v1400_v21  ;;  %v1404_v23 = vld [vmem:[#allocation3 + $0x8] ss:$0 sm:$0xff] }
0x187e   :  { %1403 = vst [vmem:[#allocation4 + $0xe] sm:$0x1] %v1402_v22  ;;  %1405 = vst [vmem:[#allocation4 + $0xf] sm:$0x1] %v1404_v23 }
0x1880   :  { %v1490_v26 = vld [vmem:[#allocation4] sm:$0x3] }
0x1881   :  { %v1491_v27 = vadd.f32 %v1490_v26, %v1489_v25  ;;  %v1595_v55 = vld [vmem:[#allocation4 + $0x2] sm:$0x3]  ;;  %v1700_v49 = vld [vmem:[#allocation4 + $0x4] sm:$0x3] }
0x1883   :  { %2696 = vtanh.f32 %v1491_v27  ;;  %v2463_v29 = vmul.f32 -1.442695, %v1491_v27 }
0x1885   :  { %2698 = vpow2.f32 %v2463_v29 }
0x1890   :  { %v2697_v28 = vpop.eup %2696 }
0x1891   :  { %1501 = vrot.lane.b32.xlu1 %v2697_v28, %s2855_s6 }
0x1892   :  { %v2699_v30 = vpop.eup %2698 }
0x1893   :  { %v1495_v31 = vadd.f32 1.0, %v2699_v30 }
0x1895   :  { %2700 = vrcp.f32 %v1495_v31 }
0x18a2   :  { %v2701_v32 = vpop.eup %2700 }
0x18a3   :  { %v1499_v35 = vmul.f32 0.0, %v2701_v32 }
0x1903   :  { %v1502_v33 = vpop.permute.xlu1 %1501 }
0x1904   :  { %v1504_v34 = vmul.f32 %v2701_v32, %v1502_v33 }
0x1906   :  { %1506 = vrot.lane.b32.xlu0 %v1504_v34, %s2861_s4 }
0x1978   :  { %v1507_v36 = vpop.permute.xlu0 %1506 }
0x1979   :  { %v1509_v37 = vadd.f32 %v1507_v36, %v1499_v35 }
0x197b   :  { %2702 = vtanh.f32 %v1509_v37 }
0x1988   :  { %v2703_v38 = vpop.eup %2702 }
0x1989   :  { %1512 = vrot.lane.b32.xlu1 %v2703_v38, %s2855_s6 }
0x19fb   :  { %v1513_v44 = vpop.permute.xlu1 %1512 }
0x19fc   :  { %v1515_v39 = vmul.f32 %v2701_v32, %v1513_v44  ;;  %v1805_v32 = vld [vmem:[#allocation4 + $0x6] sm:$0x3] }
0x19fe   :  { %1517 = vrot.lane.b32.xlu0 %v1515_v39, %s2861_s4 }
0x1a70   :  { %v1518_v40 = vpop.permute.xlu0 %1517 }
0x1a71   :  { %1520 = vst.msk [vmem:[#allocation5] sm:$0x3] %vm443_vm4, %v1518_v40  ;;  %2464 = vmatmul.mubr.msk.f32.vlgmr.msra.gmra.mxu0 %vm188_vm2, %v1518_v40 }
0x1a72   :  { %1758 = vmatpush1.msra.mxu0 %v3202_v48  ;;  %1797 = vmatprep.mubr.f32.mxu0 %v2858_v1 }
0x1a73   :  { %1759 = vmatprep.subr.mxu0 %v3204_v56 }
0x1a74   :  { %1760 = vmatpush1.msra.mxu0 %v3206_v57 }
0x1a75   :  { %1761 = vmatprep.subr.mxu0 %v3209_v62 }
0x1a76   :  { %1762 = vmatpush1.msra.mxu0 %v3213_v2 }
0x1a77   :  { %1763 = vmatprep.subr.mxu0 %v3218_v3 }
0x1a78   :  { %1764 = vmatpush1.msra.mxu0 %v3221_v4  ;;  %v2256_v41 = vld [vmem:[#allocation5] sm:$0x1] }
0x1a79   :  { %1967 = vmatprep.subr.mxu0 %v3200_v45  ;;  %2257 = vst.msk [vmem:[#allocation7] sm:$0x1] %vm1195_vm5, %v2256_v41 }
0x1b31   :  { %v1589_v42 = vpop.f32.mrf.mxu0 }
0x1b33   :  { %v1591_v43 = vpop.f32.mrf.mxu0 }
0x1b34   :  { %v1594_v51 = vsel %vm192_vm3, %v1589_v42, %v1591_v43 }
0x1b35   :  { %v1596_v60 = vadd.f32 %v1595_v55, %v1594_v51 }
0x1b37   :  { %2704 = vtanh.f32 %v1596_v60  ;;  %v2465_v0 = vmul.f32 -1.442695, %v1596_v60 }
0x1b39   :  { %2706 = vpow2.f32 %v2465_v0 }
0x1b44   :  { %v2705_v63 = vpop.eup %2704 }
0x1b45   :  { %1606 = vrot.lane.b32.xlu1 %v2705_v63, %s2855_s6 }
0x1b46   :  { %v2707_v5 = vpop.eup %2706 }
0x1b47   :  { %v1600_v6 = vadd.f32 1.0, %v2707_v5 }
0x1b49   :  { %2708 = vrcp.f32 %v1600_v6  ;;  %v1910_v6 = vld [vmem:[#allocation4 + $0x8] sm:$0x3] }
0x1b56   :  { %v2709_v7 = vpop.eup %2708 }
0x1b57   :  { %v1604_v10 = vmul.f32 %v2709_v7, %v1509_v37 }
0x1bb7   :  { %v1607_v8 = vpop.permute.xlu1 %1606 }
0x1bb8   :  { %v1609_v9 = vmul.f32 %v2709_v7, %v1607_v8 }
0x1bba   :  { %1611 = vrot.lane.b32.xlu0 %v1609_v9, %s2861_s4 }
0x1c2c   :  { %v1612_v11 = vpop.permute.xlu0 %1611 }
0x1c2d   :  { %v1614_v12 = vadd.f32 %v1612_v11, %v1604_v10 }
0x1c2f   :  { %2710 = vtanh.f32 %v1614_v12 }
0x1c3c   :  { %v2711_v13 = vpop.eup %2710 }
0x1c3d   :  { %1617 = vrot.lane.b32.xlu1 %v2711_v13, %s2855_s6 }
0x1caf   :  { %v1618_v14 = vpop.permute.xlu1 %1617 }
0x1cb0   :  { %v1620_v15 = vmul.f32 %v2709_v7, %v1618_v14 }
0x1cb2   :  { %1622 = vrot.lane.b32.xlu0 %v1620_v15, %s2861_s4 }
0x1d24   :  { %v1623_v16 = vpop.permute.xlu0 %1622 }
0x1d25   :  { %1625 = vst.msk [vmem:[#allocation5 + $0x2] sm:$0x3] %vm443_vm4, %v1623_v16  ;;  %2466 = vmatmul.mubr.msk.f32.vlgmr.msra.gmra.mxu1 %vm188_vm2, %v1623_v16 }
0x1d26   :  { %1863 = vmatpush1.msra.mxu1 %v3202_v48  ;;  %1902 = vmatprep.mubr.f32.mxu1 %v2858_v1 }
0x1d27   :  { %1864 = vmatprep.subr.mxu1 %v3204_v56 }
0x1d28   :  { %1865 = vmatpush1.msra.mxu1 %v3206_v57 }
0x1d29   :  { %1866 = vmatprep.subr.mxu1 %v3209_v62 }
0x1d2a   :  { %1867 = vmatpush1.msra.mxu1 %v3213_v2 }
0x1d2b   :  { %1868 = vmatprep.subr.mxu1 %v3218_v3 }
0x1d2c   :  { %1869 = vmatpush1.msra.mxu1 %v3221_v4  ;;  %v2264_v17 = vld [vmem:[#allocation5 + $0x2] sm:$0x1] }
0x1d2d   :  { %2072 = vmatprep.subr.mxu1 %v3200_v45  ;;  %2265 = vst.msk [vmem:[#allocation7 + $0x1] sm:$0x1] %vm1195_vm5, %v2264_v17 }
0x1de5   :  { %v1694_v46 = vpop.f32.mrf.mxu1 }
0x1de7   :  { %v1696_v18 = vpop.f32.mrf.mxu1 }
0x1de8   :  { %v1699_v47 = vsel %vm192_vm3, %v1694_v46, %v1696_v18 }
0x1de9   :  { %v1701_v50 = vadd.f32 %v1700_v49, %v1699_v47 }
0x1deb   :  { %2712 = vtanh.f32 %v1701_v50  ;;  %v2467_v52 = vmul.f32 -1.442695, %v1701_v50 }
0x1ded   :  { %2714 = vpow2.f32 %v2467_v52 }
0x1df8   :  { %v2713_v59 = vpop.eup %2712 }
0x1df9   :  { %1711 = vrot.lane.b32.xlu1 %v2713_v59, %s2855_s6 }
0x1dfa   :  { %v2715_v61 = vpop.eup %2714 }
0x1dfb   :  { %v1705_v53 = vadd.f32 1.0, %v2715_v61  ;;  %v2015_v61 = vld [vmem:[#allocation4 + $0xa] sm:$0x3] }
0x1dfd   :  { %2716 = vrcp.f32 %v1705_v53 }
0x1e0a   :  { %v2717_v54 = vpop.eup %2716 }
0x1e0b   :  { %v1709_v21 = vmul.f32 %v2717_v54, %v1614_v12 }
0x1e6b   :  { %v1712_v19 = vpop.permute.xlu1 %1711 }
0x1e6c   :  { %v1714_v20 = vmul.f32 %v2717_v54, %v1712_v19 }
0x1e6e   :  { %1716 = vrot.lane.b32.xlu0 %v1714_v20, %s2861_s4 }
0x1ee0   :  { %v1717_v22 = vpop.permute.xlu0 %1716 }
0x1ee1   :  { %v1719_v23 = vadd.f32 %v1717_v22, %v1709_v21 }
0x1ee3   :  { %2718 = vtanh.f32 %v1719_v23 }
0x1ef0   :  { %v2719_v24 = vpop.eup %2718 }
0x1ef1   :  { %1722 = vrot.lane.b32.xlu1 %v2719_v24, %s2855_s6 }
0x1f63   :  { %v1723_v25 = vpop.permute.xlu1 %1722 }
0x1f64   :  { %v1725_v26 = vmul.f32 %v2717_v54, %v1723_v25 }
0x1f66   :  { %1727 = vrot.lane.b32.xlu0 %v1725_v26, %s2861_s4 }
0x1fd8   :  { %v1728_v27 = vpop.permute.xlu0 %1727 }
0x1fd9   :  { %1730 = vst.msk [vmem:[#allocation5 + $0x4] sm:$0x3] %vm443_vm4, %v1728_v27  ;;  %2468 = vmatmul.mubr.msk.f32.vlgmr.msra.gmra.mxu0 %vm188_vm2, %v1728_v27 }
0x1fda   :  { %1968 = vmatpush1.msra.mxu0 %v3202_v48  ;;  %2007 = vmatprep.mubr.f32.mxu0 %v2858_v1 }
0x1fdb   :  { %1969 = vmatprep.subr.mxu0 %v3204_v56 }
0x1fdc   :  { %1970 = vmatpush1.msra.mxu0 %v3206_v57 }
0x1fdd   :  { %1971 = vmatprep.subr.mxu0 %v3209_v62 }
0x1fde   :  { %1972 = vmatpush1.msra.mxu0 %v3213_v2 }
0x1fdf   :  { %1973 = vmatprep.subr.mxu0 %v3218_v3 }
0x1fe0   :  { %1974 = vmatpush1.msra.mxu0 %v3221_v4  ;;  %v2272_v28 = vld [vmem:[#allocation5 + $0x4] sm:$0x1] }
0x1fe1   :  { %2177 = vmatprep.subr.mxu0 %v3200_v45  ;;  %2273 = vst.msk [vmem:[#allocation7 + $0x2] sm:$0x1] %vm1195_vm5, %v2272_v28 }
0x2099   :  { %v1799_v29 = vpop.f32.mrf.mxu0 }
0x209b   :  { %v1801_v30 = vpop.f32.mrf.mxu0 }
0x209c   :  { %v1804_v31 = vsel %vm192_vm3, %v1799_v29, %v1801_v30  ;;  %v2120_v30 = vld [vmem:[#allocation4 + $0xc] sm:$0x3] }
0x209d   :  { %v1806_v33 = vadd.f32 %v1805_v32, %v1804_v31 }
0x209f   :  { %2720 = vtanh.f32 %v1806_v33  ;;  %v2469_v35 = vmul.f32 -1.442695, %v1806_v33 }
0x20a1   :  { %2722 = vpow2.f32 %v2469_v35 }
0x20ac   :  { %v2721_v34 = vpop.eup %2720 }
0x20ad   :  { %1816 = vrot.lane.b32.xlu1 %v2721_v34, %s2855_s6 }
0x20ae   :  { %v2723_v36 = vpop.eup %2722 }
0x20af   :  { %v1810_v37 = vadd.f32 1.0, %v2723_v36 }
0x20b1   :  { %2724 = vrcp.f32 %v1810_v37 }
0x20be   :  { %v2725_v38 = vpop.eup %2724 }
0x20bf   :  { %v1814_v39 = vmul.f32 %v2725_v38, %v1719_v23 }
0x211f   :  { %v1817_v45 = vpop.permute.xlu1 %1816 }
0x2120   :  { %v1819_v44 = vmul.f32 %v2725_v38, %v1817_v45 }
0x2122   :  { %1821 = vrot.lane.b32.xlu0 %v1819_v44, %s2861_s4 }
0x2194   :  { %v1822_v40 = vpop.permute.xlu0 %1821 }
0x2195   :  { %v1824_v41 = vadd.f32 %v1822_v40, %v1814_v39 }
0x2197   :  { %2726 = vtanh.f32 %v1824_v41 }
0x21a4   :  { %v2727_v42 = vpop.eup %2726 }
0x21a5   :  { %1827 = vrot.lane.b32.xlu1 %v2727_v42, %s2855_s6 }
0x2217   :  { %v1828_v43 = vpop.permute.xlu1 %1827 }
0x2218   :  { %v1830_v51 = vmul.f32 %v2725_v38, %v1828_v43 }
0x221a   :  { %1832 = vrot.lane.b32.xlu0 %v1830_v51, %s2861_s4 }
0x228c   :  { %v1833_v55 = vpop.permute.xlu0 %1832 }
0x228d   :  { %1835 = vst.msk [vmem:[#allocation5 + $0x6] sm:$0x3] %vm443_vm4, %v1833_v55  ;;  %2470 = vmatmul.mubr.msk.f32.vlgmr.msra.gmra.mxu1 %vm188_vm2, %v1833_v55 }
0x228e   :  { %2073 = vmatpush1.msra.mxu1 %v3202_v48  ;;  %2112 = vmatprep.mubr.f32.mxu1 %v2858_v1 }
0x228f   :  { %2074 = vmatprep.subr.mxu1 %v3204_v56 }
0x2290   :  { %2075 = vmatpush1.msra.mxu1 %v3206_v57 }
0x2291   :  { %2076 = vmatprep.subr.mxu1 %v3209_v62 }
0x2292   :  { %2077 = vmatpush1.msra.mxu1 %v3213_v2 }
0x2293   :  { %2078 = vmatprep.subr.mxu1 %v3218_v3 }
0x2294   :  { %2079 = vmatpush1.msra.mxu1 %v3221_v4  ;;  %v2280_v60 = vld [vmem:[#allocation5 + $0x6] sm:$0x1] }
0x2295   :  { %2281 = vst.msk [vmem:[#allocation7 + $0x3] sm:$0x1] %vm1195_vm5, %v2280_v60  ;;  %2599 = vmatprep.subr.mxu1 %v2858_v1 }
0x234d   :  { %v1904_v63 = vpop.f32.mrf.mxu1 }
0x234f   :  { %v1906_v0 = vpop.f32.mrf.mxu1 }
0x2350   :  { %v1909_v5 = vsel %vm192_vm3, %v1904_v63, %v1906_v0  ;;  %v2225_v0 = vld [vmem:[#allocation4 + $0xe] sm:$0x3] }
0x2351   :  { %v1911_v7 = vadd.f32 %v1910_v6, %v1909_v5 }
0x2353   :  { %2728 = vtanh.f32 %v1911_v7  ;;  %v2471_v9 = vmul.f32 -1.442695, %v1911_v7 }
0x2355   :  { %2730 = vpow2.f32 %v2471_v9 }
0x2360   :  { %v2729_v8 = vpop.eup %2728 }
0x2361   :  { %1921 = vrot.lane.b32.xlu1 %v2729_v8, %s2855_s6 }
0x2362   :  { %v2731_v10 = vpop.eup %2730 }
0x2363   :  { %v1915_v11 = vadd.f32 1.0, %v2731_v10 }
0x2365   :  { %2732 = vrcp.f32 %v1915_v11 }
0x2372   :  { %v2733_v12 = vpop.eup %2732 }
0x2373   :  { %v1919_v15 = vmul.f32 %v2733_v12, %v1824_v41 }
0x23d3   :  { %v1922_v13 = vpop.permute.xlu1 %1921 }
0x23d4   :  { %v1924_v14 = vmul.f32 %v2733_v12, %v1922_v13 }
0x23d6   :  { %1926 = vrot.lane.b32.xlu0 %v1924_v14, %s2861_s4 }
0x2448   :  { %v1927_v16 = vpop.permute.xlu0 %1926 }
0x2449   :  { %v1929_v17 = vadd.f32 %v1927_v16, %v1919_v15 }
0x244b   :  { %2734 = vtanh.f32 %v1929_v17 }
0x2458   :  { %v2735_v46 = vpop.eup %2734 }
0x2459   :  { %1932 = vrot.lane.b32.xlu1 %v2735_v46, %s2855_s6 }
0x24cb   :  { %v1933_v18 = vpop.permute.xlu1 %1932 }
0x24cc   :  { %v1935_v47 = vmul.f32 %v2733_v12, %v1933_v18 }
0x24ce   :  { %1937 = vrot.lane.b32.xlu0 %v1935_v47, %s2861_s4 }
0x2540   :  { %v1938_v49 = vpop.permute.xlu0 %1937 }
0x2541   :  { %1940 = vst.msk [vmem:[#allocation5 + $0x8] sm:$0x3] %vm443_vm4, %v1938_v49  ;;  %2472 = vmatmul.mubr.msk.f32.vlgmr.msra.gmra.mxu0 %vm188_vm2, %v1938_v49 }
0x2542   :  { %2178 = vmatpush1.msra.mxu0 %v3202_v48  ;;  %2217 = vmatprep.mubr.f32.mxu0 %v2858_v1 }
0x2543   :  { %2179 = vmatprep.subr.mxu0 %v3204_v56 }
0x2544   :  { %2180 = vmatpush1.msra.mxu0 %v3206_v57 }
0x2545   :  { %2181 = vmatprep.subr.mxu0 %v3209_v62 }
0x2546   :  { %2182 = vmatpush1.msra.mxu0 %v3213_v2 }
0x2547   :  { %2183 = vmatprep.subr.mxu0 %v3218_v3 }
0x2548   :  { %2184 = vmatpush1.msra.mxu0 %v3221_v4  ;;  %v2288_v50 = vld [vmem:[#allocation5 + $0x8] sm:$0x1] }
0x2549   :  { %2289 = vst.msk [vmem:[#allocation7 + $0x4] sm:$0x1] %vm1195_vm5, %v2288_v50  ;;  %v2537_v50 = vld [vmem:[#allocation13 + $0x18] sm:$0xff]  }
0x2601   :  { %v2009_v59 = vpop.f32.mrf.mxu0 }
0x2603   :  { %v2011_v52 = vpop.f32.mrf.mxu0 }
0x2604   :  { %v2014_v48 = vsel %vm192_vm3, %v2009_v59, %v2011_v52  ;;  %v2527_v59 = vunpack.c.h.bf16 %v2537_v50  ;;  %v2526_v52 = vunpack.c.l.bf16 %v2537_v50 }
0x2605   :  { %v2016_v56 = vadd.f32 %v2015_v61, %v2014_v48  ;;  %v2282_v61 = vld [vmem:[#allocation5 + $0x9] sm:$0x1] }
0x2607   :  { %2736 = vtanh.f32 %v2016_v56  ;;  %v2473_v62 = vmul.f32 -1.442695, %v2016_v56  ;;  %v2298_v56 = vld [vmem:[#allocation5 + $0x5] sm:$0x1] }
0x2609   :  { %2738 = vpow2.f32 %v2473_v62  ;;  %v2536_v62 = vld [vmem:[#allocation13 + $0x10] sm:$0xff]  }
0x2614   :  { %v2737_v57 = vpop.eup %2736 }
0x2615   :  { %2026 = vrot.lane.b32.xlu1 %v2737_v57, %s2855_s6  ;;  %v2314_v57 = vld [vmem:[#allocation5 + $0x1] sm:$0x1] }
0x2616   :  { %v2739_v2 = vpop.eup %2738 }
0x2617   :  { %v2020_v3 = vadd.f32 1.0, %v2739_v2  ;;  %v2523_v2 = vunpack.c.h.bf16 %v2536_v62 }
0x2619   :  { %2740 = vrcp.f32 %v2020_v3  ;;  %v2522_v3 = vunpack.c.l.bf16 %v2536_v62 }
0x2626   :  { %v2741_v4 = vpop.eup %2740 }
0x2627   :  { %v2024_v19 = vmul.f32 %v2741_v4, %v1929_v17  ;;  %v2290_v17 = vld [vmem:[#allocation5 + $0x7] sm:$0x1] }
0x2687   :  { %v2027_v53 = vpop.permute.xlu1 %2026 }
0x2688   :  { %v2029_v54 = vmul.f32 %v2741_v4, %v2027_v53  ;;  %v2535_v53 = vld [vmem:[#allocation13 + $0x8] sm:$0xff]  }
0x268a   :  { %2031 = vrot.lane.b32.xlu0 %v2029_v54, %s2861_s4  ;;  %v2513_v54 = vld [vmem:[#allocation13] sm:$0xff]  }
0x26fc   :  { %v2032_v20 = vpop.permute.xlu0 %2031 }
0x26fd   :  { %v2034_v21 = vadd.f32 %v2032_v20, %v2024_v19  ;;  %v2519_v19 = vunpack.c.h.bf16 %v2535_v53  ;;  %v2518_v20 = vunpack.c.l.bf16 %v2535_v53 }
0x26ff   :  { %2742 = vtanh.f32 %v2034_v21 }
0x270c   :  { %v2743_v22 = vpop.eup %2742 }
0x270d   :  { %2037 = vrot.lane.b32.xlu1 %v2743_v22, %s2855_s6 }
0x277f   :  { %v2038_v23 = vpop.permute.xlu1 %2037 }
0x2780   :  { %v2040_v24 = vmul.f32 %v2741_v4, %v2038_v23  ;;  %v2514_v23 = vunpack.c.l.bf16 %v2513_v54 }
0x2782   :  { %2042 = vrot.lane.b32.xlu0 %v2040_v24, %s2861_s4 }
0x27f4   :  { %v2043_v25 = vpop.permute.xlu0 %2042 }
0x27f5   :  { %2045 = vst.msk [vmem:[#allocation5 + $0xa] sm:$0x3] %vm443_vm4, %v2043_v25  ;;  %2474 = vmatmul.mubr.msk.f32.vlgmr.msra.gmra.mxu1 %vm188_vm2, %v2043_v25 }
0x27f6   :  { %2615 = vmatprep.mubr.msk.f32.mxu1 %vm2859_vm0, %v2858_v1  ;;  %2600 = vmatpush3.msra.mxu1 %v2527_v59 }
0x27f7   :  { %2601 = vmatprep.subr.mxu1 %v2858_v1 }
0x27f8   :  { %2602 = vmatpush3.msra.mxu1 %v2526_v52 }
0x27f9   :  { %2603 = vmatprep.subr.mxu1 %v2858_v1 }
0x27fa   :  { %2604 = vmatpush3.msra.mxu1 %v2523_v2 }
0x27fb   :  { %2605 = vmatprep.subr.mxu1 %v2858_v1 }
0x27fc   :  { %v2296_v26 = vld [vmem:[#allocation5 + $0xa] sm:$0x1]  ;;  %v2274_v16 = vld [vmem:[#allocation5 + $0xb] sm:$0x1]  ;;  %2606 = vmatpush3.msra.mxu1 %v2522_v3 }
0x27fd   :  { %2297 = vst.msk [vmem:[#allocation7 + $0x5] sm:$0x1] %vm1195_vm5, %v2296_v26  ;;  %2607 = vmatprep.subr.mxu1 %v2858_v1 }
0x27fe   :  { %2608 = vmatpush3.msra.mxu1 %v2519_v19 }
0x27ff   :  { %2609 = vmatprep.subr.mxu1 %v2858_v1 }
0x2800   :  { %2610 = vmatpush3.msra.mxu1 %v2518_v20 }
0x2801   :  { %2611 = vmatprep.subr.mxu1 %v2858_v1 }
0x28b5   :  { %v2114_v27 = vpop.f32.mrf.mxu1 }
0x28b7   :  { %v2116_v28 = vpop.f32.mrf.mxu1 }
0x28b8   :  { %v2119_v29 = vsel %vm192_vm3, %v2114_v27, %v2116_v28  ;;  %v2306_v28 = vld [vmem:[#allocation5 + $0x3] sm:$0x1] }
0x28b9   :  { %v2121_v31 = vadd.f32 %v2120_v30, %v2119_v29 }
0x28bb   :  { %2744 = vtanh.f32 %v2121_v31  ;;  %v2475_v33 = vmul.f32 -1.442695, %v2121_v31 }
0x28bd   :  { %2746 = vpow2.f32 %v2475_v33 }
0x28c8   :  { %v2745_v32 = vpop.eup %2744 }
0x28c9   :  { %2131 = vrot.lane.b32.xlu1 %v2745_v32, %s2855_s6  ;;  %v2478_v32 = vld [vmem:[%s3414_s9] ss:$0 sm:$0xff]  ;;  %s2824_s9 = scalar_lea.vmem %s2435_s28, 128 }
0x28ca   :  { %v2747_v34 = vpop.eup %2746  ;;  %p2825_p1 = scmp.ne.s32.totalorder %s2435_s28, %s2824_s9  ;;  %p2830_p3 = scmp.lt.s32.totalorder %s2824_s9, %s2824_s9 }
0x28cb   :  { %v2125_v35 = vadd.f32 1.0, %v2747_v34 }
0x28cc   :  { %p2831_p4 = por %p2830_p3, %p2829_p2 }
0x28cd   :  { %2748 = vrcp.f32 %v2125_v35 }
0x28ce   :  { %p2832_p5 = pnand %p2831_p4, %p2825_p1 }
0x28da   :  { %v2749_v36 = vpop.eup %2748 }
0x28db   :  { %v2129_v45 = vmul.f32 %v2749_v36, %v2034_v21  ;;  %v2515_v21 = vunpack.c.h.bf16 %v2513_v54 }
0x28dd   :  { %2612 = vmatpush3.msra.mxu1 %v2515_v21 }
0x28de   :  { %2613 = vmatprep.subr.mxu1 %v2858_v1 }
0x28df   :  { %2614 = vmatpush3.msra.mxu1 %v2514_v23 }
0x293b   :  { %v2132_v37 = vpop.permute.xlu1 %2131 }
0x293c   :  { %v2134_v38 = vmul.f32 %v2749_v36, %v2132_v37 }
0x293e   :  { %2136 = vrot.lane.b32.xlu0 %v2134_v38, %s2861_s4 }
0x29b0   :  { %v2137_v44 = vpop.permute.xlu0 %2136 }
0x29b1   :  { %v2139_v39 = vadd.f32 %v2137_v44, %v2129_v45 }
0x29b3   :  { %2750 = vtanh.f32 %v2139_v39 }
0x29c0   :  { %v2751_v40 = vpop.eup %2750 }
0x29c1   :  { %2142 = vrot.lane.b32.xlu1 %v2751_v40, %s2855_s6 }
0x2a33   :  { %v2143_v41 = vpop.permute.xlu1 %2142 }
0x2a34   :  { %v2145_v42 = vmul.f32 %v2749_v36, %v2143_v41 }
0x2a36   :  { %2147 = vrot.lane.b32.xlu0 %v2145_v42, %s2861_s4 }
0x2aa8   :  { %v2148_v43 = vpop.permute.xlu0 %2147 }
0x2aa9   :  { %2150 = vst.msk [vmem:[#allocation5 + $0xc] sm:$0x3] %vm443_vm4, %v2148_v43  ;;  %2476 = vmatmul.mubr.msk.f32.vlgmr.msra.gmra.mxu0 %vm188_vm2, %v2148_v43 }
0x2ab0   :  { %v2304_v51 = vld [vmem:[#allocation5 + $0xc] sm:$0x1]  ;;  %v2266_v49 = vld [vmem:[#allocation5 + $0xd] sm:$0x1] }
0x2ab1   :  { %2305 = vst.msk [vmem:[#allocation7 + $0x6] sm:$0x1] %vm1195_vm5, %v2304_v51 }
0x2b69   :  { %v2219_v55 = vpop.f32.mrf.mxu0 }
0x2b6b   :  { %v2221_v60 = vpop.f32.mrf.mxu0 }
0x2b6c   :  { %v2224_v63 = vsel %vm192_vm3, %v2219_v55, %v2221_v60 }
0x2b6d   :  { %v2226_v5 = vadd.f32 %v2225_v0, %v2224_v63 }
0x2b6f   :  { %2752 = vtanh.f32 %v2226_v5  ;;  %v2477_v7 = vmul.f32 -1.442695, %v2226_v5 }
0x2b71   :  { %2754 = vpow2.f32 %v2477_v7 }
0x2b7c   :  { %v2753_v6 = vpop.eup %2752 }
0x2b7d   :  { %2236 = vrot.lane.b32.xlu1 %v2753_v6, %s2855_s6 }
0x2b7e   :  { %v2755_v8 = vpop.eup %2754 }
0x2b7f   :  { %v2230_v9 = vadd.f32 1.0, %v2755_v8 }
0x2b81   :  { %2756 = vrcp.f32 %v2230_v9 }
0x2b8e   :  { %v2757_v10 = vpop.eup %2756 }
0x2b8f   :  { %v2234_v13 = vmul.f32 %v2757_v10, %v2139_v39 }
0x2bef   :  { %v2237_v11 = vpop.permute.xlu1 %2236 }
0x2bf0   :  { %v2239_v12 = vmul.f32 %v2757_v10, %v2237_v11 }
0x2bf2   :  { %2241 = vrot.lane.b32.xlu0 %v2239_v12, %s2861_s4 }
0x2c64   :  { %v2242_v14 = vpop.permute.xlu0 %2241 }
0x2c65   :  { %v2244_v58 = vadd.f32 %v2242_v14, %v2234_v13 }
0x2c67   :  { %2758 = vtanh.f32 %v2244_v58 }
0x2c74   :  { %v2759_v15 = vpop.eup %2758 }
0x2c75   :  { %2247 = vrot.lane.b32.xlu1 %v2759_v15, %s2855_s6 }
0x2c79   :  { %2276 = vrot.lane.b32.xlu1 %v2274_v16, %s2861_s4 }
0x2c7d   :  { %2292 = vrot.lane.b32.xlu1 %v2290_v17, %s2861_s4 }
0x2ce7   :  { %v2248_v46 = vpop.permute.xlu1 %2247 }
0x2ce8   :  { %v2250_v18 = vmul.f32 %v2757_v10, %v2248_v46 }
0x2cea   :  { %2252 = vrot.lane.b32.xlu0 %v2250_v18, %s2861_s4 }
0x2ceb   :  { %v2277_v47 = vpop.permute.xlu1 %2276 }
0x2cec   :  { %2279 = vst.msk [vmem:[#allocation7 + $0x2] sm:$0x1] %vm1202_vm6, %v2277_v47 }
0x2cee   :  { %2268 = vrot.lane.b32.xlu0 %v2266_v49, %s2861_s4 }
0x2cef   :  { %v2293_v48 = vpop.permute.xlu1 %2292 }
0x2cf0   :  { %2295 = vst.msk [vmem:[#allocation7 + $0x4] sm:$0x1] %vm1202_vm6, %v2293_v48 }
0x2cf2   :  { %2284 = vrot.lane.b32.xlu0 %v2282_v61, %s2861_s4 }
0x2cf6   :  { %2300 = vrot.lane.b32.xlu0 %v2298_v56, %s2861_s4 }
0x2cfa   :  { %2316 = vrot.lane.b32.xlu0 %v2314_v57, %s2861_s4 }
0x2d5c   :  { %v2253_v4 = vpop.permute.xlu0 %2252 }
0x2d5d   :  { %2255 = vst.msk [vmem:[#allocation5 + $0xe] sm:$0x3] %vm443_vm4, %v2253_v4 }
0x2d60   :  { %v2269_v22 = vpop.permute.xlu0 %2268 }
0x2d61   :  { %2271 = vst.msk [vmem:[#allocation7 + $0x1] sm:$0x1] %vm1202_vm6, %v2269_v22 }
0x2d64   :  { %v2285_v24 = vpop.permute.xlu0 %2284  ;;  %v2258_v25 = vld [vmem:[#allocation5 + $0xf] sm:$0x1]  ;;  %v2312_v26 = vld [vmem:[#allocation5 + $0xe] sm:$0x1] }
0x2d65   :  { %2287 = vst.msk [vmem:[#allocation7 + $0x3] sm:$0x1] %vm1202_vm6, %v2285_v24  ;;  %2260 = vrot.lane.b32.xlu1 %v2258_v25, %s2861_s4 }
0x2d66   :  { %2313 = vst.msk [vmem:[#allocation7 + $0x7] sm:$0x1] %vm1195_vm5, %v2312_v26 }
0x2d68   :  { %v2301_v27 = vpop.permute.xlu0 %2300 }
0x2d69   :  { %2303 = vst.msk [vmem:[#allocation7 + $0x5] sm:$0x1] %vm1202_vm6, %v2301_v27  ;;  %2308 = vrot.lane.b32.xlu1 %v2306_v28, %s2861_s4 }
0x2d6c   :  { %v2317_v29 = vpop.permute.xlu0 %2316 }
0x2d6d   :  { %2319 = vst.msk [vmem:[#allocation7 + $0x7] sm:$0x1] %vm1202_vm6, %v2317_v29 }
0x2dd7   :  { %v2261_v30 = vpop.permute.xlu1 %2260 }
0x2dd8   :  { %2263 = vst.msk [vmem:[#allocation7] sm:$0x1] %vm1202_vm6, %v2261_v30 }
0x2ddb   :  { %v2309_v1 = vpop.permute.xlu1 %2308 }
0x2ddc   :  { %2311 = vst.msk [vmem:[#allocation7 + $0x6] sm:$0x1] %vm1202_vm6, %v2309_v1 }
0x2de3   :  { %v2320_v31 = vld [vmem:[#allocation7] sm:$0xff] }
0x2de4   :  { %2616 = vmatmul.mubr.msk.f32.vlgmr.msra.gmra.mxu1 %vm1297_vm7, %v2320_v31 }
0x2ea4   :  { %v2413_v33 = vpop.f32.mrf.mxu1 }
0x2ea5   :  { %v2414_v34 = vadd.f32 %v2478_v32, %v2413_v33 }
0x2ea6   :  { %v2617_v35 = vpop.f32.mrf.mxu1 }
0x2ea7   :  { %2417 = vmax.xlane.f32.xlu1 %v2414_v34 }
0x2f30   :  { %v2418_v36 = vpop.xlane.xlu1 %2417 }
0x2f31   :  { %v2419_v37 = vsub.f32 %v2414_v34, %v2418_v36 }
0x2f33   :  { %v2420_v38 = vmul.f32 1.442695, %v2419_v37 }
0x2f35   :  { %2760 = vpow2.f32 %v2420_v38 }
0x2f42   :  { %v2761_v45 = vpop.eup %2760 }
0x2f43   :  { %2422 = vadd.xlane.f32.xlu0 %v2761_v45 }
0x2fcc   :  { %v2423_v44 = vpop.xlane.xlu0 %2422 }
0x2fcd   :  { %2762 = vlog2.f32 %v2423_v44 }
0x2fda   :  { %v2763_v39 = vpop.eup %2762 }
0x2fdb   :  { %v2425_v40 = vmul.f32 0.6931472, %v2763_v39 }
0x2fdd   :  { %v2426_v41 = vsub.f32 %v2419_v37, %v2425_v40 }
0x2fdf   :  { %2427 = vst [vmem:[#allocation14] sm:$0xff] %v2426_v41 }
0x2fe0   :  { %2835 = shalt.err (!%p2832_p5)
}
0x2fe1   :  { %2437 = dma.vmem_to_hbm [thread:$0]  %s2435_s28, 128, %s3415_s10, [#allocation10]  }
0x2fe2   :  { %2848 = dma.done.wait [#allocation10], 128  }
0x2fe3   :  { %2849 = vsyncadd [#allocation10], 4294967168 }
0x2fe4   :  { %2441 = vsyncpa [#allocation9], 1 }
0x2fe5   :  { %2442 = vsyncpa [#allocation12], 1 }
0x2fe6   :  { %2443 = vsyncpa [#allocation10], 1 }

</bundles_post_ra>
